<compile_context>
chip_gen: v7x
topology: tpu7x:2x2x1
jax: 0.10.0
libtpu: 0.0.40
codegen_flags: <defaults>
</compile_context>

<pallas_src>
import functools

import numpy as np

import jax
import jax.numpy as jnp
from jax.experimental import pallas as pl
from jax.experimental.pallas import tpu as pltpu

BN_EPS = 1e-5
ALPHA = 0.125          # width multiplier of the reference model
CLASS_NUM = 10
STEM_K = 32            # 3*3*3 = 27 stem im2col taps, zero-padded to 32

_COMPILER_PARAMS = pltpu.CompilerParams(vmem_limit_bytes=32 * 1024 * 1024)


def _channels(n):
    return int(n * ALPHA)


# (kind, cin, cout, stride) for every block, as in the PyTorch reference.
_FULL_CFG = tuple(
    [("basic", 3, _channels(32), 2),                          # stem basic block
     ("ds", _channels(32), _channels(64), 1)]                 # stem DS block
    + [("ds", _channels(64), _channels(128), 2),
       ("ds", _channels(128), _channels(128), 1)]             # conv1
    + [("ds", _channels(128), _channels(256), 2),
       ("ds", _channels(256), _channels(256), 1)]             # conv2
    + [("ds", _channels(256), _channels(512), 2)]
    + [("ds", _channels(512), _channels(512), 1)] * 5         # conv3
    + [("ds", _channels(512), _channels(1024), 2),
       ("ds", _channels(1024), _channels(1024), 1)]           # conv4
)


# ------------------------------ fused kernel ---------------------------------


def _mobilenet_kernel(*refs, plan, n_weights):
    """Whole MobileNet forward.  refs = (patches, *weights, out, *scratch).

    Activations flow as values in the canonical 2-D layout described above.
    `plan` is a static per-block description (Python ints only)."""
    patches_ref = refs[0]
    w_refs = refs[1:1 + n_weights]
    out_ref = refs[1 + n_weights]
    scratch_refs = refs[2 + n_weights:]

    wcur = 0   # weight-operand cursor
    scur = 0   # scratch cursor
    x = None   # current activation, canonical 2-D layout

    for entry in plan:
        kind = entry["kind"]

        if kind == "head":
            bsz, hh, ww, ch = entry["B"], entry["h"], entry["w"], entry["c"]
            fcp = w_refs[wcur]; wcur += 1
            if hh == 1 and ww == 1:
                g = x                                   # global pool is identity
            else:                                       # generic spatial mean
                rows = None
                for i in range(hh):
                    blk = x[i * bsz:(i + 1) * bsz, :]
                    rows = blk if rows is None else rows + blk
                g = None
                for j in range(ww):
                    blk = rows[:, j * ch:(j + 1) * ch]
                    g = blk if g is None else g + blk
                g = g * (1.0 / float(hh * ww))
            logits = jnp.dot(g, fcp[0:ch, :], preferred_element_type=jnp.float32)
            out_ref[...] = logits + fcp[ch:ch + 1, :]
            continue

        if kind == "stem":
            # Full 3x3 conv (+folded BN + ReLU) on im2col patches: one matmul.
            k = entry["k"]
            wp = w_refs[wcur]; wcur += 1
            y = jnp.dot(patches_ref[...], wp[0:k, :],
                        preferred_element_type=jnp.float32)
            x = jnp.maximum(y + wp[k:k + 1, :], 0.0)

        else:  # depthwise-separable block
            bsz, cin = entry["B"], entry["cin"]
            ho, wo = entry["h_out"], entry["w_out"]
            dwp = w_refs[wcur]; wcur += 1          # (10, wo*cin): 9 taps + shift
            pwp = w_refs[wcur]; wcur += 1          # (wo*cin+1, wo*cout)
            pad = scratch_refs[scur]; scur += 1

            if entry["stride"] == 1:
                hi, wsp = entry["h_in"], entry["w_in"]
                pad[...] = jnp.zeros_like(pad)
                pad[bsz:bsz + hi * bsz, cin:cin + wsp * cin] = x

                def tap(dy, dx, _pad=pad, _b=bsz, _c=cin, _h=hi, _w=wsp):
                    return _pad[dy * _b:dy * _b + _h * _b,
                                dx * _c:dx * _c + _w * _c]
            else:
                # x is parity-blocked by the previous block:
                #   rows  = [even h | odd h],  lanes = [even w | odd w]
                rb, lc = ho * bsz, wo * cin
                pstride = (ho + 1) * bsz          # scratch rows per phase slab
                pad[...] = jnp.zeros_like(pad)
                quads = ((0, bsz, cin, x[rb:2 * rb, lc:2 * lc]),   # odd h, odd w
                         (1, bsz, 0,   x[rb:2 * rb, 0:lc]),        # odd h, even w
                         (2, 0,   cin, x[0:rb, lc:2 * lc]),        # even h, odd w
                         (3, 0,   0,   x[0:rb, 0:lc]))             # even h, even w
                for p, r0, c0, v in quads:
                    pad[p * pstride + r0:p * pstride + r0 + rb, c0:c0 + lc] = v

                def tap(dy, dx, _pad=pad, _b=bsz, _c=cin, _rb=rb, _lc=lc,
                        _ps=pstride):
                    p = (dy % 2) * 2 + (dx % 2)
                    r0 = _ps * p + (dy // 2) * _b
                    c0 = (dx // 2) * _c
                    return _pad[r0:r0 + _rb, c0:c0 + _lc]

            # depthwise 3x3 (+folded BN + ReLU): 9 lane-dense multiply-adds.
            acc = None
            for dy in range(3):
                for dx in range(3):
                    t = tap(dy, dx) * dwp[dy * 3 + dx:dy * 3 + dx + 1, :]
                    acc = t if acc is None else acc + t
            dwres = jnp.maximum(acc + dwp[9:10, :], 0.0)

            # pointwise 1x1 (+bias +folded BN + ReLU): one block-diagonal matmul.
            kdim = wo * cin
            y = jnp.dot(dwres, pwp[0:kdim, :], preferred_element_type=jnp.float32)
            x = jnp.maximum(y + pwp[kdim:kdim + 1, :], 0.0)

        if entry.get("rowperm", False):
            # Row-parity permutation (even h rows first) for the following
            # stride-2 block, done as one tiny matmul (no strided access).
            perm = w_refs[wcur]; wcur += 1
            x = jnp.dot(perm[...], x, preferred_element_type=jnp.float32)

    assert wcur == len(w_refs) and scur == len(scratch_refs)


# --------------------------- raw parameter init ------------------------------


def _bn_affine(key, c):
    k1, k2, k3, k4 = jax.random.split(key, 4)
    gamma = 1.0 + 0.1 * jax.random.normal(k1, (c,), jnp.float32)
    beta = 0.1 * jax.random.normal(k2, (c,), jnp.float32)
    mean = 0.1 * jax.random.normal(k3, (c,), jnp.float32)
    var = 1.0 + 0.1 * jax.random.uniform(k4, (c,), jnp.float32)
    scale = gamma * jax.lax.rsqrt(var + BN_EPS)
    shift = beta - mean * scale
    return scale, shift


def init_params(key, class_num=CLASS_NUM):
    """Synthetic parameters; inference-mode BatchNorm folded into the conv
    weights (scale) and a per-channel shift.  Pointwise-conv bias folded too."""
    keys = jax.random.split(key, len(_FULL_CFG) + 1)
    blocks = []
    for k, (kind, cin, cout, _) in zip(keys[:-1], _FULL_CFG):
        if kind == "basic":
            k1, k2 = jax.random.split(k)
            w = 0.1 * jax.random.normal(k1, (3, 3, cin, cout), jnp.float32)
            scale, shift = _bn_affine(k2, cout)
            blocks.append(dict(w=w * scale, shift=shift))
        else:
            k1, k2, k3, k4, k5 = jax.random.split(k, 5)
            dw = 0.1 * jax.random.normal(k1, (3, 3, cin), jnp.float32)
            dscale, dshift = _bn_affine(k2, cin)
            pw = 0.1 * jax.random.normal(k3, (cin, cout), jnp.float32)
            pbias = 0.1 * jax.random.normal(k4, (cout,), jnp.float32)
            pscale, pshift = _bn_affine(k5, cout)
            blocks.append(dict(dw=dw * dscale, dshift=dshift,
                               pw=pw * pscale,
                               pshift=pshift + pbias * pscale))
    kf1, kf2 = jax.random.split(keys[-1])
    fc_w = 0.1 * jax.random.normal(kf1, (_channels(1024), class_num), jnp.float32)
    fc_b = 0.1 * jax.random.normal(kf2, (class_num,), jnp.float32)
    return dict(blocks=blocks, fc_w=fc_w, fc_b=fc_b)


# --------------------- kernel-layout parameter preparation -------------------


def _perm_eye(n, parity):
    """(n, n) selection matrix: identity, or 'even columns first' if parity."""
    e = np.zeros((n, n), np.float32)
    for i in range(n):
        j = i if not parity else (i // 2 if i % 2 == 0 else n // 2 + i // 2)
        e[i, j] = 1.0
    return jnp.asarray(e)


def _row_parity_perm(h, b):
    """Permutation P with (P @ x) having even-h row-blocks first."""
    e = np.zeros((h, h), np.float32)
    for hh in range(h):
        new_h = hh // 2 if hh % 2 == 0 else h // 2 + hh // 2
        e[new_h, hh] = 1.0
    return jnp.kron(jnp.asarray(e), jnp.eye(b, dtype=jnp.float32))


def prepare_params(params, batch, height, width):
    """Fold/tile/pack parameters into the canonical-layout operands of the
    single fused kernel and build the static per-block plan + scratch list."""
    b = batch
    blocks = params["blocks"]
    n_cfg = len(_FULL_CFG)
    plan, weights, scratch = [], [], []
    h, w = height, width

    for i, ((kind, cin, cout, stride), p) in enumerate(zip(_FULL_CFG, blocks)):
        ho = (h - 1) // stride + 1
        wo = (w - 1) // stride + 1
        boundary = (i + 1 < n_cfg) and (_FULL_CFG[i + 1][3] == 2)
        if boundary:
            assert ho % 2 == 0 and wo % 2 == 0, "stride-2 block needs even input"
        rowperm = boundary and ho > 2          # permutation is identity for ho<=2

        if kind == "basic":
            assert 9 * cin <= STEM_K
            w9 = p["w"].reshape(9 * cin, cout)
            w9 = jnp.pad(w9, ((0, STEM_K - 9 * cin), (0, 0)))
            bd = jnp.kron(_perm_eye(wo, boundary), w9)      # (wo*K, wo*cout)
            wp = jnp.concatenate([bd, jnp.tile(p["shift"], wo)[None, :]], axis=0)
            weights.append(wp)
            plan.append(dict(kind="stem", k=wo * STEM_K, rowperm=rowperm))
        else:
            dw9 = p["dw"].reshape(9, cin)
            dwp = jnp.concatenate(
                [jnp.tile(dw9, (1, wo)),
                 jnp.tile(p["dshift"], wo)[None, :]], axis=0)       # (10, wo*cin)
            bd = jnp.kron(_perm_eye(wo, boundary), p["pw"])         # blockdiag
            pwp = jnp.concatenate([bd, jnp.tile(p["pshift"], wo)[None, :]],
                                  axis=0)                           # (wo*cin+1, wo*cout)
            weights.extend([dwp, pwp])
            if stride == 1:
                scratch.append(pltpu.VMEM(((h + 2) * b, (w + 2) * cin),
                                          jnp.float32))
            else:
                scratch.append(pltpu.VMEM((4 * (ho + 1) * b, (wo + 1) * cin),
                                          jnp.float32))
            plan.append(dict(kind="ds", stride=stride, B=b, cin=cin, cout=cout,
                             h_in=h, w_in=w, h_out=ho, w_out=wo,
                             rowperm=rowperm))
        if rowperm:
            weights.append(_row_parity_perm(ho, b))
        h, w = ho, wo

    c_last = _FULL_CFG[-1][2]
    fcp = jnp.concatenate([params["fc_w"], params["fc_b"][None, :]], axis=0)
    weights.append(fcp)
    plan.append(dict(kind="head", B=b, h=h, w=w, c=c_last))
    return tuple(plan), weights, scratch


# ------------------------------- wrappers ------------------------------------


def _stem_patches(x_nhwc, stride):
    """im2col for the stride-2 stem conv, emitted in the canonical 2-D layout
    (row = i*B + b, lane = j*STEM_K + tap).  XLA glue on the network input."""
    b, hh, ww, cin = x_nhwc.shape
    ho = (hh - 1) // stride + 1
    wo = (ww - 1) // stride + 1
    xpad = jnp.pad(x_nhwc, ((0, 0), (1, 1), (1, 1), (0, 0)))
    taps = []
    for dy in range(3):
        for dx in range(3):
            taps.append(jax.lax.slice(
                xpad, (0, dy, dx, 0),
                (b, dy + (ho - 1) * stride + 1, dx + (wo - 1) * stride + 1, cin),
                (1, stride, stride, 1)))
    pat = jnp.concatenate(taps, axis=-1)                      # (b, ho, wo, 9*cin)
    pat = jnp.pad(pat, ((0, 0), (0, 0), (0, 0), (0, STEM_K - 9 * cin)))
    pat = jnp.transpose(pat, (1, 0, 2, 3))                    # (ho, b, wo, K)
    return pat.reshape(ho * b, wo * STEM_K)


def build_forward(params, batch, height, width):
    """Returns (jitted forward fn, packed weight operands)."""
    plan, weights, scratch = prepare_params(params, batch, height, width)
    kernel = functools.partial(_mobilenet_kernel, plan=plan,
                               n_weights=len(weights))
    call = pl.pallas_call(
        kernel,
        out_shape=jax.ShapeDtypeStruct((batch, CLASS_NUM), jnp.float32),
        scratch_shapes=scratch,
        compiler_params=_COMPILER_PARAMS,
    )
    stem_stride = _FULL_CFG[0][3]

    def forward(weight_list, x_nchw):
        x = jnp.transpose(x_nchw, (0, 2, 3, 1)).astype(jnp.float32)   # -> NHWC
        patches = _stem_patches(x, stem_stride)
        return call(patches, *weight_list)

    return jax.jit(forward), weights


# ---------------------------------- main --------------------------------------


if __name__ == "__main__":
    key = jax.random.PRNGKey(0)
    kp, kx = jax.random.split(key)
    params = init_params(kp)
    x = jax.random.normal(kx, (2, 3, 32, 32), jnp.float32)     # NCHW input
    fwd, weights = build_forward(params, batch=2, height=32, width=32)
    out = jax.block_until_ready(fwd(weights, x))
    assert out.shape == (2, CLASS_NUM), out.shape
    assert bool(jnp.all(jnp.isfinite(out)))
    print("KERNEL_OK")
</pallas_src>

<mosaic_0001>
module attributes {stable_mosaic.version = 11 : i64} {
  func.func @_mobilenet_kernel(%arg0: memref<32x512xf32, #tpu.memory_space<vmem>>, %arg1: memref<513x64xf32, #tpu.memory_space<vmem>>, %arg2: memref<10x64xf32, #tpu.memory_space<vmem>>, %arg3: memref<65x128xf32, #tpu.memory_space<vmem>>, %arg4: memref<32x32xf32, #tpu.memory_space<vmem>>, %arg5: memref<10x64xf32, #tpu.memory_space<vmem>>, %arg6: memref<65x128xf32, #tpu.memory_space<vmem>>, %arg7: memref<10x128xf32, #tpu.memory_space<vmem>>, %arg8: memref<129x128xf32, #tpu.memory_space<vmem>>, %arg9: memref<16x16xf32, #tpu.memory_space<vmem>>, %arg10: memref<10x64xf32, #tpu.memory_space<vmem>>, %arg11: memref<65x128xf32, #tpu.memory_space<vmem>>, %arg12: memref<10x128xf32, #tpu.memory_space<vmem>>, %arg13: memref<129x128xf32, #tpu.memory_space<vmem>>, %arg14: memref<8x8xf32, #tpu.memory_space<vmem>>, %arg15: memref<10x64xf32, #tpu.memory_space<vmem>>, %arg16: memref<65x128xf32, #tpu.memory_space<vmem>>, %arg17: memref<10x128xf32, #tpu.memory_space<vmem>>, %arg18: memref<129x128xf32, #tpu.memory_space<vmem>>, %arg19: memref<10x128xf32, #tpu.memory_space<vmem>>, %arg20: memref<129x128xf32, #tpu.memory_space<vmem>>, %arg21: memref<10x128xf32, #tpu.memory_space<vmem>>, %arg22: memref<129x128xf32, #tpu.memory_space<vmem>>, %arg23: memref<10x128xf32, #tpu.memory_space<vmem>>, %arg24: memref<129x128xf32, #tpu.memory_space<vmem>>, %arg25: memref<10x128xf32, #tpu.memory_space<vmem>>, %arg26: memref<129x128xf32, #tpu.memory_space<vmem>>, %arg27: memref<10x64xf32, #tpu.memory_space<vmem>>, %arg28: memref<65x128xf32, #tpu.memory_space<vmem>>, %arg29: memref<10x128xf32, #tpu.memory_space<vmem>>, %arg30: memref<129x128xf32, #tpu.memory_space<vmem>>, %arg31: memref<129x10xf32, #tpu.memory_space<vmem>>, %arg32: memref<2x10xf32, #tpu.memory_space<vmem>>, %arg33: memref<36x72xf32, #tpu.memory_space<vmem>>, %arg34: memref<72x72xf32, #tpu.memory_space<vmem>>, %arg35: memref<20x160xf32, #tpu.memory_space<vmem>>, %arg36: memref<40x80xf32, #tpu.memory_space<vmem>>, %arg37: memref<12x192xf32, #tpu.memory_space<vmem>>, %arg38: memref<24x96xf32, #tpu.memory_space<vmem>>, %arg39: memref<8x256xf32, #tpu.memory_space<vmem>>, %arg40: memref<8x256xf32, #tpu.memory_space<vmem>>, %arg41: memref<8x256xf32, #tpu.memory_space<vmem>>, %arg42: memref<8x256xf32, #tpu.memory_space<vmem>>, %arg43: memref<8x256xf32, #tpu.memory_space<vmem>>, %arg44: memref<16x128xf32, #tpu.memory_space<vmem>>, %arg45: memref<6x384xf32, #tpu.memory_space<vmem>>) attributes {dimension_semantics = [], scalar_prefetch = 0 : i64, scratch_operands = 13 : i64, tpu.core_type = #tpu.core_type<tc>} {
    %c0 = arith.constant 0 : index
    %c0_0 = arith.constant 0 : index
    %0 = vector.load %arg0[%c0, %c0_0] : memref<32x512xf32, #tpu.memory_space<vmem>>, vector<32x512xf32>
    %c0_1 = arith.constant 0 : index
    %c0_2 = arith.constant 0 : index
    %1 = vector.load %arg1[%c0_1, %c0_2] : memref<513x64xf32, #tpu.memory_space<vmem>>, vector<512x64xf32>
    %cst = arith.constant dense<0.000000e+00> : vector<32x64xf32>
    %2 = tpu.matmul %0, %1, %cst {dimension_numbers = #tpu.dot_dimension_numbers<[1], [0], [0], [1], [0, 0, 1, 1], [], []>} : vector<32x512xf32>, vector<512x64xf32>, vector<32x64xf32> -> vector<32x64xf32>
    %c512 = arith.constant 512 : index
    %c0_3 = arith.constant 0 : index
    %3 = vector.load %arg1[%c512, %c0_3] : memref<513x64xf32, #tpu.memory_space<vmem>>, vector<1x64xf32>
    %4 = vector.broadcast %3 : vector<1x64xf32> to vector<32x64xf32>
    %5 = arith.addf %2, %4 : vector<32x64xf32>
    %cst_4 = arith.constant 0.000000e+00 : f32
    %6 = vector.broadcast %cst_4 : f32 to vector<32x64xf32>
    %7 = arith.maximumf %5, %6 : vector<32x64xf32>
    %cst_5 = arith.constant 0.000000e+00 : f32
    %8 = vector.broadcast %cst_5 : f32 to vector<36x72xf32>
    %c0_6 = arith.constant 0 : index
    %c0_7 = arith.constant 0 : index
    %9 = vector.load %arg33[%c0_6, %c0_7] : memref<36x72xf32, #tpu.memory_space<vmem>>, vector<36x72xf32>
    tpu.vector_store %arg33[%c0_6, %c0_7], %8 {strides = array<i32>} : memref<36x72xf32, #tpu.memory_space<vmem>>, vector<36x72xf32>,
    %c2 = arith.constant 2 : index
    %c4 = arith.constant 4 : index
    %10 = vector.load %arg33[%c2, %c4] : memref<36x72xf32, #tpu.memory_space<vmem>>, vector<32x64xf32>
    tpu.vector_store %arg33[%c2, %c4], %7 {strides = array<i32>} : memref<36x72xf32, #tpu.memory_space<vmem>>, vector<32x64xf32>,
    %c0_8 = arith.constant 0 : index
    %c0_9 = arith.constant 0 : index
    %11 = vector.load %arg33[%c0_8, %c0_9] : memref<36x72xf32, #tpu.memory_space<vmem>>, vector<32x64xf32>
    %c0_10 = arith.constant 0 : index
    %c0_11 = arith.constant 0 : index
    %12 = vector.load %arg2[%c0_10, %c0_11] : memref<10x64xf32, #tpu.memory_space<vmem>>, vector<1x64xf32>
    %13 = vector.broadcast %12 : vector<1x64xf32> to vector<32x64xf32>
    %14 = arith.mulf %11, %13 : vector<32x64xf32>
    %c0_12 = arith.constant 0 : index
    %c4_13 = arith.constant 4 : index
    %15 = vector.load %arg33[%c0_12, %c4_13] : memref<36x72xf32, #tpu.memory_space<vmem>>, vector<32x64xf32>
    %c1 = arith.constant 1 : index
    %c0_14 = arith.constant 0 : index
    %16 = vector.load %arg2[%c1, %c0_14] : memref<10x64xf32, #tpu.memory_space<vmem>>, vector<1x64xf32>
    %17 = vector.broadcast %16 : vector<1x64xf32> to vector<32x64xf32>
    %18 = arith.mulf %15, %17 : vector<32x64xf32>
    %19 = arith.addf %14, %18 : vector<32x64xf32>
    %c0_15 = arith.constant 0 : index
    %c8 = arith.constant 8 : index
    %20 = vector.load %arg33[%c0_15, %c8] : memref<36x72xf32, #tpu.memory_space<vmem>>, vector<32x64xf32>
    %c2_16 = arith.constant 2 : index
    %c0_17 = arith.constant 0 : index
    %21 = vector.load %arg2[%c2_16, %c0_17] : memref<10x64xf32, #tpu.memory_space<vmem>>, vector<1x64xf32>
    %22 = vector.broadcast %21 : vector<1x64xf32> to vector<32x64xf32>
    %23 = arith.mulf %20, %22 : vector<32x64xf32>
    %24 = arith.addf %19, %23 : vector<32x64xf32>
    %c2_18 = arith.constant 2 : index
    %c0_19 = arith.constant 0 : index
    %25 = vector.load %arg33[%c2_18, %c0_19] : memref<36x72xf32, #tpu.memory_space<vmem>>, vector<32x64xf32>
    %c3 = arith.constant 3 : index
    %c0_20 = arith.constant 0 : index
    %26 = vector.load %arg2[%c3, %c0_20] : memref<10x64xf32, #tpu.memory_space<vmem>>, vector<1x64xf32>
    %27 = vector.broadcast %26 : vector<1x64xf32> to vector<32x64xf32>
    %28 = arith.mulf %25, %27 : vector<32x64xf32>
    %29 = arith.addf %24, %28 : vector<32x64xf32>
    %c2_21 = arith.constant 2 : index
    %c4_22 = arith.constant 4 : index
    %30 = vector.load %arg33[%c2_21, %c4_22] : memref<36x72xf32, #tpu.memory_space<vmem>>, vector<32x64xf32>
    %c4_23 = arith.constant 4 : index
    %c0_24 = arith.constant 0 : index
    %31 = vector.load %arg2[%c4_23, %c0_24] : memref<10x64xf32, #tpu.memory_space<vmem>>, vector<1x64xf32>
    %32 = vector.broadcast %31 : vector<1x64xf32> to vector<32x64xf32>
    %33 = arith.mulf %30, %32 : vector<32x64xf32>
    %34 = arith.addf %29, %33 : vector<32x64xf32>
    %c2_25 = arith.constant 2 : index
    %c8_26 = arith.constant 8 : index
    %35 = vector.load %arg33[%c2_25, %c8_26] : memref<36x72xf32, #tpu.memory_space<vmem>>, vector<32x64xf32>
    %c5 = arith.constant 5 : index
    %c0_27 = arith.constant 0 : index
    %36 = vector.load %arg2[%c5, %c0_27] : memref<10x64xf32, #tpu.memory_space<vmem>>, vector<1x64xf32>
    %37 = vector.broadcast %36 : vector<1x64xf32> to vector<32x64xf32>
    %38 = arith.mulf %35, %37 : vector<32x64xf32>
    %39 = arith.addf %34, %38 : vector<32x64xf32>
    %c4_28 = arith.constant 4 : index
    %c0_29 = arith.constant 0 : index
    %40 = vector.load %arg33[%c4_28, %c0_29] : memref<36x72xf32, #tpu.memory_space<vmem>>, vector<32x64xf32>
    %c6 = arith.constant 6 : index
    %c0_30 = arith.constant 0 : index
    %41 = vector.load %arg2[%c6, %c0_30] : memref<10x64xf32, #tpu.memory_space<vmem>>, vector<1x64xf32>
    %42 = vector.broadcast %41 : vector<1x64xf32> to vector<32x64xf32>
    %43 = arith.mulf %40, %42 : vector<32x64xf32>
    %44 = arith.addf %39, %43 : vector<32x64xf32>
    %c4_31 = arith.constant 4 : index
    %c4_32 = arith.constant 4 : index
    %45 = vector.load %arg33[%c4_31, %c4_32] : memref<36x72xf32, #tpu.memory_space<vmem>>, vector<32x64xf32>
    %c7 = arith.constant 7 : index
    %c0_33 = arith.constant 0 : index
    %46 = vector.load %arg2[%c7, %c0_33] : memref<10x64xf32, #tpu.memory_space<vmem>>, vector<1x64xf32>
    %47 = vector.broadcast %46 : vector<1x64xf32> to vector<32x64xf32>
    %48 = arith.mulf %45, %47 : vector<32x64xf32>
    %49 = arith.addf %44, %48 : vector<32x64xf32>
    %c4_34 = arith.constant 4 : index
    %c8_35 = arith.constant 8 : index
    %50 = vector.load %arg33[%c4_34, %c8_35] : memref<36x72xf32, #tpu.memory_space<vmem>>, vector<32x64xf32>
    %c8_36 = arith.constant 8 : index
    %c0_37 = arith.constant 0 : index
    %51 = vector.load %arg2[%c8_36, %c0_37] : memref<10x64xf32, #tpu.memory_space<vmem>>, vector<1x64xf32>
    %52 = vector.broadcast %51 : vector<1x64xf32> to vector<32x64xf32>
    %53 = arith.mulf %50, %52 : vector<32x64xf32>
    %54 = arith.addf %49, %53 : vector<32x64xf32>
    %c9 = arith.constant 9 : index
    %c0_38 = arith.constant 0 : index
    %55 = vector.load %arg2[%c9, %c0_38] : memref<10x64xf32, #tpu.memory_space<vmem>>, vector<1x64xf32>
    %56 = vector.broadcast %55 : vector<1x64xf32> to vector<32x64xf32>
    %57 = arith.addf %54, %56 : vector<32x64xf32>
    %cst_39 = arith.constant 0.000000e+00 : f32
    %58 = vector.broadcast %cst_39 : f32 to vector<32x64xf32>
    %59 = arith.maximumf %57, %58 : vector<32x64xf32>
    %c0_40 = arith.constant 0 : index
    %c0_41 = arith.constant 0 : index
    %60 = vector.load %arg3[%c0_40, %c0_41] : memref<65x128xf32, #tpu.memory_space<vmem>>, vector<64x128xf32>
    %cst_42 = arith.constant dense<0.000000e+00> : vector<32x128xf32>
    %61 = tpu.matmul %59, %60, %cst_42 {dimension_numbers = #tpu.dot_dimension_numbers<[1], [0], [0], [1], [0, 0, 1, 1], [], []>} : vector<32x64xf32>, vector<64x128xf32>, vector<32x128xf32> -> vector<32x128xf32>
    %c64 = arith.constant 64 : index
    %c0_43 = arith.constant 0 : index
    %62 = vector.load %arg3[%c64, %c0_43] : memref<65x128xf32, #tpu.memory_space<vmem>>, vector<1x128xf32>
    %63 = vector.broadcast %62 : vector<1x128xf32> to vector<32x128xf32>
    %64 = arith.addf %61, %63 : vector<32x128xf32>
    %cst_44 = arith.constant 0.000000e+00 : f32
    %65 = vector.broadcast %cst_44 : f32 to vector<32x128xf32>
    %66 = arith.maximumf %64, %65 : vector<32x128xf32>
    %c0_45 = arith.constant 0 : index
    %c0_46 = arith.constant 0 : index
    %67 = vector.load %arg4[%c0_45, %c0_46] : memref<32x32xf32, #tpu.memory_space<vmem>>, vector<32x32xf32>
    %cst_47 = arith.constant dense<0.000000e+00> : vector<32x128xf32>
    %68 = tpu.matmul %67, %66, %cst_47 {dimension_numbers = #tpu.dot_dimension_numbers<[1], [0], [0], [1], [0, 0, 1, 1], [], []>} : vector<32x32xf32>, vector<32x128xf32>, vector<32x128xf32> -> vector<32x128xf32>
    %cst_48 = arith.constant 0.000000e+00 : f32
    %69 = vector.broadcast %cst_48 : f32 to vector<72x72xf32>
    %c0_49 = arith.constant 0 : index
    %c0_50 = arith.constant 0 : index
    %70 = vector.load %arg34[%c0_49, %c0_50] : memref<72x72xf32, #tpu.memory_space<vmem>>, vector<72x72xf32>
    tpu.vector_store %arg34[%c0_49, %c0_50], %69 {strides = array<i32>} : memref<72x72xf32, #tpu.memory_space<vmem>>, vector<72x72xf32>,
    %71 = vector.extract_strided_slice %68 {offsets = [16, 64], sizes = [16, 64], strides = [1, 1]} : vector<32x128xf32> to vector<16x64xf32>
    %72 = vector.extract_strided_slice %68 {offsets = [16, 0], sizes = [16, 64], strides = [1, 1]} : vector<32x128xf32> to vector<16x64xf32>
    %73 = vector.extract_strided_slice %68 {offsets = [0, 64], sizes = [16, 64], strides = [1, 1]} : vector<32x128xf32> to vector<16x64xf32>
    %74 = vector.extract_strided_slice %68 {offsets = [0, 0], sizes = [16, 64], strides = [1, 1]} : vector<32x128xf32> to vector<16x64xf32>
    %c2_51 = arith.constant 2 : index
    %c8_52 = arith.constant 8 : index
    %75 = vector.load %arg34[%c2_51, %c8_52] : memref<72x72xf32, #tpu.memory_space<vmem>>, vector<16x64xf32>
    tpu.vector_store %arg34[%c2_51, %c8_52], %71 {strides = array<i32>} : memref<72x72xf32, #tpu.memory_space<vmem>>, vector<16x64xf32>,
    %c20 = arith.constant 20 : index
    %c0_53 = arith.constant 0 : index
    %76 = vector.load %arg34[%c20, %c0_53] : memref<72x72xf32, #tpu.memory_space<vmem>>, vector<16x64xf32>
    tpu.vector_store %arg34[%c20, %c0_53], %72 {strides = array<i32>} : memref<72x72xf32, #tpu.memory_space<vmem>>, vector<16x64xf32>,
    %c36 = arith.constant 36 : index
    %c8_54 = arith.constant 8 : index
    %77 = vector.load %arg34[%c36, %c8_54] : memref<72x72xf32, #tpu.memory_space<vmem>>, vector<16x64xf32>
    tpu.vector_store %arg34[%c36, %c8_54], %73 {strides = array<i32>} : memref<72x72xf32, #tpu.memory_space<vmem>>, vector<16x64xf32>,
    %c54 = arith.constant 54 : index
    %c0_55 = arith.constant 0 : index
    %78 = vector.load %arg34[%c54, %c0_55] : memref<72x72xf32, #tpu.memory_space<vmem>>, vector<16x64xf32>
    tpu.vector_store %arg34[%c54, %c0_55], %74 {strides = array<i32>} : memref<72x72xf32, #tpu.memory_space<vmem>>, vector<16x64xf32>,
    %c0_56 = arith.constant 0 : index
    %c0_57 = arith.constant 0 : index
    %79 = vector.load %arg34[%c0_56, %c0_57] : memref<72x72xf32, #tpu.memory_space<vmem>>, vector<16x64xf32>
    %c0_58 = arith.constant 0 : index
    %c0_59 = arith.constant 0 : index
    %80 = vector.load %arg5[%c0_58, %c0_59] : memref<10x64xf32, #tpu.memory_space<vmem>>, vector<1x64xf32>
    %81 = vector.broadcast %80 : vector<1x64xf32> to vector<16x64xf32>
    %82 = arith.mulf %79, %81 : vector<16x64xf32>
    %c18 = arith.constant 18 : index
    %c0_60 = arith.constant 0 : index
    %83 = vector.load %arg34[%c18, %c0_60] : memref<72x72xf32, #tpu.memory_space<vmem>>, vector<16x64xf32>
    %c1_61 = arith.constant 1 : index
    %c0_62 = arith.constant 0 : index
    %84 = vector.load %arg5[%c1_61, %c0_62] : memref<10x64xf32, #tpu.memory_space<vmem>>, vector<1x64xf32>
    %85 = vector.broadcast %84 : vector<1x64xf32> to vector<16x64xf32>
    %86 = arith.mulf %83, %85 : vector<16x64xf32>
    %87 = arith.addf %82, %86 : vector<16x64xf32>
    %c0_63 = arith.constant 0 : index
    %c8_64 = arith.constant 8 : index
    %88 = vector.load %arg34[%c0_63, %c8_64] : memref<72x72xf32, #tpu.memory_space<vmem>>, vector<16x64xf32>
    %c2_65 = arith.constant 2 : index
    %c0_66 = arith.constant 0 : index
    %89 = vector.load %arg5[%c2_65, %c0_66] : memref<10x64xf32, #tpu.memory_space<vmem>>, vector<1x64xf32>
    %90 = vector.broadcast %89 : vector<1x64xf32> to vector<16x64xf32>
    %91 = arith.mulf %88, %90 : vector<16x64xf32>
    %92 = arith.addf %87, %91 : vector<16x64xf32>
    %c36_67 = arith.constant 36 : index
    %c0_68 = arith.constant 0 : index
    %93 = vector.load %arg34[%c36_67, %c0_68] : memref<72x72xf32, #tpu.memory_space<vmem>>, vector<16x64xf32>
    %c3_69 = arith.constant 3 : index
    %c0_70 = arith.constant 0 : index
    %94 = vector.load %arg5[%c3_69, %c0_70] : memref<10x64xf32, #tpu.memory_space<vmem>>, vector<1x64xf32>
    %95 = vector.broadcast %94 : vector<1x64xf32> to vector<16x64xf32>
    %96 = arith.mulf %93, %95 : vector<16x64xf32>
    %97 = arith.addf %92, %96 : vector<16x64xf32>
    %c54_71 = arith.constant 54 : index
    %c0_72 = arith.constant 0 : index
    %98 = vector.load %arg34[%c54_71, %c0_72] : memref<72x72xf32, #tpu.memory_space<vmem>>, vector<16x64xf32>
    %c4_73 = arith.constant 4 : index
    %c0_74 = arith.constant 0 : index
    %99 = vector.load %arg5[%c4_73, %c0_74] : memref<10x64xf32, #tpu.memory_space<vmem>>, vector<1x64xf32>
    %100 = vector.broadcast %99 : vector<1x64xf32> to vector<16x64xf32>
    %101 = arith.mulf %98, %100 : vector<16x64xf32>
    %102 = arith.addf %97, %101 : vector<16x64xf32>
    %c36_75 = arith.constant 36 : index
    %c8_76 = arith.constant 8 : index
    %103 = vector.load %arg34[%c36_75, %c8_76] : memref<72x72xf32, #tpu.memory_space<vmem>>, vector<16x64xf32>
    %c5_77 = arith.constant 5 : index
    %c0_78 = arith.constant 0 : index
    %104 = vector.load %arg5[%c5_77, %c0_78] : memref<10x64xf32, #tpu.memory_space<vmem>>, vector<1x64xf32>
    %105 = vector.broadcast %104 : vector<1x64xf32> to vector<16x64xf32>
    %106 = arith.mulf %103, %105 : vector<16x64xf32>
    %107 = arith.addf %102, %106 : vector<16x64xf32>
    %c2_79 = arith.constant 2 : index
    %c0_80 = arith.constant 0 : index
    %108 = vector.load %arg34[%c2_79, %c0_80] : memref<72x72xf32, #tpu.memory_space<vmem>>, vector<16x64xf32>
    %c6_81 = arith.constant 6 : index
    %c0_82 = arith.constant 0 : index
    %109 = vector.load %arg5[%c6_81, %c0_82] : memref<10x64xf32, #tpu.memory_space<vmem>>, vector<1x64xf32>
    %110 = vector.broadcast %109 : vector<1x64xf32> to vector<16x64xf32>
    %111 = arith.mulf %108, %110 : vector<16x64xf32>
    %112 = arith.addf %107, %111 : vector<16x64xf32>
    %c20_83 = arith.constant 20 : index
    %c0_84 = arith.constant 0 : index
    %113 = vector.load %arg34[%c20_83, %c0_84] : memref<72x72xf32, #tpu.memory_space<vmem>>, vector<16x64xf32>
    %c7_85 = arith.constant 7 : index
    %c0_86 = arith.constant 0 : index
    %114 = vector.load %arg5[%c7_85, %c0_86] : memref<10x64xf32, #tpu.memory_space<vmem>>, vector<1x64xf32>
    %115 = vector.broadcast %114 : vector<1x64xf32> to vector<16x64xf32>
    %116 = arith.mulf %113, %115 : vector<16x64xf32>
    %117 = arith.addf %112, %116 : vector<16x64xf32>
    %c2_87 = arith.constant 2 : index
    %c8_88 = arith.constant 8 : index
    %118 = vector.load %arg34[%c2_87, %c8_88] : memref<72x72xf32, #tpu.memory_space<vmem>>, vector<16x64xf32>
    %c8_89 = arith.constant 8 : index
    %c0_90 = arith.constant 0 : index
    %119 = vector.load %arg5[%c8_89, %c0_90] : memref<10x64xf32, #tpu.memory_space<vmem>>, vector<1x64xf32>
    %120 = vector.broadcast %119 : vector<1x64xf32> to vector<16x64xf32>
    %121 = arith.mulf %118, %120 : vector<16x64xf32>
    %122 = arith.addf %117, %121 : vector<16x64xf32>
    %c9_91 = arith.constant 9 : index
    %c0_92 = arith.constant 0 : index
    %123 = vector.load %arg5[%c9_91, %c0_92] : memref<10x64xf32, #tpu.memory_space<vmem>>, vector<1x64xf32>
    %124 = vector.broadcast %123 : vector<1x64xf32> to vector<16x64xf32>
    %125 = arith.addf %122, %124 : vector<16x64xf32>
    %cst_93 = arith.constant 0.000000e+00 : f32
    %126 = vector.broadcast %cst_93 : f32 to vector<16x64xf32>
    %127 = arith.maximumf %125, %126 : vector<16x64xf32>
    %c0_94 = arith.constant 0 : index
    %c0_95 = arith.constant 0 : index
    %128 = vector.load %arg6[%c0_94, %c0_95] : memref<65x128xf32, #tpu.memory_space<vmem>>, vector<64x128xf32>
    %cst_96 = arith.constant dense<0.000000e+00> : vector<16x128xf32>
    %129 = tpu.matmul %127, %128, %cst_96 {dimension_numbers = #tpu.dot_dimension_numbers<[1], [0], [0], [1], [0, 0, 1, 1], [], []>} : vector<16x64xf32>, vector<64x128xf32>, vector<16x128xf32> -> vector<16x128xf32>
    %c64_97 = arith.constant 64 : index
    %c0_98 = arith.constant 0 : index
    %130 = vector.load %arg6[%c64_97, %c0_98] : memref<65x128xf32, #tpu.memory_space<vmem>>, vector<1x128xf32>
    %131 = vector.broadcast %130 : vector<1x128xf32> to vector<16x128xf32>
    %132 = arith.addf %129, %131 : vector<16x128xf32>
    %cst_99 = arith.constant 0.000000e+00 : f32
    %133 = vector.broadcast %cst_99 : f32 to vector<16x128xf32>
    %134 = arith.maximumf %132, %133 : vector<16x128xf32>
    %cst_100 = arith.constant 0.000000e+00 : f32
    %135 = vector.broadcast %cst_100 : f32 to vector<20x160xf32>
    %c0_101 = arith.constant 0 : index
    %c0_102 = arith.constant 0 : index
    %136 = vector.load %arg35[%c0_101, %c0_102] : memref<20x160xf32, #tpu.memory_space<vmem>>, vector<20x160xf32>
    tpu.vector_store %arg35[%c0_101, %c0_102], %135 {strides = array<i32>} : memref<20x160xf32, #tpu.memory_space<vmem>>, vector<20x160xf32>,
    %c2_103 = arith.constant 2 : index
    %c16 = arith.constant 16 : index
    %137 = vector.load %arg35[%c2_103, %c16] : memref<20x160xf32, #tpu.memory_space<vmem>>, vector<16x128xf32>
    tpu.vector_store %arg35[%c2_103, %c16], %134 {strides = array<i32>} : memref<20x160xf32, #tpu.memory_space<vmem>>, vector<16x128xf32>,
    %c0_104 = arith.constant 0 : index
    %c0_105 = arith.constant 0 : index
    %138 = vector.load %arg35[%c0_104, %c0_105] : memref<20x160xf32, #tpu.memory_space<vmem>>, vector<16x128xf32>
    %c0_106 = arith.constant 0 : index
    %c0_107 = arith.constant 0 : index
    %139 = vector.load %arg7[%c0_106, %c0_107] : memref<10x128xf32, #tpu.memory_space<vmem>>, vector<1x128xf32>
    %140 = vector.broadcast %139 : vector<1x128xf32> to vector<16x128xf32>
    %141 = arith.mulf %138, %140 : vector<16x128xf32>
    %c0_108 = arith.constant 0 : index
    %c16_109 = arith.constant 16 : index
    %142 = vector.load %arg35[%c0_108, %c16_109] : memref<20x160xf32, #tpu.memory_space<vmem>>, vector<16x128xf32>
    %c1_110 = arith.constant 1 : index
    %c0_111 = arith.constant 0 : index
    %143 = vector.load %arg7[%c1_110, %c0_111] : memref<10x128xf32, #tpu.memory_space<vmem>>, vector<1x128xf32>
    %144 = vector.broadcast %143 : vector<1x128xf32> to vector<16x128xf32>
    %145 = arith.mulf %142, %144 : vector<16x128xf32>
    %146 = arith.addf %141, %145 : vector<16x128xf32>
    %c0_112 = arith.constant 0 : index
    %c32 = arith.constant 32 : index
    %147 = vector.load %arg35[%c0_112, %c32] : memref<20x160xf32, #tpu.memory_space<vmem>>, vector<16x128xf32>
    %c2_113 = arith.constant 2 : index
    %c0_114 = arith.constant 0 : index
    %148 = vector.load %arg7[%c2_113, %c0_114] : memref<10x128xf32, #tpu.memory_space<vmem>>, vector<1x128xf32>
    %149 = vector.broadcast %148 : vector<1x128xf32> to vector<16x128xf32>
    %150 = arith.mulf %147, %149 : vector<16x128xf32>
    %151 = arith.addf %146, %150 : vector<16x128xf32>
    %c2_115 = arith.constant 2 : index
    %c0_116 = arith.constant 0 : index
    %152 = vector.load %arg35[%c2_115, %c0_116] : memref<20x160xf32, #tpu.memory_space<vmem>>, vector<16x128xf32>
    %c3_117 = arith.constant 3 : index
    %c0_118 = arith.constant 0 : index
    %153 = vector.load %arg7[%c3_117, %c0_118] : memref<10x128xf32, #tpu.memory_space<vmem>>, vector<1x128xf32>
    %154 = vector.broadcast %153 : vector<1x128xf32> to vector<16x128xf32>
    %155 = arith.mulf %152, %154 : vector<16x128xf32>
    %156 = arith.addf %151, %155 : vector<16x128xf32>
    %c2_119 = arith.constant 2 : index
    %c16_120 = arith.constant 16 : index
    %157 = vector.load %arg35[%c2_119, %c16_120] : memref<20x160xf32, #tpu.memory_space<vmem>>, vector<16x128xf32>
    %c4_121 = arith.constant 4 : index
    %c0_122 = arith.constant 0 : index
    %158 = vector.load %arg7[%c4_121, %c0_122] : memref<10x128xf32, #tpu.memory_space<vmem>>, vector<1x128xf32>
    %159 = vector.broadcast %158 : vector<1x128xf32> to vector<16x128xf32>
    %160 = arith.mulf %157, %159 : vector<16x128xf32>
    %161 = arith.addf %156, %160 : vector<16x128xf32>
    %c2_123 = arith.constant 2 : index
    %c32_124 = arith.constant 32 : index
    %162 = vector.load %arg35[%c2_123, %c32_124] : memref<20x160xf32, #tpu.memory_space<vmem>>, vector<16x128xf32>
    %c5_125 = arith.constant 5 : index
    %c0_126 = arith.constant 0 : index
    %163 = vector.load %arg7[%c5_125, %c0_126] : memref<10x128xf32, #tpu.memory_space<vmem>>, vector<1x128xf32>
    %164 = vector.broadcast %163 : vector<1x128xf32> to vector<16x128xf32>
    %165 = arith.mulf %162, %164 : vector<16x128xf32>
    %166 = arith.addf %161, %165 : vector<16x128xf32>
    %c4_127 = arith.constant 4 : index
    %c0_128 = arith.constant 0 : index
    %167 = vector.load %arg35[%c4_127, %c0_128] : memref<20x160xf32, #tpu.memory_space<vmem>>, vector<16x128xf32>
    %c6_129 = arith.constant 6 : index
    %c0_130 = arith.constant 0 : index
    %168 = vector.load %arg7[%c6_129, %c0_130] : memref<10x128xf32, #tpu.memory_space<vmem>>, vector<1x128xf32>
    %169 = vector.broadcast %168 : vector<1x128xf32> to vector<16x128xf32>
    %170 = arith.mulf %167, %169 : vector<16x128xf32>
    %171 = arith.addf %166, %170 : vector<16x128xf32>
    %c4_131 = arith.constant 4 : index
    %c16_132 = arith.constant 16 : index
    %172 = vector.load %arg35[%c4_131, %c16_132] : memref<20x160xf32, #tpu.memory_space<vmem>>, vector<16x128xf32>
    %c7_133 = arith.constant 7 : index
    %c0_134 = arith.constant 0 : index
    %173 = vector.load %arg7[%c7_133, %c0_134] : memref<10x128xf32, #tpu.memory_space<vmem>>, vector<1x128xf32>
    %174 = vector.broadcast %173 : vector<1x128xf32> to vector<16x128xf32>
    %175 = arith.mulf %172, %174 : vector<16x128xf32>
    %176 = arith.addf %171, %175 : vector<16x128xf32>
    %c4_135 = arith.constant 4 : index
    %c32_136 = arith.constant 32 : index
    %177 = vector.load %arg35[%c4_135, %c32_136] : memref<20x160xf32, #tpu.memory_space<vmem>>, vector<16x128xf32>
    %c8_137 = arith.constant 8 : index
    %c0_138 = arith.constant 0 : index
    %178 = vector.load %arg7[%c8_137, %c0_138] : memref<10x128xf32, #tpu.memory_space<vmem>>, vector<1x128xf32>
    %179 = vector.broadcast %178 : vector<1x128xf32> to vector<16x128xf32>
    %180 = arith.mulf %177, %179 : vector<16x128xf32>
    %181 = arith.addf %176, %180 : vector<16x128xf32>
    %c9_139 = arith.constant 9 : index
    %c0_140 = arith.constant 0 : index
    %182 = vector.load %arg7[%c9_139, %c0_140] : memref<10x128xf32, #tpu.memory_space<vmem>>, vector<1x128xf32>
    %183 = vector.broadcast %182 : vector<1x128xf32> to vector<16x128xf32>
    %184 = arith.addf %181, %183 : vector<16x128xf32>
    %cst_141 = arith.constant 0.000000e+00 : f32
    %185 = vector.broadcast %cst_141 : f32 to vector<16x128xf32>
    %186 = arith.maximumf %184, %185 : vector<16x128xf32>
    %c0_142 = arith.constant 0 : index
    %c0_143 = arith.constant 0 : index
    %187 = vector.load %arg8[%c0_142, %c0_143] : memref<129x128xf32, #tpu.memory_space<vmem>>, vector<128x128xf32>
    %cst_144 = arith.constant dense<0.000000e+00> : vector<16x128xf32>
    %188 = tpu.matmul %186, %187, %cst_144 {dimension_numbers = #tpu.dot_dimension_numbers<[1], [0], [0], [1], [0, 0, 1, 1], [], []>} : vector<16x128xf32>, vector<128x128xf32>, vector<16x128xf32> -> vector<16x128xf32>
    %c128 = arith.constant 128 : index
    %c0_145 = arith.constant 0 : index
    %189 = vector.load %arg8[%c128, %c0_145] : memref<129x128xf32, #tpu.memory_space<vmem>>, vector<1x128xf32>
    %190 = vector.broadcast %189 : vector<1x128xf32> to vector<16x128xf32>
    %191 = arith.addf %188, %190 : vector<16x128xf32>
    %cst_146 = arith.constant 0.000000e+00 : f32
    %192 = vector.broadcast %cst_146 : f32 to vector<16x128xf32>
    %193 = arith.maximumf %191, %192 : vector<16x128xf32>
    %c0_147 = arith.constant 0 : index
    %c0_148 = arith.constant 0 : index
    %194 = vector.load %arg9[%c0_147, %c0_148] : memref<16x16xf32, #tpu.memory_space<vmem>>, vector<16x16xf32>
    %cst_149 = arith.constant dense<0.000000e+00> : vector<16x128xf32>
    %195 = tpu.matmul %194, %193, %cst_149 {dimension_numbers = #tpu.dot_dimension_numbers<[1], [0], [0], [1], [0, 0, 1, 1], [], []>} : vector<16x16xf32>, vector<16x128xf32>, vector<16x128xf32> -> vector<16x128xf32>
    %cst_150 = arith.constant 0.000000e+00 : f32
    %196 = vector.broadcast %cst_150 : f32 to vector<40x80xf32>
    %c0_151 = arith.constant 0 : index
    %c0_152 = arith.constant 0 : index
    %197 = vector.load %arg36[%c0_151, %c0_152] : memref<40x80xf32, #tpu.memory_space<vmem>>, vector<40x80xf32>
    tpu.vector_store %arg36[%c0_151, %c0_152], %196 {strides = array<i32>} : memref<40x80xf32, #tpu.memory_space<vmem>>, vector<40x80xf32>,
    %198 = vector.extract_strided_slice %195 {offsets = [8, 64], sizes = [8, 64], strides = [1, 1]} : vector<16x128xf32> to vector<8x64xf32>
    %199 = vector.extract_strided_slice %195 {offsets = [8, 0], sizes = [8, 64], strides = [1, 1]} : vector<16x128xf32> to vector<8x64xf32>
    %200 = vector.extract_strided_slice %195 {offsets = [0, 64], sizes = [8, 64], strides = [1, 1]} : vector<16x128xf32> to vector<8x64xf32>
    %201 = vector.extract_strided_slice %195 {offsets = [0, 0], sizes = [8, 64], strides = [1, 1]} : vector<16x128xf32> to vector<8x64xf32>
    %c2_153 = arith.constant 2 : index
    %c16_154 = arith.constant 16 : index
    %202 = vector.load %arg36[%c2_153, %c16_154] : memref<40x80xf32, #tpu.memory_space<vmem>>, vector<8x64xf32>
    tpu.vector_store %arg36[%c2_153, %c16_154], %198 {strides = array<i32>} : memref<40x80xf32, #tpu.memory_space<vmem>>, vector<8x64xf32>,
    %c12 = arith.constant 12 : index
    %c0_155 = arith.constant 0 : index
    %203 = vector.load %arg36[%c12, %c0_155] : memref<40x80xf32, #tpu.memory_space<vmem>>, vector<8x64xf32>
    tpu.vector_store %arg36[%c12, %c0_155], %199 {strides = array<i32>} : memref<40x80xf32, #tpu.memory_space<vmem>>, vector<8x64xf32>,
    %c20_156 = arith.constant 20 : index
    %c16_157 = arith.constant 16 : index
    %204 = vector.load %arg36[%c20_156, %c16_157] : memref<40x80xf32, #tpu.memory_space<vmem>>, vector<8x64xf32>
    tpu.vector_store %arg36[%c20_156, %c16_157], %200 {strides = array<i32>} : memref<40x80xf32, #tpu.memory_space<vmem>>, vector<8x64xf32>,
    %c30 = arith.constant 30 : index
    %c0_158 = arith.constant 0 : index
    %205 = vector.load %arg36[%c30, %c0_158] : memref<40x80xf32, #tpu.memory_space<vmem>>, vector<8x64xf32>
    tpu.vector_store %arg36[%c30, %c0_158], %201 {strides = array<i32>} : memref<40x80xf32, #tpu.memory_space<vmem>>, vector<8x64xf32>,
    %c0_159 = arith.constant 0 : index
    %c0_160 = arith.constant 0 : index
    %206 = vector.load %arg36[%c0_159, %c0_160] : memref<40x80xf32, #tpu.memory_space<vmem>>, vector<8x64xf32>
    %c0_161 = arith.constant 0 : index
    %c0_162 = arith.constant 0 : index
    %207 = vector.load %arg10[%c0_161, %c0_162] : memref<10x64xf32, #tpu.memory_space<vmem>>, vector<1x64xf32>
    %208 = vector.broadcast %207 : vector<1x64xf32> to vector<8x64xf32>
    %209 = arith.mulf %206, %208 : vector<8x64xf32>
    %c10 = arith.constant 10 : index
    %c0_163 = arith.constant 0 : index
    %210 = vector.load %arg36[%c10, %c0_163] : memref<40x80xf32, #tpu.memory_space<vmem>>, vector<8x64xf32>
    %c1_164 = arith.constant 1 : index
    %c0_165 = arith.constant 0 : index
    %211 = vector.load %arg10[%c1_164, %c0_165] : memref<10x64xf32, #tpu.memory_space<vmem>>, vector<1x64xf32>
    %212 = vector.broadcast %211 : vector<1x64xf32> to vector<8x64xf32>
    %213 = arith.mulf %210, %212 : vector<8x64xf32>
    %214 = arith.addf %209, %213 : vector<8x64xf32>
    %c0_166 = arith.constant 0 : index
    %c16_167 = arith.constant 16 : index
    %215 = vector.load %arg36[%c0_166, %c16_167] : memref<40x80xf32, #tpu.memory_space<vmem>>, vector<8x64xf32>
    %c2_168 = arith.constant 2 : index
    %c0_169 = arith.constant 0 : index
    %216 = vector.load %arg10[%c2_168, %c0_169] : memref<10x64xf32, #tpu.memory_space<vmem>>, vector<1x64xf32>
    %217 = vector.broadcast %216 : vector<1x64xf32> to vector<8x64xf32>
    %218 = arith.mulf %215, %217 : vector<8x64xf32>
    %219 = arith.addf %214, %218 : vector<8x64xf32>
    %c20_170 = arith.constant 20 : index
    %c0_171 = arith.constant 0 : index
    %220 = vector.load %arg36[%c20_170, %c0_171] : memref<40x80xf32, #tpu.memory_space<vmem>>, vector<8x64xf32>
    %c3_172 = arith.constant 3 : index
    %c0_173 = arith.constant 0 : index
    %221 = vector.load %arg10[%c3_172, %c0_173] : memref<10x64xf32, #tpu.memory_space<vmem>>, vector<1x64xf32>
    %222 = vector.broadcast %221 : vector<1x64xf32> to vector<8x64xf32>
    %223 = arith.mulf %220, %222 : vector<8x64xf32>
    %224 = arith.addf %219, %223 : vector<8x64xf32>
    %c30_174 = arith.constant 30 : index
    %c0_175 = arith.constant 0 : index
    %225 = vector.load %arg36[%c30_174, %c0_175] : memref<40x80xf32, #tpu.memory_space<vmem>>, vector<8x64xf32>
    %c4_176 = arith.constant 4 : index
    %c0_177 = arith.constant 0 : index
    %226 = vector.load %arg10[%c4_176, %c0_177] : memref<10x64xf32, #tpu.memory_space<vmem>>, vector<1x64xf32>
    %227 = vector.broadcast %226 : vector<1x64xf32> to vector<8x64xf32>
    %228 = arith.mulf %225, %227 : vector<8x64xf32>
    %229 = arith.addf %224, %228 : vector<8x64xf32>
    %c20_178 = arith.constant 20 : index
    %c16_179 = arith.constant 16 : index
    %230 = vector.load %arg36[%c20_178, %c16_179] : memref<40x80xf32, #tpu.memory_space<vmem>>, vector<8x64xf32>
    %c5_180 = arith.constant 5 : index
    %c0_181 = arith.constant 0 : index
    %231 = vector.load %arg10[%c5_180, %c0_181] : memref<10x64xf32, #tpu.memory_space<vmem>>, vector<1x64xf32>
    %232 = vector.broadcast %231 : vector<1x64xf32> to vector<8x64xf32>
    %233 = arith.mulf %230, %232 : vector<8x64xf32>
    %234 = arith.addf %229, %233 : vector<8x64xf32>
    %c2_182 = arith.constant 2 : index
    %c0_183 = arith.constant 0 : index
    %235 = vector.load %arg36[%c2_182, %c0_183] : memref<40x80xf32, #tpu.memory_space<vmem>>, vector<8x64xf32>
    %c6_184 = arith.constant 6 : index
    %c0_185 = arith.constant 0 : index
    %236 = vector.load %arg10[%c6_184, %c0_185] : memref<10x64xf32, #tpu.memory_space<vmem>>, vector<1x64xf32>
    %237 = vector.broadcast %236 : vector<1x64xf32> to vector<8x64xf32>
    %238 = arith.mulf %235, %237 : vector<8x64xf32>
    %239 = arith.addf %234, %238 : vector<8x64xf32>
    %c12_186 = arith.constant 12 : index
    %c0_187 = arith.constant 0 : index
    %240 = vector.load %arg36[%c12_186, %c0_187] : memref<40x80xf32, #tpu.memory_space<vmem>>, vector<8x64xf32>
    %c7_188 = arith.constant 7 : index
    %c0_189 = arith.constant 0 : index
    %241 = vector.load %arg10[%c7_188, %c0_189] : memref<10x64xf32, #tpu.memory_space<vmem>>, vector<1x64xf32>
    %242 = vector.broadcast %241 : vector<1x64xf32> to vector<8x64xf32>
    %243 = arith.mulf %240, %242 : vector<8x64xf32>
    %244 = arith.addf %239, %243 : vector<8x64xf32>
    %c2_190 = arith.constant 2 : index
    %c16_191 = arith.constant 16 : index
    %245 = vector.load %arg36[%c2_190, %c16_191] : memref<40x80xf32, #tpu.memory_space<vmem>>, vector<8x64xf32>
    %c8_192 = arith.constant 8 : index
    %c0_193 = arith.constant 0 : index
    %246 = vector.load %arg10[%c8_192, %c0_193] : memref<10x64xf32, #tpu.memory_space<vmem>>, vector<1x64xf32>
    %247 = vector.broadcast %246 : vector<1x64xf32> to vector<8x64xf32>
    %248 = arith.mulf %245, %247 : vector<8x64xf32>
    %249 = arith.addf %244, %248 : vector<8x64xf32>
    %c9_194 = arith.constant 9 : index
    %c0_195 = arith.constant 0 : index
    %250 = vector.load %arg10[%c9_194, %c0_195] : memref<10x64xf32, #tpu.memory_space<vmem>>, vector<1x64xf32>
    %251 = vector.broadcast %250 : vector<1x64xf32> to vector<8x64xf32>
    %252 = arith.addf %249, %251 : vector<8x64xf32>
    %cst_196 = arith.constant 0.000000e+00 : f32
    %253 = vector.broadcast %cst_196 : f32 to vector<8x64xf32>
    %254 = arith.maximumf %252, %253 : vector<8x64xf32>
    %c0_197 = arith.constant 0 : index
    %c0_198 = arith.constant 0 : index
    %255 = vector.load %arg11[%c0_197, %c0_198] : memref<65x128xf32, #tpu.memory_space<vmem>>, vector<64x128xf32>
    %cst_199 = arith.constant dense<0.000000e+00> : vector<8x128xf32>
    %256 = tpu.matmul %254, %255, %cst_199 {dimension_numbers = #tpu.dot_dimension_numbers<[1], [0], [0], [1], [0, 0, 1, 1], [], []>} : vector<8x64xf32>, vector<64x128xf32>, vector<8x128xf32> -> vector<8x128xf32>
    %c64_200 = arith.constant 64 : index
    %c0_201 = arith.constant 0 : index
    %257 = vector.load %arg11[%c64_200, %c0_201] : memref<65x128xf32, #tpu.memory_space<vmem>>, vector<1x128xf32>
    %258 = vector.broadcast %257 : vector<1x128xf32> to vector<8x128xf32>
    %259 = arith.addf %256, %258 : vector<8x128xf32>
    %cst_202 = arith.constant 0.000000e+00 : f32
    %260 = vector.broadcast %cst_202 : f32 to vector<8x128xf32>
    %261 = arith.maximumf %259, %260 : vector<8x128xf32>
    %cst_203 = arith.constant 0.000000e+00 : f32
    %262 = vector.broadcast %cst_203 : f32 to vector<12x192xf32>
    %c0_204 = arith.constant 0 : index
    %c0_205 = arith.constant 0 : index
    %263 = vector.load %arg37[%c0_204, %c0_205] : memref<12x192xf32, #tpu.memory_space<vmem>>, vector<12x192xf32>
    tpu.vector_store %arg37[%c0_204, %c0_205], %262 {strides = array<i32>} : memref<12x192xf32, #tpu.memory_space<vmem>>, vector<12x192xf32>,
    %c2_206 = arith.constant 2 : index
    %c32_207 = arith.constant 32 : index
    %264 = vector.load %arg37[%c2_206, %c32_207] : memref<12x192xf32, #tpu.memory_space<vmem>>, vector<8x128xf32>
    tpu.vector_store %arg37[%c2_206, %c32_207], %261 {strides = array<i32>} : memref<12x192xf32, #tpu.memory_space<vmem>>, vector<8x128xf32>,
    %c0_208 = arith.constant 0 : index
    %c0_209 = arith.constant 0 : index
    %265 = vector.load %arg37[%c0_208, %c0_209] : memref<12x192xf32, #tpu.memory_space<vmem>>, vector<8x128xf32>
    %c0_210 = arith.constant 0 : index
    %c0_211 = arith.constant 0 : index
    %266 = vector.load %arg12[%c0_210, %c0_211] : memref<10x128xf32, #tpu.memory_space<vmem>>, vector<1x128xf32>
    %267 = vector.broadcast %266 : vector<1x128xf32> to vector<8x128xf32>
    %268 = arith.mulf %265, %267 : vector<8x128xf32>
    %c0_212 = arith.constant 0 : index
    %c32_213 = arith.constant 32 : index
    %269 = vector.load %arg37[%c0_212, %c32_213] : memref<12x192xf32, #tpu.memory_space<vmem>>, vector<8x128xf32>
    %c1_214 = arith.constant 1 : index
    %c0_215 = arith.constant 0 : index
    %270 = vector.load %arg12[%c1_214, %c0_215] : memref<10x128xf32, #tpu.memory_space<vmem>>, vector<1x128xf32>
    %271 = vector.broadcast %270 : vector<1x128xf32> to vector<8x128xf32>
    %272 = arith.mulf %269, %271 : vector<8x128xf32>
    %273 = arith.addf %268, %272 : vector<8x128xf32>
    %c0_216 = arith.constant 0 : index
    %c64_217 = arith.constant 64 : index
    %274 = vector.load %arg37[%c0_216, %c64_217] : memref<12x192xf32, #tpu.memory_space<vmem>>, vector<8x128xf32>
    %c2_218 = arith.constant 2 : index
    %c0_219 = arith.constant 0 : index
    %275 = vector.load %arg12[%c2_218, %c0_219] : memref<10x128xf32, #tpu.memory_space<vmem>>, vector<1x128xf32>
    %276 = vector.broadcast %275 : vector<1x128xf32> to vector<8x128xf32>
    %277 = arith.mulf %274, %276 : vector<8x128xf32>
    %278 = arith.addf %273, %277 : vector<8x128xf32>
    %c2_220 = arith.constant 2 : index
    %c0_221 = arith.constant 0 : index
    %279 = vector.load %arg37[%c2_220, %c0_221] : memref<12x192xf32, #tpu.memory_space<vmem>>, vector<8x128xf32>
    %c3_222 = arith.constant 3 : index
    %c0_223 = arith.constant 0 : index
    %280 = vector.load %arg12[%c3_222, %c0_223] : memref<10x128xf32, #tpu.memory_space<vmem>>, vector<1x128xf32>
    %281 = vector.broadcast %280 : vector<1x128xf32> to vector<8x128xf32>
    %282 = arith.mulf %279, %281 : vector<8x128xf32>
    %283 = arith.addf %278, %282 : vector<8x128xf32>
    %c2_224 = arith.constant 2 : index
    %c32_225 = arith.constant 32 : index
    %284 = vector.load %arg37[%c2_224, %c32_225] : memref<12x192xf32, #tpu.memory_space<vmem>>, vector<8x128xf32>
    %c4_226 = arith.constant 4 : index
    %c0_227 = arith.constant 0 : index
    %285 = vector.load %arg12[%c4_226, %c0_227] : memref<10x128xf32, #tpu.memory_space<vmem>>, vector<1x128xf32>
    %286 = vector.broadcast %285 : vector<1x128xf32> to vector<8x128xf32>
    %287 = arith.mulf %284, %286 : vector<8x128xf32>
    %288 = arith.addf %283, %287 : vector<8x128xf32>
    %c2_228 = arith.constant 2 : index
    %c64_229 = arith.constant 64 : index
    %289 = vector.load %arg37[%c2_228, %c64_229] : memref<12x192xf32, #tpu.memory_space<vmem>>, vector<8x128xf32>
    %c5_230 = arith.constant 5 : index
    %c0_231 = arith.constant 0 : index
    %290 = vector.load %arg12[%c5_230, %c0_231] : memref<10x128xf32, #tpu.memory_space<vmem>>, vector<1x128xf32>
    %291 = vector.broadcast %290 : vector<1x128xf32> to vector<8x128xf32>
    %292 = arith.mulf %289, %291 : vector<8x128xf32>
    %293 = arith.addf %288, %292 : vector<8x128xf32>
    %c4_232 = arith.constant 4 : index
    %c0_233 = arith.constant 0 : index
    %294 = vector.load %arg37[%c4_232, %c0_233] : memref<12x192xf32, #tpu.memory_space<vmem>>, vector<8x128xf32>
    %c6_234 = arith.constant 6 : index
    %c0_235 = arith.constant 0 : index
    %295 = vector.load %arg12[%c6_234, %c0_235] : memref<10x128xf32, #tpu.memory_space<vmem>>, vector<1x128xf32>
    %296 = vector.broadcast %295 : vector<1x128xf32> to vector<8x128xf32>
    %297 = arith.mulf %294, %296 : vector<8x128xf32>
    %298 = arith.addf %293, %297 : vector<8x128xf32>
    %c4_236 = arith.constant 4 : index
    %c32_237 = arith.constant 32 : index
    %299 = vector.load %arg37[%c4_236, %c32_237] : memref<12x192xf32, #tpu.memory_space<vmem>>, vector<8x128xf32>
    %c7_238 = arith.constant 7 : index
    %c0_239 = arith.constant 0 : index
    %300 = vector.load %arg12[%c7_238, %c0_239] : memref<10x128xf32, #tpu.memory_space<vmem>>, vector<1x128xf32>
    %301 = vector.broadcast %300 : vector<1x128xf32> to vector<8x128xf32>
    %302 = arith.mulf %299, %301 : vector<8x128xf32>
    %303 = arith.addf %298, %302 : vector<8x128xf32>
    %c4_240 = arith.constant 4 : index
    %c64_241 = arith.constant 64 : index
    %304 = vector.load %arg37[%c4_240, %c64_241] : memref<12x192xf32, #tpu.memory_space<vmem>>, vector<8x128xf32>
    %c8_242 = arith.constant 8 : index
    %c0_243 = arith.constant 0 : index
    %305 = vector.load %arg12[%c8_242, %c0_243] : memref<10x128xf32, #tpu.memory_space<vmem>>, vector<1x128xf32>
    %306 = vector.broadcast %305 : vector<1x128xf32> to vector<8x128xf32>
    %307 = arith.mulf %304, %306 : vector<8x128xf32>
    %308 = arith.addf %303, %307 : vector<8x128xf32>
    %c9_244 = arith.constant 9 : index
    %c0_245 = arith.constant 0 : index
    %309 = vector.load %arg12[%c9_244, %c0_245] : memref<10x128xf32, #tpu.memory_space<vmem>>, vector<1x128xf32>
    %310 = vector.broadcast %309 : vector<1x128xf32> to vector<8x128xf32>
    %311 = arith.addf %308, %310 : vector<8x128xf32>
    %cst_246 = arith.constant 0.000000e+00 : f32
    %312 = vector.broadcast %cst_246 : f32 to vector<8x128xf32>
    %313 = arith.maximumf %311, %312 : vector<8x128xf32>
    %c0_247 = arith.constant 0 : index
    %c0_248 = arith.constant 0 : index
    %314 = vector.load %arg13[%c0_247, %c0_248] : memref<129x128xf32, #tpu.memory_space<vmem>>, vector<128x128xf32>
    %cst_249 = arith.constant dense<0.000000e+00> : vector<8x128xf32>
    %315 = tpu.matmul %313, %314, %cst_249 {dimension_numbers = #tpu.dot_dimension_numbers<[1], [0], [0], [1], [0, 0, 1, 1], [], []>} : vector<8x128xf32>, vector<128x128xf32>, vector<8x128xf32> -> vector<8x128xf32>
    %c128_250 = arith.constant 128 : index
    %c0_251 = arith.constant 0 : index
    %316 = vector.load %arg13[%c128_250, %c0_251] : memref<129x128xf32, #tpu.memory_space<vmem>>, vector<1x128xf32>
    %317 = vector.broadcast %316 : vector<1x128xf32> to vector<8x128xf32>
    %318 = arith.addf %315, %317 : vector<8x128xf32>
    %cst_252 = arith.constant 0.000000e+00 : f32
    %319 = vector.broadcast %cst_252 : f32 to vector<8x128xf32>
    %320 = arith.maximumf %318, %319 : vector<8x128xf32>
    %c0_253 = arith.constant 0 : index
    %c0_254 = arith.constant 0 : index
    %321 = vector.load %arg14[%c0_253, %c0_254] : memref<8x8xf32, #tpu.memory_space<vmem>>, vector<8x8xf32>
    %cst_255 = arith.constant dense<0.000000e+00> : vector<8x128xf32>
    %322 = tpu.matmul %321, %320, %cst_255 {dimension_numbers = #tpu.dot_dimension_numbers<[1], [0], [0], [1], [0, 0, 1, 1], [], []>} : vector<8x8xf32>, vector<8x128xf32>, vector<8x128xf32> -> vector<8x128xf32>
    %cst_256 = arith.constant 0.000000e+00 : f32
    %323 = vector.broadcast %cst_256 : f32 to vector<24x96xf32>
    %c0_257 = arith.constant 0 : index
    %c0_258 = arith.constant 0 : index
    %324 = vector.load %arg38[%c0_257, %c0_258] : memref<24x96xf32, #tpu.memory_space<vmem>>, vector<24x96xf32>
    tpu.vector_store %arg38[%c0_257, %c0_258], %323 {strides = array<i32>} : memref<24x96xf32, #tpu.memory_space<vmem>>, vector<24x96xf32>,
    %325 = vector.extract_strided_slice %322 {offsets = [4, 64], sizes = [4, 64], strides = [1, 1]} : vector<8x128xf32> to vector<4x64xf32>
    %326 = vector.extract_strided_slice %322 {offsets = [4, 0], sizes = [4, 64], strides = [1, 1]} : vector<8x128xf32> to vector<4x64xf32>
    %327 = vector.extract_strided_slice %322 {offsets = [0, 64], sizes = [4, 64], strides = [1, 1]} : vector<8x128xf32> to vector<4x64xf32>
    %328 = vector.extract_strided_slice %322 {offsets = [0, 0], sizes = [4, 64], strides = [1, 1]} : vector<8x128xf32> to vector<4x64xf32>
    %c2_259 = arith.constant 2 : index
    %c32_260 = arith.constant 32 : index
    %329 = vector.load %arg38[%c2_259, %c32_260] : memref<24x96xf32, #tpu.memory_space<vmem>>, vector<4x64xf32>
    tpu.vector_store %arg38[%c2_259, %c32_260], %325 {strides = array<i32>} : memref<24x96xf32, #tpu.memory_space<vmem>>, vector<4x64xf32>,
    %c8_261 = arith.constant 8 : index
    %c0_262 = arith.constant 0 : index
    %330 = vector.load %arg38[%c8_261, %c0_262] : memref<24x96xf32, #tpu.memory_space<vmem>>, vector<4x64xf32>
    tpu.vector_store %arg38[%c8_261, %c0_262], %326 {strides = array<i32>} : memref<24x96xf32, #tpu.memory_space<vmem>>, vector<4x64xf32>,
    %c12_263 = arith.constant 12 : index
    %c32_264 = arith.constant 32 : index
    %331 = vector.load %arg38[%c12_263, %c32_264] : memref<24x96xf32, #tpu.memory_space<vmem>>, vector<4x64xf32>
    tpu.vector_store %arg38[%c12_263, %c32_264], %327 {strides = array<i32>} : memref<24x96xf32, #tpu.memory_space<vmem>>, vector<4x64xf32>,
    %c18_265 = arith.constant 18 : index
    %c0_266 = arith.constant 0 : index
    %332 = vector.load %arg38[%c18_265, %c0_266] : memref<24x96xf32, #tpu.memory_space<vmem>>, vector<4x64xf32>
    tpu.vector_store %arg38[%c18_265, %c0_266], %328 {strides = array<i32>} : memref<24x96xf32, #tpu.memory_space<vmem>>, vector<4x64xf32>,
    %c0_267 = arith.constant 0 : index
    %c0_268 = arith.constant 0 : index
    %333 = vector.load %arg38[%c0_267, %c0_268] : memref<24x96xf32, #tpu.memory_space<vmem>>, vector<4x64xf32>
    %c0_269 = arith.constant 0 : index
    %c0_270 = arith.constant 0 : index
    %334 = vector.load %arg15[%c0_269, %c0_270] : memref<10x64xf32, #tpu.memory_space<vmem>>, vector<1x64xf32>
    %335 = vector.broadcast %334 : vector<1x64xf32> to vector<4x64xf32>
    %336 = arith.mulf %333, %335 : vector<4x64xf32>
    %c6_271 = arith.constant 6 : index
    %c0_272 = arith.constant 0 : index
    %337 = vector.load %arg38[%c6_271, %c0_272] : memref<24x96xf32, #tpu.memory_space<vmem>>, vector<4x64xf32>
    %c1_273 = arith.constant 1 : index
    %c0_274 = arith.constant 0 : index
    %338 = vector.load %arg15[%c1_273, %c0_274] : memref<10x64xf32, #tpu.memory_space<vmem>>, vector<1x64xf32>
    %339 = vector.broadcast %338 : vector<1x64xf32> to vector<4x64xf32>
    %340 = arith.mulf %337, %339 : vector<4x64xf32>
    %341 = arith.addf %336, %340 : vector<4x64xf32>
    %c0_275 = arith.constant 0 : index
    %c32_276 = arith.constant 32 : index
    %342 = vector.load %arg38[%c0_275, %c32_276] : memref<24x96xf32, #tpu.memory_space<vmem>>, vector<4x64xf32>
    %c2_277 = arith.constant 2 : index
    %c0_278 = arith.constant 0 : index
    %343 = vector.load %arg15[%c2_277, %c0_278] : memref<10x64xf32, #tpu.memory_space<vmem>>, vector<1x64xf32>
    %344 = vector.broadcast %343 : vector<1x64xf32> to vector<4x64xf32>
    %345 = arith.mulf %342, %344 : vector<4x64xf32>
    %346 = arith.addf %341, %345 : vector<4x64xf32>
    %c12_279 = arith.constant 12 : index
    %c0_280 = arith.constant 0 : index
    %347 = vector.load %arg38[%c12_279, %c0_280] : memref<24x96xf32, #tpu.memory_space<vmem>>, vector<4x64xf32>
    %c3_281 = arith.constant 3 : index
    %c0_282 = arith.constant 0 : index
    %348 = vector.load %arg15[%c3_281, %c0_282] : memref<10x64xf32, #tpu.memory_space<vmem>>, vector<1x64xf32>
    %349 = vector.broadcast %348 : vector<1x64xf32> to vector<4x64xf32>
    %350 = arith.mulf %347, %349 : vector<4x64xf32>
    %351 = arith.addf %346, %350 : vector<4x64xf32>
    %c18_283 = arith.constant 18 : index
    %c0_284 = arith.constant 0 : index
    %352 = vector.load %arg38[%c18_283, %c0_284] : memref<24x96xf32, #tpu.memory_space<vmem>>, vector<4x64xf32>
    %c4_285 = arith.constant 4 : index
    %c0_286 = arith.constant 0 : index
    %353 = vector.load %arg15[%c4_285, %c0_286] : memref<10x64xf32, #tpu.memory_space<vmem>>, vector<1x64xf32>
    %354 = vector.broadcast %353 : vector<1x64xf32> to vector<4x64xf32>
    %355 = arith.mulf %352, %354 : vector<4x64xf32>
    %356 = arith.addf %351, %355 : vector<4x64xf32>
    %c12_287 = arith.constant 12 : index
    %c32_288 = arith.constant 32 : index
    %357 = vector.load %arg38[%c12_287, %c32_288] : memref<24x96xf32, #tpu.memory_space<vmem>>, vector<4x64xf32>
    %c5_289 = arith.constant 5 : index
    %c0_290 = arith.constant 0 : index
    %358 = vector.load %arg15[%c5_289, %c0_290] : memref<10x64xf32, #tpu.memory_space<vmem>>, vector<1x64xf32>
    %359 = vector.broadcast %358 : vector<1x64xf32> to vector<4x64xf32>
    %360 = arith.mulf %357, %359 : vector<4x64xf32>
    %361 = arith.addf %356, %360 : vector<4x64xf32>
    %c2_291 = arith.constant 2 : index
    %c0_292 = arith.constant 0 : index
    %362 = vector.load %arg38[%c2_291, %c0_292] : memref<24x96xf32, #tpu.memory_space<vmem>>, vector<4x64xf32>
    %c6_293 = arith.constant 6 : index
    %c0_294 = arith.constant 0 : index
    %363 = vector.load %arg15[%c6_293, %c0_294] : memref<10x64xf32, #tpu.memory_space<vmem>>, vector<1x64xf32>
    %364 = vector.broadcast %363 : vector<1x64xf32> to vector<4x64xf32>
    %365 = arith.mulf %362, %364 : vector<4x64xf32>
    %366 = arith.addf %361, %365 : vector<4x64xf32>
    %c8_295 = arith.constant 8 : index
    %c0_296 = arith.constant 0 : index
    %367 = vector.load %arg38[%c8_295, %c0_296] : memref<24x96xf32, #tpu.memory_space<vmem>>, vector<4x64xf32>
    %c7_297 = arith.constant 7 : index
    %c0_298 = arith.constant 0 : index
    %368 = vector.load %arg15[%c7_297, %c0_298] : memref<10x64xf32, #tpu.memory_space<vmem>>, vector<1x64xf32>
    %369 = vector.broadcast %368 : vector<1x64xf32> to vector<4x64xf32>
    %370 = arith.mulf %367, %369 : vector<4x64xf32>
    %371 = arith.addf %366, %370 : vector<4x64xf32>
    %c2_299 = arith.constant 2 : index
    %c32_300 = arith.constant 32 : index
    %372 = vector.load %arg38[%c2_299, %c32_300] : memref<24x96xf32, #tpu.memory_space<vmem>>, vector<4x64xf32>
    %c8_301 = arith.constant 8 : index
    %c0_302 = arith.constant 0 : index
    %373 = vector.load %arg15[%c8_301, %c0_302] : memref<10x64xf32, #tpu.memory_space<vmem>>, vector<1x64xf32>
    %374 = vector.broadcast %373 : vector<1x64xf32> to vector<4x64xf32>
    %375 = arith.mulf %372, %374 : vector<4x64xf32>
    %376 = arith.addf %371, %375 : vector<4x64xf32>
    %c9_303 = arith.constant 9 : index
    %c0_304 = arith.constant 0 : index
    %377 = vector.load %arg15[%c9_303, %c0_304] : memref<10x64xf32, #tpu.memory_space<vmem>>, vector<1x64xf32>
    %378 = vector.broadcast %377 : vector<1x64xf32> to vector<4x64xf32>
    %379 = arith.addf %376, %378 : vector<4x64xf32>
    %cst_305 = arith.constant 0.000000e+00 : f32
    %380 = vector.broadcast %cst_305 : f32 to vector<4x64xf32>
    %381 = arith.maximumf %379, %380 : vector<4x64xf32>
    %c0_306 = arith.constant 0 : index
    %c0_307 = arith.constant 0 : index
    %382 = vector.load %arg16[%c0_306, %c0_307] : memref<65x128xf32, #tpu.memory_space<vmem>>, vector<64x128xf32>
    %cst_308 = arith.constant dense<0.000000e+00> : vector<4x128xf32>
    %383 = tpu.matmul %381, %382, %cst_308 {dimension_numbers = #tpu.dot_dimension_numbers<[1], [0], [0], [1], [0, 0, 1, 1], [], []>} : vector<4x64xf32>, vector<64x128xf32>, vector<4x128xf32> -> vector<4x128xf32>
    %c64_309 = arith.constant 64 : index
    %c0_310 = arith.constant 0 : index
    %384 = vector.load %arg16[%c64_309, %c0_310] : memref<65x128xf32, #tpu.memory_space<vmem>>, vector<1x128xf32>
    %385 = vector.broadcast %384 : vector<1x128xf32> to vector<4x128xf32>
    %386 = arith.addf %383, %385 : vector<4x128xf32>
    %cst_311 = arith.constant 0.000000e+00 : f32
    %387 = vector.broadcast %cst_311 : f32 to vector<4x128xf32>
    %388 = arith.maximumf %386, %387 : vector<4x128xf32>
    %cst_312 = arith.constant 0.000000e+00 : f32
    %389 = vector.broadcast %cst_312 : f32 to vector<8x256xf32>
    %c0_313 = arith.constant 0 : index
    %c0_314 = arith.constant 0 : index
    %390 = vector.load %arg39[%c0_313, %c0_314] : memref<8x256xf32, #tpu.memory_space<vmem>>, vector<8x256xf32>
    tpu.vector_store %arg39[%c0_313, %c0_314], %389 {strides = array<i32>} : memref<8x256xf32, #tpu.memory_space<vmem>>, vector<8x256xf32>,
    %c2_315 = arith.constant 2 : index
    %c64_316 = arith.constant 64 : index
    %391 = vector.load %arg39[%c2_315, %c64_316] : memref<8x256xf32, #tpu.memory_space<vmem>>, vector<4x128xf32>
    tpu.vector_store %arg39[%c2_315, %c64_316], %388 {strides = array<i32>} : memref<8x256xf32, #tpu.memory_space<vmem>>, vector<4x128xf32>,
    %c0_317 = arith.constant 0 : index
    %c0_318 = arith.constant 0 : index
    %392 = vector.load %arg39[%c0_317, %c0_318] : memref<8x256xf32, #tpu.memory_space<vmem>>, vector<4x128xf32>
    %c0_319 = arith.constant 0 : index
    %c0_320 = arith.constant 0 : index
    %393 = vector.load %arg17[%c0_319, %c0_320] : memref<10x128xf32, #tpu.memory_space<vmem>>, vector<1x128xf32>
    %394 = vector.broadcast %393 : vector<1x128xf32> to vector<4x128xf32>
    %395 = arith.mulf %392, %394 : vector<4x128xf32>
    %c0_321 = arith.constant 0 : index
    %c64_322 = arith.constant 64 : index
    %396 = vector.load %arg39[%c0_321, %c64_322] : memref<8x256xf32, #tpu.memory_space<vmem>>, vector<4x128xf32>
    %c1_323 = arith.constant 1 : index
    %c0_324 = arith.constant 0 : index
    %397 = vector.load %arg17[%c1_323, %c0_324] : memref<10x128xf32, #tpu.memory_space<vmem>>, vector<1x128xf32>
    %398 = vector.broadcast %397 : vector<1x128xf32> to vector<4x128xf32>
    %399 = arith.mulf %396, %398 : vector<4x128xf32>
    %400 = arith.addf %395, %399 : vector<4x128xf32>
    %c0_325 = arith.constant 0 : index
    %c128_326 = arith.constant 128 : index
    %401 = vector.load %arg39[%c0_325, %c128_326] : memref<8x256xf32, #tpu.memory_space<vmem>>, vector<4x128xf32>
    %c2_327 = arith.constant 2 : index
    %c0_328 = arith.constant 0 : index
    %402 = vector.load %arg17[%c2_327, %c0_328] : memref<10x128xf32, #tpu.memory_space<vmem>>, vector<1x128xf32>
    %403 = vector.broadcast %402 : vector<1x128xf32> to vector<4x128xf32>
    %404 = arith.mulf %401, %403 : vector<4x128xf32>
    %405 = arith.addf %400, %404 : vector<4x128xf32>
    %c2_329 = arith.constant 2 : index
    %c0_330 = arith.constant 0 : index
    %406 = vector.load %arg39[%c2_329, %c0_330] : memref<8x256xf32, #tpu.memory_space<vmem>>, vector<4x128xf32>
    %c3_331 = arith.constant 3 : index
    %c0_332 = arith.constant 0 : index
    %407 = vector.load %arg17[%c3_331, %c0_332] : memref<10x128xf32, #tpu.memory_space<vmem>>, vector<1x128xf32>
    %408 = vector.broadcast %407 : vector<1x128xf32> to vector<4x128xf32>
    %409 = arith.mulf %406, %408 : vector<4x128xf32>
    %410 = arith.addf %405, %409 : vector<4x128xf32>
    %c2_333 = arith.constant 2 : index
    %c64_334 = arith.constant 64 : index
    %411 = vector.load %arg39[%c2_333, %c64_334] : memref<8x256xf32, #tpu.memory_space<vmem>>, vector<4x128xf32>
    %c4_335 = arith.constant 4 : index
    %c0_336 = arith.constant 0 : index
    %412 = vector.load %arg17[%c4_335, %c0_336] : memref<10x128xf32, #tpu.memory_space<vmem>>, vector<1x128xf32>
    %413 = vector.broadcast %412 : vector<1x128xf32> to vector<4x128xf32>
    %414 = arith.mulf %411, %413 : vector<4x128xf32>
    %415 = arith.addf %410, %414 : vector<4x128xf32>
    %c2_337 = arith.constant 2 : index
    %c128_338 = arith.constant 128 : index
    %416 = vector.load %arg39[%c2_337, %c128_338] : memref<8x256xf32, #tpu.memory_space<vmem>>, vector<4x128xf32>
    %c5_339 = arith.constant 5 : index
    %c0_340 = arith.constant 0 : index
    %417 = vector.load %arg17[%c5_339, %c0_340] : memref<10x128xf32, #tpu.memory_space<vmem>>, vector<1x128xf32>
    %418 = vector.broadcast %417 : vector<1x128xf32> to vector<4x128xf32>
    %419 = arith.mulf %416, %418 : vector<4x128xf32>
    %420 = arith.addf %415, %419 : vector<4x128xf32>
    %c4_341 = arith.constant 4 : index
    %c0_342 = arith.constant 0 : index
    %421 = vector.load %arg39[%c4_341, %c0_342] : memref<8x256xf32, #tpu.memory_space<vmem>>, vector<4x128xf32>
    %c6_343 = arith.constant 6 : index
    %c0_344 = arith.constant 0 : index
    %422 = vector.load %arg17[%c6_343, %c0_344] : memref<10x128xf32, #tpu.memory_space<vmem>>, vector<1x128xf32>
    %423 = vector.broadcast %422 : vector<1x128xf32> to vector<4x128xf32>
    %424 = arith.mulf %421, %423 : vector<4x128xf32>
    %425 = arith.addf %420, %424 : vector<4x128xf32>
    %c4_345 = arith.constant 4 : index
    %c64_346 = arith.constant 64 : index
    %426 = vector.load %arg39[%c4_345, %c64_346] : memref<8x256xf32, #tpu.memory_space<vmem>>, vector<4x128xf32>
    %c7_347 = arith.constant 7 : index
    %c0_348 = arith.constant 0 : index
    %427 = vector.load %arg17[%c7_347, %c0_348] : memref<10x128xf32, #tpu.memory_space<vmem>>, vector<1x128xf32>
    %428 = vector.broadcast %427 : vector<1x128xf32> to vector<4x128xf32>
    %429 = arith.mulf %426, %428 : vector<4x128xf32>
    %430 = arith.addf %425, %429 : vector<4x128xf32>
    %c4_349 = arith.constant 4 : index
    %c128_350 = arith.constant 128 : index
    %431 = vector.load %arg39[%c4_349, %c128_350] : memref<8x256xf32, #tpu.memory_space<vmem>>, vector<4x128xf32>
    %c8_351 = arith.constant 8 : index
    %c0_352 = arith.constant 0 : index
    %432 = vector.load %arg17[%c8_351, %c0_352] : memref<10x128xf32, #tpu.memory_space<vmem>>, vector<1x128xf32>
    %433 = vector.broadcast %432 : vector<1x128xf32> to vector<4x128xf32>
    %434 = arith.mulf %431, %433 : vector<4x128xf32>
    %435 = arith.addf %430, %434 : vector<4x128xf32>
    %c9_353 = arith.constant 9 : index
    %c0_354 = arith.constant 0 : index
    %436 = vector.load %arg17[%c9_353, %c0_354] : memref<10x128xf32, #tpu.memory_space<vmem>>, vector<1x128xf32>
    %437 = vector.broadcast %436 : vector<1x128xf32> to vector<4x128xf32>
    %438 = arith.addf %435, %437 : vector<4x128xf32>
    %cst_355 = arith.constant 0.000000e+00 : f32
    %439 = vector.broadcast %cst_355 : f32 to vector<4x128xf32>
    %440 = arith.maximumf %438, %439 : vector<4x128xf32>
    %c0_356 = arith.constant 0 : index
    %c0_357 = arith.constant 0 : index
    %441 = vector.load %arg18[%c0_356, %c0_357] : memref<129x128xf32, #tpu.memory_space<vmem>>, vector<128x128xf32>
    %cst_358 = arith.constant dense<0.000000e+00> : vector<4x128xf32>
    %442 = tpu.matmul %440, %441, %cst_358 {dimension_numbers = #tpu.dot_dimension_numbers<[1], [0], [0], [1], [0, 0, 1, 1], [], []>} : vector<4x128xf32>, vector<128x128xf32>, vector<4x128xf32> -> vector<4x128xf32>
    %c128_359 = arith.constant 128 : index
    %c0_360 = arith.constant 0 : index
    %443 = vector.load %arg18[%c128_359, %c0_360] : memref<129x128xf32, #tpu.memory_space<vmem>>, vector<1x128xf32>
    %444 = vector.broadcast %443 : vector<1x128xf32> to vector<4x128xf32>
    %445 = arith.addf %442, %444 : vector<4x128xf32>
    %cst_361 = arith.constant 0.000000e+00 : f32
    %446 = vector.broadcast %cst_361 : f32 to vector<4x128xf32>
    %447 = arith.maximumf %445, %446 : vector<4x128xf32>
    %cst_362 = arith.constant 0.000000e+00 : f32
    %448 = vector.broadcast %cst_362 : f32 to vector<8x256xf32>
    %c0_363 = arith.constant 0 : index
    %c0_364 = arith.constant 0 : index
    %449 = vector.load %arg40[%c0_363, %c0_364] : memref<8x256xf32, #tpu.memory_space<vmem>>, vector<8x256xf32>
    tpu.vector_store %arg40[%c0_363, %c0_364], %448 {strides = array<i32>} : memref<8x256xf32, #tpu.memory_space<vmem>>, vector<8x256xf32>,
    %c2_365 = arith.constant 2 : index
    %c64_366 = arith.constant 64 : index
    %450 = vector.load %arg40[%c2_365, %c64_366] : memref<8x256xf32, #tpu.memory_space<vmem>>, vector<4x128xf32>
    tpu.vector_store %arg40[%c2_365, %c64_366], %447 {strides = array<i32>} : memref<8x256xf32, #tpu.memory_space<vmem>>, vector<4x128xf32>,
    %c0_367 = arith.constant 0 : index
    %c0_368 = arith.constant 0 : index
    %451 = vector.load %arg40[%c0_367, %c0_368] : memref<8x256xf32, #tpu.memory_space<vmem>>, vector<4x128xf32>
    %c0_369 = arith.constant 0 : index
    %c0_370 = arith.constant 0 : index
    %452 = vector.load %arg19[%c0_369, %c0_370] : memref<10x128xf32, #tpu.memory_space<vmem>>, vector<1x128xf32>
    %453 = vector.broadcast %452 : vector<1x128xf32> to vector<4x128xf32>
    %454 = arith.mulf %451, %453 : vector<4x128xf32>
    %c0_371 = arith.constant 0 : index
    %c64_372 = arith.constant 64 : index
    %455 = vector.load %arg40[%c0_371, %c64_372] : memref<8x256xf32, #tpu.memory_space<vmem>>, vector<4x128xf32>
    %c1_373 = arith.constant 1 : index
    %c0_374 = arith.constant 0 : index
    %456 = vector.load %arg19[%c1_373, %c0_374] : memref<10x128xf32, #tpu.memory_space<vmem>>, vector<1x128xf32>
    %457 = vector.broadcast %456 : vector<1x128xf32> to vector<4x128xf32>
    %458 = arith.mulf %455, %457 : vector<4x128xf32>
    %459 = arith.addf %454, %458 : vector<4x128xf32>
    %c0_375 = arith.constant 0 : index
    %c128_376 = arith.constant 128 : index
    %460 = vector.load %arg40[%c0_375, %c128_376] : memref<8x256xf32, #tpu.memory_space<vmem>>, vector<4x128xf32>
    %c2_377 = arith.constant 2 : index
    %c0_378 = arith.constant 0 : index
    %461 = vector.load %arg19[%c2_377, %c0_378] : memref<10x128xf32, #tpu.memory_space<vmem>>, vector<1x128xf32>
    %462 = vector.broadcast %461 : vector<1x128xf32> to vector<4x128xf32>
    %463 = arith.mulf %460, %462 : vector<4x128xf32>
    %464 = arith.addf %459, %463 : vector<4x128xf32>
    %c2_379 = arith.constant 2 : index
    %c0_380 = arith.constant 0 : index
    %465 = vector.load %arg40[%c2_379, %c0_380] : memref<8x256xf32, #tpu.memory_space<vmem>>, vector<4x128xf32>
    %c3_381 = arith.constant 3 : index
    %c0_382 = arith.constant 0 : index
    %466 = vector.load %arg19[%c3_381, %c0_382] : memref<10x128xf32, #tpu.memory_space<vmem>>, vector<1x128xf32>
    %467 = vector.broadcast %466 : vector<1x128xf32> to vector<4x128xf32>
    %468 = arith.mulf %465, %467 : vector<4x128xf32>
    %469 = arith.addf %464, %468 : vector<4x128xf32>
    %c2_383 = arith.constant 2 : index
    %c64_384 = arith.constant 64 : index
    %470 = vector.load %arg40[%c2_383, %c64_384] : memref<8x256xf32, #tpu.memory_space<vmem>>, vector<4x128xf32>
    %c4_385 = arith.constant 4 : index
    %c0_386 = arith.constant 0 : index
    %471 = vector.load %arg19[%c4_385, %c0_386] : memref<10x128xf32, #tpu.memory_space<vmem>>, vector<1x128xf32>
    %472 = vector.broadcast %471 : vector<1x128xf32> to vector<4x128xf32>
    %473 = arith.mulf %470, %472 : vector<4x128xf32>
    %474 = arith.addf %469, %473 : vector<4x128xf32>
    %c2_387 = arith.constant 2 : index
    %c128_388 = arith.constant 128 : index
    %475 = vector.load %arg40[%c2_387, %c128_388] : memref<8x256xf32, #tpu.memory_space<vmem>>, vector<4x128xf32>
    %c5_389 = arith.constant 5 : index
    %c0_390 = arith.constant 0 : index
    %476 = vector.load %arg19[%c5_389, %c0_390] : memref<10x128xf32, #tpu.memory_space<vmem>>, vector<1x128xf32>
    %477 = vector.broadcast %476 : vector<1x128xf32> to vector<4x128xf32>
    %478 = arith.mulf %475, %477 : vector<4x128xf32>
    %479 = arith.addf %474, %478 : vector<4x128xf32>
    %c4_391 = arith.constant 4 : index
    %c0_392 = arith.constant 0 : index
    %480 = vector.load %arg40[%c4_391, %c0_392] : memref<8x256xf32, #tpu.memory_space<vmem>>, vector<4x128xf32>
    %c6_393 = arith.constant 6 : index
    %c0_394 = arith.constant 0 : index
    %481 = vector.load %arg19[%c6_393, %c0_394] : memref<10x128xf32, #tpu.memory_space<vmem>>, vector<1x128xf32>
    %482 = vector.broadcast %481 : vector<1x128xf32> to vector<4x128xf32>
    %483 = arith.mulf %480, %482 : vector<4x128xf32>
    %484 = arith.addf %479, %483 : vector<4x128xf32>
    %c4_395 = arith.constant 4 : index
    %c64_396 = arith.constant 64 : index
    %485 = vector.load %arg40[%c4_395, %c64_396] : memref<8x256xf32, #tpu.memory_space<vmem>>, vector<4x128xf32>
    %c7_397 = arith.constant 7 : index
    %c0_398 = arith.constant 0 : index
    %486 = vector.load %arg19[%c7_397, %c0_398] : memref<10x128xf32, #tpu.memory_space<vmem>>, vector<1x128xf32>
    %487 = vector.broadcast %486 : vector<1x128xf32> to vector<4x128xf32>
    %488 = arith.mulf %485, %487 : vector<4x128xf32>
    %489 = arith.addf %484, %488 : vector<4x128xf32>
    %c4_399 = arith.constant 4 : index
    %c128_400 = arith.constant 128 : index
    %490 = vector.load %arg40[%c4_399, %c128_400] : memref<8x256xf32, #tpu.memory_space<vmem>>, vector<4x128xf32>
    %c8_401 = arith.constant 8 : index
    %c0_402 = arith.constant 0 : index
    %491 = vector.load %arg19[%c8_401, %c0_402] : memref<10x128xf32, #tpu.memory_space<vmem>>, vector<1x128xf32>
    %492 = vector.broadcast %491 : vector<1x128xf32> to vector<4x128xf32>
    %493 = arith.mulf %490, %492 : vector<4x128xf32>
    %494 = arith.addf %489, %493 : vector<4x128xf32>
    %c9_403 = arith.constant 9 : index
    %c0_404 = arith.constant 0 : index
    %495 = vector.load %arg19[%c9_403, %c0_404] : memref<10x128xf32, #tpu.memory_space<vmem>>, vector<1x128xf32>
    %496 = vector.broadcast %495 : vector<1x128xf32> to vector<4x128xf32>
    %497 = arith.addf %494, %496 : vector<4x128xf32>
    %cst_405 = arith.constant 0.000000e+00 : f32
    %498 = vector.broadcast %cst_405 : f32 to vector<4x128xf32>
    %499 = arith.maximumf %497, %498 : vector<4x128xf32>
    %c0_406 = arith.constant 0 : index
    %c0_407 = arith.constant 0 : index
    %500 = vector.load %arg20[%c0_406, %c0_407] : memref<129x128xf32, #tpu.memory_space<vmem>>, vector<128x128xf32>
    %cst_408 = arith.constant dense<0.000000e+00> : vector<4x128xf32>
    %501 = tpu.matmul %499, %500, %cst_408 {dimension_numbers = #tpu.dot_dimension_numbers<[1], [0], [0], [1], [0, 0, 1, 1], [], []>} : vector<4x128xf32>, vector<128x128xf32>, vector<4x128xf32> -> vector<4x128xf32>
    %c128_409 = arith.constant 128 : index
    %c0_410 = arith.constant 0 : index
    %502 = vector.load %arg20[%c128_409, %c0_410] : memref<129x128xf32, #tpu.memory_space<vmem>>, vector<1x128xf32>
    %503 = vector.broadcast %502 : vector<1x128xf32> to vector<4x128xf32>
    %504 = arith.addf %501, %503 : vector<4x128xf32>
    %cst_411 = arith.constant 0.000000e+00 : f32
    %505 = vector.broadcast %cst_411 : f32 to vector<4x128xf32>
    %506 = arith.maximumf %504, %505 : vector<4x128xf32>
    %cst_412 = arith.constant 0.000000e+00 : f32
    %507 = vector.broadcast %cst_412 : f32 to vector<8x256xf32>
    %c0_413 = arith.constant 0 : index
    %c0_414 = arith.constant 0 : index
    %508 = vector.load %arg41[%c0_413, %c0_414] : memref<8x256xf32, #tpu.memory_space<vmem>>, vector<8x256xf32>
    tpu.vector_store %arg41[%c0_413, %c0_414], %507 {strides = array<i32>} : memref<8x256xf32, #tpu.memory_space<vmem>>, vector<8x256xf32>,
    %c2_415 = arith.constant 2 : index
    %c64_416 = arith.constant 64 : index
    %509 = vector.load %arg41[%c2_415, %c64_416] : memref<8x256xf32, #tpu.memory_space<vmem>>, vector<4x128xf32>
    tpu.vector_store %arg41[%c2_415, %c64_416], %506 {strides = array<i32>} : memref<8x256xf32, #tpu.memory_space<vmem>>, vector<4x128xf32>,
    %c0_417 = arith.constant 0 : index
    %c0_418 = arith.constant 0 : index
    %510 = vector.load %arg41[%c0_417, %c0_418] : memref<8x256xf32, #tpu.memory_space<vmem>>, vector<4x128xf32>
    %c0_419 = arith.constant 0 : index
    %c0_420 = arith.constant 0 : index
    %511 = vector.load %arg21[%c0_419, %c0_420] : memref<10x128xf32, #tpu.memory_space<vmem>>, vector<1x128xf32>
    %512 = vector.broadcast %511 : vector<1x128xf32> to vector<4x128xf32>
    %513 = arith.mulf %510, %512 : vector<4x128xf32>
    %c0_421 = arith.constant 0 : index
    %c64_422 = arith.constant 64 : index
    %514 = vector.load %arg41[%c0_421, %c64_422] : memref<8x256xf32, #tpu.memory_space<vmem>>, vector<4x128xf32>
    %c1_423 = arith.constant 1 : index
    %c0_424 = arith.constant 0 : index
    %515 = vector.load %arg21[%c1_423, %c0_424] : memref<10x128xf32, #tpu.memory_space<vmem>>, vector<1x128xf32>
    %516 = vector.broadcast %515 : vector<1x128xf32> to vector<4x128xf32>
    %517 = arith.mulf %514, %516 : vector<4x128xf32>
    %518 = arith.addf %513, %517 : vector<4x128xf32>
    %c0_425 = arith.constant 0 : index
    %c128_426 = arith.constant 128 : index
    %519 = vector.load %arg41[%c0_425, %c128_426] : memref<8x256xf32, #tpu.memory_space<vmem>>, vector<4x128xf32>
    %c2_427 = arith.constant 2 : index
    %c0_428 = arith.constant 0 : index
    %520 = vector.load %arg21[%c2_427, %c0_428] : memref<10x128xf32, #tpu.memory_space<vmem>>, vector<1x128xf32>
    %521 = vector.broadcast %520 : vector<1x128xf32> to vector<4x128xf32>
    %522 = arith.mulf %519, %521 : vector<4x128xf32>
    %523 = arith.addf %518, %522 : vector<4x128xf32>
    %c2_429 = arith.constant 2 : index
    %c0_430 = arith.constant 0 : index
    %524 = vector.load %arg41[%c2_429, %c0_430] : memref<8x256xf32, #tpu.memory_space<vmem>>, vector<4x128xf32>
    %c3_431 = arith.constant 3 : index
    %c0_432 = arith.constant 0 : index
    %525 = vector.load %arg21[%c3_431, %c0_432] : memref<10x128xf32, #tpu.memory_space<vmem>>, vector<1x128xf32>
    %526 = vector.broadcast %525 : vector<1x128xf32> to vector<4x128xf32>
    %527 = arith.mulf %524, %526 : vector<4x128xf32>
    %528 = arith.addf %523, %527 : vector<4x128xf32>
    %c2_433 = arith.constant 2 : index
    %c64_434 = arith.constant 64 : index
    %529 = vector.load %arg41[%c2_433, %c64_434] : memref<8x256xf32, #tpu.memory_space<vmem>>, vector<4x128xf32>
    %c4_435 = arith.constant 4 : index
    %c0_436 = arith.constant 0 : index
    %530 = vector.load %arg21[%c4_435, %c0_436] : memref<10x128xf32, #tpu.memory_space<vmem>>, vector<1x128xf32>
    %531 = vector.broadcast %530 : vector<1x128xf32> to vector<4x128xf32>
    %532 = arith.mulf %529, %531 : vector<4x128xf32>
    %533 = arith.addf %528, %532 : vector<4x128xf32>
    %c2_437 = arith.constant 2 : index
    %c128_438 = arith.constant 128 : index
    %534 = vector.load %arg41[%c2_437, %c128_438] : memref<8x256xf32, #tpu.memory_space<vmem>>, vector<4x128xf32>
    %c5_439 = arith.constant 5 : index
    %c0_440 = arith.constant 0 : index
    %535 = vector.load %arg21[%c5_439, %c0_440] : memref<10x128xf32, #tpu.memory_space<vmem>>, vector<1x128xf32>
    %536 = vector.broadcast %535 : vector<1x128xf32> to vector<4x128xf32>
    %537 = arith.mulf %534, %536 : vector<4x128xf32>
    %538 = arith.addf %533, %537 : vector<4x128xf32>
    %c4_441 = arith.constant 4 : index
    %c0_442 = arith.constant 0 : index
    %539 = vector.load %arg41[%c4_441, %c0_442] : memref<8x256xf32, #tpu.memory_space<vmem>>, vector<4x128xf32>
    %c6_443 = arith.constant 6 : index
    %c0_444 = arith.constant 0 : index
    %540 = vector.load %arg21[%c6_443, %c0_444] : memref<10x128xf32, #tpu.memory_space<vmem>>, vector<1x128xf32>
    %541 = vector.broadcast %540 : vector<1x128xf32> to vector<4x128xf32>
    %542 = arith.mulf %539, %541 : vector<4x128xf32>
    %543 = arith.addf %538, %542 : vector<4x128xf32>
    %c4_445 = arith.constant 4 : index
    %c64_446 = arith.constant 64 : index
    %544 = vector.load %arg41[%c4_445, %c64_446] : memref<8x256xf32, #tpu.memory_space<vmem>>, vector<4x128xf32>
    %c7_447 = arith.constant 7 : index
    %c0_448 = arith.constant 0 : index
    %545 = vector.load %arg21[%c7_447, %c0_448] : memref<10x128xf32, #tpu.memory_space<vmem>>, vector<1x128xf32>
    %546 = vector.broadcast %545 : vector<1x128xf32> to vector<4x128xf32>
    %547 = arith.mulf %544, %546 : vector<4x128xf32>
    %548 = arith.addf %543, %547 : vector<4x128xf32>
    %c4_449 = arith.constant 4 : index
    %c128_450 = arith.constant 128 : index
    %549 = vector.load %arg41[%c4_449, %c128_450] : memref<8x256xf32, #tpu.memory_space<vmem>>, vector<4x128xf32>
    %c8_451 = arith.constant 8 : index
    %c0_452 = arith.constant 0 : index
    %550 = vector.load %arg21[%c8_451, %c0_452] : memref<10x128xf32, #tpu.memory_space<vmem>>, vector<1x128xf32>
    %551 = vector.broadcast %550 : vector<1x128xf32> to vector<4x128xf32>
    %552 = arith.mulf %549, %551 : vector<4x128xf32>
    %553 = arith.addf %548, %552 : vector<4x128xf32>
    %c9_453 = arith.constant 9 : index
    %c0_454 = arith.constant 0 : index
    %554 = vector.load %arg21[%c9_453, %c0_454] : memref<10x128xf32, #tpu.memory_space<vmem>>, vector<1x128xf32>
    %555 = vector.broadcast %554 : vector<1x128xf32> to vector<4x128xf32>
    %556 = arith.addf %553, %555 : vector<4x128xf32>
    %cst_455 = arith.constant 0.000000e+00 : f32
    %557 = vector.broadcast %cst_455 : f32 to vector<4x128xf32>
    %558 = arith.maximumf %556, %557 : vector<4x128xf32>
    %c0_456 = arith.constant 0 : index
    %c0_457 = arith.constant 0 : index
    %559 = vector.load %arg22[%c0_456, %c0_457] : memref<129x128xf32, #tpu.memory_space<vmem>>, vector<128x128xf32>
    %cst_458 = arith.constant dense<0.000000e+00> : vector<4x128xf32>
    %560 = tpu.matmul %558, %559, %cst_458 {dimension_numbers = #tpu.dot_dimension_numbers<[1], [0], [0], [1], [0, 0, 1, 1], [], []>} : vector<4x128xf32>, vector<128x128xf32>, vector<4x128xf32> -> vector<4x128xf32>
    %c128_459 = arith.constant 128 : index
    %c0_460 = arith.constant 0 : index
    %561 = vector.load %arg22[%c128_459, %c0_460] : memref<129x128xf32, #tpu.memory_space<vmem>>, vector<1x128xf32>
    %562 = vector.broadcast %561 : vector<1x128xf32> to vector<4x128xf32>
    %563 = arith.addf %560, %562 : vector<4x128xf32>
    %cst_461 = arith.constant 0.000000e+00 : f32
    %564 = vector.broadcast %cst_461 : f32 to vector<4x128xf32>
    %565 = arith.maximumf %563, %564 : vector<4x128xf32>
    %cst_462 = arith.constant 0.000000e+00 : f32
    %566 = vector.broadcast %cst_462 : f32 to vector<8x256xf32>
    %c0_463 = arith.constant 0 : index
    %c0_464 = arith.constant 0 : index
    %567 = vector.load %arg42[%c0_463, %c0_464] : memref<8x256xf32, #tpu.memory_space<vmem>>, vector<8x256xf32>
    tpu.vector_store %arg42[%c0_463, %c0_464], %566 {strides = array<i32>} : memref<8x256xf32, #tpu.memory_space<vmem>>, vector<8x256xf32>,
    %c2_465 = arith.constant 2 : index
    %c64_466 = arith.constant 64 : index
    %568 = vector.load %arg42[%c2_465, %c64_466] : memref<8x256xf32, #tpu.memory_space<vmem>>, vector<4x128xf32>
    tpu.vector_store %arg42[%c2_465, %c64_466], %565 {strides = array<i32>} : memref<8x256xf32, #tpu.memory_space<vmem>>, vector<4x128xf32>,
    %c0_467 = arith.constant 0 : index
    %c0_468 = arith.constant 0 : index
    %569 = vector.load %arg42[%c0_467, %c0_468] : memref<8x256xf32, #tpu.memory_space<vmem>>, vector<4x128xf32>
    %c0_469 = arith.constant 0 : index
    %c0_470 = arith.constant 0 : index
    %570 = vector.load %arg23[%c0_469, %c0_470] : memref<10x128xf32, #tpu.memory_space<vmem>>, vector<1x128xf32>
    %571 = vector.broadcast %570 : vector<1x128xf32> to vector<4x128xf32>
    %572 = arith.mulf %569, %571 : vector<4x128xf32>
    %c0_471 = arith.constant 0 : index
    %c64_472 = arith.constant 64 : index
    %573 = vector.load %arg42[%c0_471, %c64_472] : memref<8x256xf32, #tpu.memory_space<vmem>>, vector<4x128xf32>
    %c1_473 = arith.constant 1 : index
    %c0_474 = arith.constant 0 : index
    %574 = vector.load %arg23[%c1_473, %c0_474] : memref<10x128xf32, #tpu.memory_space<vmem>>, vector<1x128xf32>
    %575 = vector.broadcast %574 : vector<1x128xf32> to vector<4x128xf32>
    %576 = arith.mulf %573, %575 : vector<4x128xf32>
    %577 = arith.addf %572, %576 : vector<4x128xf32>
    %c0_475 = arith.constant 0 : index
    %c128_476 = arith.constant 128 : index
    %578 = vector.load %arg42[%c0_475, %c128_476] : memref<8x256xf32, #tpu.memory_space<vmem>>, vector<4x128xf32>
    %c2_477 = arith.constant 2 : index
    %c0_478 = arith.constant 0 : index
    %579 = vector.load %arg23[%c2_477, %c0_478] : memref<10x128xf32, #tpu.memory_space<vmem>>, vector<1x128xf32>
    %580 = vector.broadcast %579 : vector<1x128xf32> to vector<4x128xf32>
    %581 = arith.mulf %578, %580 : vector<4x128xf32>
    %582 = arith.addf %577, %581 : vector<4x128xf32>
    %c2_479 = arith.constant 2 : index
    %c0_480 = arith.constant 0 : index
    %583 = vector.load %arg42[%c2_479, %c0_480] : memref<8x256xf32, #tpu.memory_space<vmem>>, vector<4x128xf32>
    %c3_481 = arith.constant 3 : index
    %c0_482 = arith.constant 0 : index
    %584 = vector.load %arg23[%c3_481, %c0_482] : memref<10x128xf32, #tpu.memory_space<vmem>>, vector<1x128xf32>
    %585 = vector.broadcast %584 : vector<1x128xf32> to vector<4x128xf32>
    %586 = arith.mulf %583, %585 : vector<4x128xf32>
    %587 = arith.addf %582, %586 : vector<4x128xf32>
    %c2_483 = arith.constant 2 : index
    %c64_484 = arith.constant 64 : index
    %588 = vector.load %arg42[%c2_483, %c64_484] : memref<8x256xf32, #tpu.memory_space<vmem>>, vector<4x128xf32>
    %c4_485 = arith.constant 4 : index
    %c0_486 = arith.constant 0 : index
    %589 = vector.load %arg23[%c4_485, %c0_486] : memref<10x128xf32, #tpu.memory_space<vmem>>, vector<1x128xf32>
    %590 = vector.broadcast %589 : vector<1x128xf32> to vector<4x128xf32>
    %591 = arith.mulf %588, %590 : vector<4x128xf32>
    %592 = arith.addf %587, %591 : vector<4x128xf32>
    %c2_487 = arith.constant 2 : index
    %c128_488 = arith.constant 128 : index
    %593 = vector.load %arg42[%c2_487, %c128_488] : memref<8x256xf32, #tpu.memory_space<vmem>>, vector<4x128xf32>
    %c5_489 = arith.constant 5 : index
    %c0_490 = arith.constant 0 : index
    %594 = vector.load %arg23[%c5_489, %c0_490] : memref<10x128xf32, #tpu.memory_space<vmem>>, vector<1x128xf32>
    %595 = vector.broadcast %594 : vector<1x128xf32> to vector<4x128xf32>
    %596 = arith.mulf %593, %595 : vector<4x128xf32>
    %597 = arith.addf %592, %596 : vector<4x128xf32>
    %c4_491 = arith.constant 4 : index
    %c0_492 = arith.constant 0 : index
    %598 = vector.load %arg42[%c4_491, %c0_492] : memref<8x256xf32, #tpu.memory_space<vmem>>, vector<4x128xf32>
    %c6_493 = arith.constant 6 : index
    %c0_494 = arith.constant 0 : index
    %599 = vector.load %arg23[%c6_493, %c0_494] : memref<10x128xf32, #tpu.memory_space<vmem>>, vector<1x128xf32>
    %600 = vector.broadcast %599 : vector<1x128xf32> to vector<4x128xf32>
    %601 = arith.mulf %598, %600 : vector<4x128xf32>
    %602 = arith.addf %597, %601 : vector<4x128xf32>
    %c4_495 = arith.constant 4 : index
    %c64_496 = arith.constant 64 : index
    %603 = vector.load %arg42[%c4_495, %c64_496] : memref<8x256xf32, #tpu.memory_space<vmem>>, vector<4x128xf32>
    %c7_497 = arith.constant 7 : index
    %c0_498 = arith.constant 0 : index
    %604 = vector.load %arg23[%c7_497, %c0_498] : memref<10x128xf32, #tpu.memory_space<vmem>>, vector<1x128xf32>
    %605 = vector.broadcast %604 : vector<1x128xf32> to vector<4x128xf32>
    %606 = arith.mulf %603, %605 : vector<4x128xf32>
    %607 = arith.addf %602, %606 : vector<4x128xf32>
    %c4_499 = arith.constant 4 : index
    %c128_500 = arith.constant 128 : index
    %608 = vector.load %arg42[%c4_499, %c128_500] : memref<8x256xf32, #tpu.memory_space<vmem>>, vector<4x128xf32>
    %c8_501 = arith.constant 8 : index
    %c0_502 = arith.constant 0 : index
    %609 = vector.load %arg23[%c8_501, %c0_502] : memref<10x128xf32, #tpu.memory_space<vmem>>, vector<1x128xf32>
    %610 = vector.broadcast %609 : vector<1x128xf32> to vector<4x128xf32>
    %611 = arith.mulf %608, %610 : vector<4x128xf32>
    %612 = arith.addf %607, %611 : vector<4x128xf32>
    %c9_503 = arith.constant 9 : index
    %c0_504 = arith.constant 0 : index
    %613 = vector.load %arg23[%c9_503, %c0_504] : memref<10x128xf32, #tpu.memory_space<vmem>>, vector<1x128xf32>
    %614 = vector.broadcast %613 : vector<1x128xf32> to vector<4x128xf32>
    %615 = arith.addf %612, %614 : vector<4x128xf32>
    %cst_505 = arith.constant 0.000000e+00 : f32
    %616 = vector.broadcast %cst_505 : f32 to vector<4x128xf32>
    %617 = arith.maximumf %615, %616 : vector<4x128xf32>
    %c0_506 = arith.constant 0 : index
    %c0_507 = arith.constant 0 : index
    %618 = vector.load %arg24[%c0_506, %c0_507] : memref<129x128xf32, #tpu.memory_space<vmem>>, vector<128x128xf32>
    %cst_508 = arith.constant dense<0.000000e+00> : vector<4x128xf32>
    %619 = tpu.matmul %617, %618, %cst_508 {dimension_numbers = #tpu.dot_dimension_numbers<[1], [0], [0], [1], [0, 0, 1, 1], [], []>} : vector<4x128xf32>, vector<128x128xf32>, vector<4x128xf32> -> vector<4x128xf32>
    %c128_509 = arith.constant 128 : index
    %c0_510 = arith.constant 0 : index
    %620 = vector.load %arg24[%c128_509, %c0_510] : memref<129x128xf32, #tpu.memory_space<vmem>>, vector<1x128xf32>
    %621 = vector.broadcast %620 : vector<1x128xf32> to vector<4x128xf32>
    %622 = arith.addf %619, %621 : vector<4x128xf32>
    %cst_511 = arith.constant 0.000000e+00 : f32
    %623 = vector.broadcast %cst_511 : f32 to vector<4x128xf32>
    %624 = arith.maximumf %622, %623 : vector<4x128xf32>
    %cst_512 = arith.constant 0.000000e+00 : f32
    %625 = vector.broadcast %cst_512 : f32 to vector<8x256xf32>
    %c0_513 = arith.constant 0 : index
    %c0_514 = arith.constant 0 : index
    %626 = vector.load %arg43[%c0_513, %c0_514] : memref<8x256xf32, #tpu.memory_space<vmem>>, vector<8x256xf32>
    tpu.vector_store %arg43[%c0_513, %c0_514], %625 {strides = array<i32>} : memref<8x256xf32, #tpu.memory_space<vmem>>, vector<8x256xf32>,
    %c2_515 = arith.constant 2 : index
    %c64_516 = arith.constant 64 : index
    %627 = vector.load %arg43[%c2_515, %c64_516] : memref<8x256xf32, #tpu.memory_space<vmem>>, vector<4x128xf32>
    tpu.vector_store %arg43[%c2_515, %c64_516], %624 {strides = array<i32>} : memref<8x256xf32, #tpu.memory_space<vmem>>, vector<4x128xf32>,
    %c0_517 = arith.constant 0 : index
    %c0_518 = arith.constant 0 : index
    %628 = vector.load %arg43[%c0_517, %c0_518] : memref<8x256xf32, #tpu.memory_space<vmem>>, vector<4x128xf32>
    %c0_519 = arith.constant 0 : index
    %c0_520 = arith.constant 0 : index
    %629 = vector.load %arg25[%c0_519, %c0_520] : memref<10x128xf32, #tpu.memory_space<vmem>>, vector<1x128xf32>
    %630 = vector.broadcast %629 : vector<1x128xf32> to vector<4x128xf32>
    %631 = arith.mulf %628, %630 : vector<4x128xf32>
    %c0_521 = arith.constant 0 : index
    %c64_522 = arith.constant 64 : index
    %632 = vector.load %arg43[%c0_521, %c64_522] : memref<8x256xf32, #tpu.memory_space<vmem>>, vector<4x128xf32>
    %c1_523 = arith.constant 1 : index
    %c0_524 = arith.constant 0 : index
    %633 = vector.load %arg25[%c1_523, %c0_524] : memref<10x128xf32, #tpu.memory_space<vmem>>, vector<1x128xf32>
    %634 = vector.broadcast %633 : vector<1x128xf32> to vector<4x128xf32>
    %635 = arith.mulf %632, %634 : vector<4x128xf32>
    %636 = arith.addf %631, %635 : vector<4x128xf32>
    %c0_525 = arith.constant 0 : index
    %c128_526 = arith.constant 128 : index
    %637 = vector.load %arg43[%c0_525, %c128_526] : memref<8x256xf32, #tpu.memory_space<vmem>>, vector<4x128xf32>
    %c2_527 = arith.constant 2 : index
    %c0_528 = arith.constant 0 : index
    %638 = vector.load %arg25[%c2_527, %c0_528] : memref<10x128xf32, #tpu.memory_space<vmem>>, vector<1x128xf32>
    %639 = vector.broadcast %638 : vector<1x128xf32> to vector<4x128xf32>
    %640 = arith.mulf %637, %639 : vector<4x128xf32>
    %641 = arith.addf %636, %640 : vector<4x128xf32>
    %c2_529 = arith.constant 2 : index
    %c0_530 = arith.constant 0 : index
    %642 = vector.load %arg43[%c2_529, %c0_530] : memref<8x256xf32, #tpu.memory_space<vmem>>, vector<4x128xf32>
    %c3_531 = arith.constant 3 : index
    %c0_532 = arith.constant 0 : index
    %643 = vector.load %arg25[%c3_531, %c0_532] : memref<10x128xf32, #tpu.memory_space<vmem>>, vector<1x128xf32>
    %644 = vector.broadcast %643 : vector<1x128xf32> to vector<4x128xf32>
    %645 = arith.mulf %642, %644 : vector<4x128xf32>
    %646 = arith.addf %641, %645 : vector<4x128xf32>
    %c2_533 = arith.constant 2 : index
    %c64_534 = arith.constant 64 : index
    %647 = vector.load %arg43[%c2_533, %c64_534] : memref<8x256xf32, #tpu.memory_space<vmem>>, vector<4x128xf32>
    %c4_535 = arith.constant 4 : index
    %c0_536 = arith.constant 0 : index
    %648 = vector.load %arg25[%c4_535, %c0_536] : memref<10x128xf32, #tpu.memory_space<vmem>>, vector<1x128xf32>
    %649 = vector.broadcast %648 : vector<1x128xf32> to vector<4x128xf32>
    %650 = arith.mulf %647, %649 : vector<4x128xf32>
    %651 = arith.addf %646, %650 : vector<4x128xf32>
    %c2_537 = arith.constant 2 : index
    %c128_538 = arith.constant 128 : index
    %652 = vector.load %arg43[%c2_537, %c128_538] : memref<8x256xf32, #tpu.memory_space<vmem>>, vector<4x128xf32>
    %c5_539 = arith.constant 5 : index
    %c0_540 = arith.constant 0 : index
    %653 = vector.load %arg25[%c5_539, %c0_540] : memref<10x128xf32, #tpu.memory_space<vmem>>, vector<1x128xf32>
    %654 = vector.broadcast %653 : vector<1x128xf32> to vector<4x128xf32>
    %655 = arith.mulf %652, %654 : vector<4x128xf32>
    %656 = arith.addf %651, %655 : vector<4x128xf32>
    %c4_541 = arith.constant 4 : index
    %c0_542 = arith.constant 0 : index
    %657 = vector.load %arg43[%c4_541, %c0_542] : memref<8x256xf32, #tpu.memory_space<vmem>>, vector<4x128xf32>
    %c6_543 = arith.constant 6 : index
    %c0_544 = arith.constant 0 : index
    %658 = vector.load %arg25[%c6_543, %c0_544] : memref<10x128xf32, #tpu.memory_space<vmem>>, vector<1x128xf32>
    %659 = vector.broadcast %658 : vector<1x128xf32> to vector<4x128xf32>
    %660 = arith.mulf %657, %659 : vector<4x128xf32>
    %661 = arith.addf %656, %660 : vector<4x128xf32>
    %c4_545 = arith.constant 4 : index
    %c64_546 = arith.constant 64 : index
    %662 = vector.load %arg43[%c4_545, %c64_546] : memref<8x256xf32, #tpu.memory_space<vmem>>, vector<4x128xf32>
    %c7_547 = arith.constant 7 : index
    %c0_548 = arith.constant 0 : index
    %663 = vector.load %arg25[%c7_547, %c0_548] : memref<10x128xf32, #tpu.memory_space<vmem>>, vector<1x128xf32>
    %664 = vector.broadcast %663 : vector<1x128xf32> to vector<4x128xf32>
    %665 = arith.mulf %662, %664 : vector<4x128xf32>
    %666 = arith.addf %661, %665 : vector<4x128xf32>
    %c4_549 = arith.constant 4 : index
    %c128_550 = arith.constant 128 : index
    %667 = vector.load %arg43[%c4_549, %c128_550] : memref<8x256xf32, #tpu.memory_space<vmem>>, vector<4x128xf32>
    %c8_551 = arith.constant 8 : index
    %c0_552 = arith.constant 0 : index
    %668 = vector.load %arg25[%c8_551, %c0_552] : memref<10x128xf32, #tpu.memory_space<vmem>>, vector<1x128xf32>
    %669 = vector.broadcast %668 : vector<1x128xf32> to vector<4x128xf32>
    %670 = arith.mulf %667, %669 : vector<4x128xf32>
    %671 = arith.addf %666, %670 : vector<4x128xf32>
    %c9_553 = arith.constant 9 : index
    %c0_554 = arith.constant 0 : index
    %672 = vector.load %arg25[%c9_553, %c0_554] : memref<10x128xf32, #tpu.memory_space<vmem>>, vector<1x128xf32>
    %673 = vector.broadcast %672 : vector<1x128xf32> to vector<4x128xf32>
    %674 = arith.addf %671, %673 : vector<4x128xf32>
    %cst_555 = arith.constant 0.000000e+00 : f32
    %675 = vector.broadcast %cst_555 : f32 to vector<4x128xf32>
    %676 = arith.maximumf %674, %675 : vector<4x128xf32>
    %c0_556 = arith.constant 0 : index
    %c0_557 = arith.constant 0 : index
    %677 = vector.load %arg26[%c0_556, %c0_557] : memref<129x128xf32, #tpu.memory_space<vmem>>, vector<128x128xf32>
    %cst_558 = arith.constant dense<0.000000e+00> : vector<4x128xf32>
    %678 = tpu.matmul %676, %677, %cst_558 {dimension_numbers = #tpu.dot_dimension_numbers<[1], [0], [0], [1], [0, 0, 1, 1], [], []>} : vector<4x128xf32>, vector<128x128xf32>, vector<4x128xf32> -> vector<4x128xf32>
    %c128_559 = arith.constant 128 : index
    %c0_560 = arith.constant 0 : index
    %679 = vector.load %arg26[%c128_559, %c0_560] : memref<129x128xf32, #tpu.memory_space<vmem>>, vector<1x128xf32>
    %680 = vector.broadcast %679 : vector<1x128xf32> to vector<4x128xf32>
    %681 = arith.addf %678, %680 : vector<4x128xf32>
    %cst_561 = arith.constant 0.000000e+00 : f32
    %682 = vector.broadcast %cst_561 : f32 to vector<4x128xf32>
    %683 = arith.maximumf %681, %682 : vector<4x128xf32>
    %cst_562 = arith.constant 0.000000e+00 : f32
    %684 = vector.broadcast %cst_562 : f32 to vector<16x128xf32>
    %c0_563 = arith.constant 0 : index
    %c0_564 = arith.constant 0 : index
    %685 = vector.load %arg44[%c0_563, %c0_564] : memref<16x128xf32, #tpu.memory_space<vmem>>, vector<16x128xf32>
    tpu.vector_store %arg44[%c0_563, %c0_564], %684 {strides = array<i32>} : memref<16x128xf32, #tpu.memory_space<vmem>>, vector<16x128xf32>,
    %686 = vector.extract_strided_slice %683 {offsets = [2, 64], sizes = [2, 64], strides = [1, 1]} : vector<4x128xf32> to vector<2x64xf32>
    %687 = vector.extract_strided_slice %683 {offsets = [2, 0], sizes = [2, 64], strides = [1, 1]} : vector<4x128xf32> to vector<2x64xf32>
    %688 = vector.extract_strided_slice %683 {offsets = [0, 64], sizes = [2, 64], strides = [1, 1]} : vector<4x128xf32> to vector<2x64xf32>
    %689 = vector.extract_strided_slice %683 {offsets = [0, 0], sizes = [2, 64], strides = [1, 1]} : vector<4x128xf32> to vector<2x64xf32>
    %c2_565 = arith.constant 2 : index
    %c64_566 = arith.constant 64 : index
    %690 = vector.load %arg44[%c2_565, %c64_566] : memref<16x128xf32, #tpu.memory_space<vmem>>, vector<2x64xf32>
    tpu.vector_store %arg44[%c2_565, %c64_566], %686 {strides = array<i32>} : memref<16x128xf32, #tpu.memory_space<vmem>>, vector<2x64xf32>,
    %c6_567 = arith.constant 6 : index
    %c0_568 = arith.constant 0 : index
    %691 = vector.load %arg44[%c6_567, %c0_568] : memref<16x128xf32, #tpu.memory_space<vmem>>, vector<2x64xf32>
    tpu.vector_store %arg44[%c6_567, %c0_568], %687 {strides = array<i32>} : memref<16x128xf32, #tpu.memory_space<vmem>>, vector<2x64xf32>,
    %c8_569 = arith.constant 8 : index
    %c64_570 = arith.constant 64 : index
    %692 = vector.load %arg44[%c8_569, %c64_570] : memref<16x128xf32, #tpu.memory_space<vmem>>, vector<2x64xf32>
    tpu.vector_store %arg44[%c8_569, %c64_570], %688 {strides = array<i32>} : memref<16x128xf32, #tpu.memory_space<vmem>>, vector<2x64xf32>,
    %c12_571 = arith.constant 12 : index
    %c0_572 = arith.constant 0 : index
    %693 = vector.load %arg44[%c12_571, %c0_572] : memref<16x128xf32, #tpu.memory_space<vmem>>, vector<2x64xf32>
    tpu.vector_store %arg44[%c12_571, %c0_572], %689 {strides = array<i32>} : memref<16x128xf32, #tpu.memory_space<vmem>>, vector<2x64xf32>,
    %c0_573 = arith.constant 0 : index
    %c0_574 = arith.constant 0 : index
    %694 = vector.load %arg44[%c0_573, %c0_574] : memref<16x128xf32, #tpu.memory_space<vmem>>, vector<2x64xf32>
    %c0_575 = arith.constant 0 : index
    %c0_576 = arith.constant 0 : index
    %695 = vector.load %arg27[%c0_575, %c0_576] : memref<10x64xf32, #tpu.memory_space<vmem>>, vector<1x64xf32>
    %696 = vector.broadcast %695 : vector<1x64xf32> to vector<2x64xf32>
    %697 = arith.mulf %694, %696 : vector<2x64xf32>
    %c4_577 = arith.constant 4 : index
    %c0_578 = arith.constant 0 : index
    %698 = vector.load %arg44[%c4_577, %c0_578] : memref<16x128xf32, #tpu.memory_space<vmem>>, vector<2x64xf32>
    %c1_579 = arith.constant 1 : index
    %c0_580 = arith.constant 0 : index
    %699 = vector.load %arg27[%c1_579, %c0_580] : memref<10x64xf32, #tpu.memory_space<vmem>>, vector<1x64xf32>
    %700 = vector.broadcast %699 : vector<1x64xf32> to vector<2x64xf32>
    %701 = arith.mulf %698, %700 : vector<2x64xf32>
    %702 = arith.addf %697, %701 : vector<2x64xf32>
    %c0_581 = arith.constant 0 : index
    %c64_582 = arith.constant 64 : index
    %703 = vector.load %arg44[%c0_581, %c64_582] : memref<16x128xf32, #tpu.memory_space<vmem>>, vector<2x64xf32>
    %c2_583 = arith.constant 2 : index
    %c0_584 = arith.constant 0 : index
    %704 = vector.load %arg27[%c2_583, %c0_584] : memref<10x64xf32, #tpu.memory_space<vmem>>, vector<1x64xf32>
    %705 = vector.broadcast %704 : vector<1x64xf32> to vector<2x64xf32>
    %706 = arith.mulf %703, %705 : vector<2x64xf32>
    %707 = arith.addf %702, %706 : vector<2x64xf32>
    %c8_585 = arith.constant 8 : index
    %c0_586 = arith.constant 0 : index
    %708 = vector.load %arg44[%c8_585, %c0_586] : memref<16x128xf32, #tpu.memory_space<vmem>>, vector<2x64xf32>
    %c3_587 = arith.constant 3 : index
    %c0_588 = arith.constant 0 : index
    %709 = vector.load %arg27[%c3_587, %c0_588] : memref<10x64xf32, #tpu.memory_space<vmem>>, vector<1x64xf32>
    %710 = vector.broadcast %709 : vector<1x64xf32> to vector<2x64xf32>
    %711 = arith.mulf %708, %710 : vector<2x64xf32>
    %712 = arith.addf %707, %711 : vector<2x64xf32>
    %c12_589 = arith.constant 12 : index
    %c0_590 = arith.constant 0 : index
    %713 = vector.load %arg44[%c12_589, %c0_590] : memref<16x128xf32, #tpu.memory_space<vmem>>, vector<2x64xf32>
    %c4_591 = arith.constant 4 : index
    %c0_592 = arith.constant 0 : index
    %714 = vector.load %arg27[%c4_591, %c0_592] : memref<10x64xf32, #tpu.memory_space<vmem>>, vector<1x64xf32>
    %715 = vector.broadcast %714 : vector<1x64xf32> to vector<2x64xf32>
    %716 = arith.mulf %713, %715 : vector<2x64xf32>
    %717 = arith.addf %712, %716 : vector<2x64xf32>
    %c8_593 = arith.constant 8 : index
    %c64_594 = arith.constant 64 : index
    %718 = vector.load %arg44[%c8_593, %c64_594] : memref<16x128xf32, #tpu.memory_space<vmem>>, vector<2x64xf32>
    %c5_595 = arith.constant 5 : index
    %c0_596 = arith.constant 0 : index
    %719 = vector.load %arg27[%c5_595, %c0_596] : memref<10x64xf32, #tpu.memory_space<vmem>>, vector<1x64xf32>
    %720 = vector.broadcast %719 : vector<1x64xf32> to vector<2x64xf32>
    %721 = arith.mulf %718, %720 : vector<2x64xf32>
    %722 = arith.addf %717, %721 : vector<2x64xf32>
    %c2_597 = arith.constant 2 : index
    %c0_598 = arith.constant 0 : index
    %723 = vector.load %arg44[%c2_597, %c0_598] : memref<16x128xf32, #tpu.memory_space<vmem>>, vector<2x64xf32>
    %c6_599 = arith.constant 6 : index
    %c0_600 = arith.constant 0 : index
    %724 = vector.load %arg27[%c6_599, %c0_600] : memref<10x64xf32, #tpu.memory_space<vmem>>, vector<1x64xf32>
    %725 = vector.broadcast %724 : vector<1x64xf32> to vector<2x64xf32>
    %726 = arith.mulf %723, %725 : vector<2x64xf32>
    %727 = arith.addf %722, %726 : vector<2x64xf32>
    %c6_601 = arith.constant 6 : index
    %c0_602 = arith.constant 0 : index
    %728 = vector.load %arg44[%c6_601, %c0_602] : memref<16x128xf32, #tpu.memory_space<vmem>>, vector<2x64xf32>
    %c7_603 = arith.constant 7 : index
    %c0_604 = arith.constant 0 : index
    %729 = vector.load %arg27[%c7_603, %c0_604] : memref<10x64xf32, #tpu.memory_space<vmem>>, vector<1x64xf32>
    %730 = vector.broadcast %729 : vector<1x64xf32> to vector<2x64xf32>
    %731 = arith.mulf %728, %730 : vector<2x64xf32>
    %732 = arith.addf %727, %731 : vector<2x64xf32>
    %c2_605 = arith.constant 2 : index
    %c64_606 = arith.constant 64 : index
    %733 = vector.load %arg44[%c2_605, %c64_606] : memref<16x128xf32, #tpu.memory_space<vmem>>, vector<2x64xf32>
    %c8_607 = arith.constant 8 : index
    %c0_608 = arith.constant 0 : index
    %734 = vector.load %arg27[%c8_607, %c0_608] : memref<10x64xf32, #tpu.memory_space<vmem>>, vector<1x64xf32>
    %735 = vector.broadcast %734 : vector<1x64xf32> to vector<2x64xf32>
    %736 = arith.mulf %733, %735 : vector<2x64xf32>
    %737 = arith.addf %732, %736 : vector<2x64xf32>
    %c9_609 = arith.constant 9 : index
    %c0_610 = arith.constant 0 : index
    %738 = vector.load %arg27[%c9_609, %c0_610] : memref<10x64xf32, #tpu.memory_space<vmem>>, vector<1x64xf32>
    %739 = vector.broadcast %738 : vector<1x64xf32> to vector<2x64xf32>
    %740 = arith.addf %737, %739 : vector<2x64xf32>
    %cst_611 = arith.constant 0.000000e+00 : f32
    %741 = vector.broadcast %cst_611 : f32 to vector<2x64xf32>
    %742 = arith.maximumf %740, %741 : vector<2x64xf32>
    %c0_612 = arith.constant 0 : index
    %c0_613 = arith.constant 0 : index
    %743 = vector.load %arg28[%c0_612, %c0_613] : memref<65x128xf32, #tpu.memory_space<vmem>>, vector<64x128xf32>
    %cst_614 = arith.constant dense<0.000000e+00> : vector<2x128xf32>
    %744 = tpu.matmul %742, %743, %cst_614 {dimension_numbers = #tpu.dot_dimension_numbers<[1], [0], [0], [1], [0, 0, 1, 1], [], []>} : vector<2x64xf32>, vector<64x128xf32>, vector<2x128xf32> -> vector<2x128xf32>
    %c64_615 = arith.constant 64 : index
    %c0_616 = arith.constant 0 : index
    %745 = vector.load %arg28[%c64_615, %c0_616] : memref<65x128xf32, #tpu.memory_space<vmem>>, vector<1x128xf32>
    %746 = vector.broadcast %745 : vector<1x128xf32> to vector<2x128xf32>
    %747 = arith.addf %744, %746 : vector<2x128xf32>
    %cst_617 = arith.constant 0.000000e+00 : f32
    %748 = vector.broadcast %cst_617 : f32 to vector<2x128xf32>
    %749 = arith.maximumf %747, %748 : vector<2x128xf32>
    %cst_618 = arith.constant 0.000000e+00 : f32
    %750 = vector.broadcast %cst_618 : f32 to vector<6x384xf32>
    %c0_619 = arith.constant 0 : index
    %c0_620 = arith.constant 0 : index
    %751 = vector.load %arg45[%c0_619, %c0_620] : memref<6x384xf32, #tpu.memory_space<vmem>>, vector<6x384xf32>
    tpu.vector_store %arg45[%c0_619, %c0_620], %750 {strides = array<i32>} : memref<6x384xf32, #tpu.memory_space<vmem>>, vector<6x384xf32>,
    %c2_621 = arith.constant 2 : index
    %c128_622 = arith.constant 128 : index
    %752 = vector.load %arg45[%c2_621, %c128_622] : memref<6x384xf32, #tpu.memory_space<vmem>>, vector<2x128xf32>
    tpu.vector_store %arg45[%c2_621, %c128_622], %749 {strides = array<i32>} : memref<6x384xf32, #tpu.memory_space<vmem>>, vector<2x128xf32>,
    %c0_623 = arith.constant 0 : index
    %c0_624 = arith.constant 0 : index
    %753 = vector.load %arg45[%c0_623, %c0_624] : memref<6x384xf32, #tpu.memory_space<vmem>>, vector<2x128xf32>
    %c0_625 = arith.constant 0 : index
    %c0_626 = arith.constant 0 : index
    %754 = vector.load %arg29[%c0_625, %c0_626] : memref<10x128xf32, #tpu.memory_space<vmem>>, vector<1x128xf32>
    %755 = vector.broadcast %754 : vector<1x128xf32> to vector<2x128xf32>
    %756 = arith.mulf %753, %755 : vector<2x128xf32>
    %c0_627 = arith.constant 0 : index
    %c128_628 = arith.constant 128 : index
    %757 = vector.load %arg45[%c0_627, %c128_628] : memref<6x384xf32, #tpu.memory_space<vmem>>, vector<2x128xf32>
    %c1_629 = arith.constant 1 : index
    %c0_630 = arith.constant 0 : index
    %758 = vector.load %arg29[%c1_629, %c0_630] : memref<10x128xf32, #tpu.memory_space<vmem>>, vector<1x128xf32>
    %759 = vector.broadcast %758 : vector<1x128xf32> to vector<2x128xf32>
    %760 = arith.mulf %757, %759 : vector<2x128xf32>
    %761 = arith.addf %756, %760 : vector<2x128xf32>
    %c0_631 = arith.constant 0 : index
    %c256 = arith.constant 256 : index
    %762 = vector.load %arg45[%c0_631, %c256] : memref<6x384xf32, #tpu.memory_space<vmem>>, vector<2x128xf32>
    %c2_632 = arith.constant 2 : index
    %c0_633 = arith.constant 0 : index
    %763 = vector.load %arg29[%c2_632, %c0_633] : memref<10x128xf32, #tpu.memory_space<vmem>>, vector<1x128xf32>
    %764 = vector.broadcast %763 : vector<1x128xf32> to vector<2x128xf32>
    %765 = arith.mulf %762, %764 : vector<2x128xf32>
    %766 = arith.addf %761, %765 : vector<2x128xf32>
    %c2_634 = arith.constant 2 : index
    %c0_635 = arith.constant 0 : index
    %767 = vector.load %arg45[%c2_634, %c0_635] : memref<6x384xf32, #tpu.memory_space<vmem>>, vector<2x128xf32>
    %c3_636 = arith.constant 3 : index
    %c0_637 = arith.constant 0 : index
    %768 = vector.load %arg29[%c3_636, %c0_637] : memref<10x128xf32, #tpu.memory_space<vmem>>, vector<1x128xf32>
    %769 = vector.broadcast %768 : vector<1x128xf32> to vector<2x128xf32>
    %770 = arith.mulf %767, %769 : vector<2x128xf32>
    %771 = arith.addf %766, %770 : vector<2x128xf32>
    %c2_638 = arith.constant 2 : index
    %c128_639 = arith.constant 128 : index
    %772 = vector.load %arg45[%c2_638, %c128_639] : memref<6x384xf32, #tpu.memory_space<vmem>>, vector<2x128xf32>
    %c4_640 = arith.constant 4 : index
    %c0_641 = arith.constant 0 : index
    %773 = vector.load %arg29[%c4_640, %c0_641] : memref<10x128xf32, #tpu.memory_space<vmem>>, vector<1x128xf32>
    %774 = vector.broadcast %773 : vector<1x128xf32> to vector<2x128xf32>
    %775 = arith.mulf %772, %774 : vector<2x128xf32>
    %776 = arith.addf %771, %775 : vector<2x128xf32>
    %c2_642 = arith.constant 2 : index
    %c256_643 = arith.constant 256 : index
    %777 = vector.load %arg45[%c2_642, %c256_643] : memref<6x384xf32, #tpu.memory_space<vmem>>, vector<2x128xf32>
    %c5_644 = arith.constant 5 : index
    %c0_645 = arith.constant 0 : index
    %778 = vector.load %arg29[%c5_644, %c0_645] : memref<10x128xf32, #tpu.memory_space<vmem>>, vector<1x128xf32>
    %779 = vector.broadcast %778 : vector<1x128xf32> to vector<2x128xf32>
    %780 = arith.mulf %777, %779 : vector<2x128xf32>
    %781 = arith.addf %776, %780 : vector<2x128xf32>
    %c4_646 = arith.constant 4 : index
    %c0_647 = arith.constant 0 : index
    %782 = vector.load %arg45[%c4_646, %c0_647] : memref<6x384xf32, #tpu.memory_space<vmem>>, vector<2x128xf32>
    %c6_648 = arith.constant 6 : index
    %c0_649 = arith.constant 0 : index
    %783 = vector.load %arg29[%c6_648, %c0_649] : memref<10x128xf32, #tpu.memory_space<vmem>>, vector<1x128xf32>
    %784 = vector.broadcast %783 : vector<1x128xf32> to vector<2x128xf32>
    %785 = arith.mulf %782, %784 : vector<2x128xf32>
    %786 = arith.addf %781, %785 : vector<2x128xf32>
    %c4_650 = arith.constant 4 : index
    %c128_651 = arith.constant 128 : index
    %787 = vector.load %arg45[%c4_650, %c128_651] : memref<6x384xf32, #tpu.memory_space<vmem>>, vector<2x128xf32>
    %c7_652 = arith.constant 7 : index
    %c0_653 = arith.constant 0 : index
    %788 = vector.load %arg29[%c7_652, %c0_653] : memref<10x128xf32, #tpu.memory_space<vmem>>, vector<1x128xf32>
    %789 = vector.broadcast %788 : vector<1x128xf32> to vector<2x128xf32>
    %790 = arith.mulf %787, %789 : vector<2x128xf32>
    %791 = arith.addf %786, %790 : vector<2x128xf32>
    %c4_654 = arith.constant 4 : index
    %c256_655 = arith.constant 256 : index
    %792 = vector.load %arg45[%c4_654, %c256_655] : memref<6x384xf32, #tpu.memory_space<vmem>>, vector<2x128xf32>
    %c8_656 = arith.constant 8 : index
    %c0_657 = arith.constant 0 : index
    %793 = vector.load %arg29[%c8_656, %c0_657] : memref<10x128xf32, #tpu.memory_space<vmem>>, vector<1x128xf32>
    %794 = vector.broadcast %793 : vector<1x128xf32> to vector<2x128xf32>
    %795 = arith.mulf %792, %794 : vector<2x128xf32>
    %796 = arith.addf %791, %795 : vector<2x128xf32>
    %c9_658 = arith.constant 9 : index
    %c0_659 = arith.constant 0 : index
    %797 = vector.load %arg29[%c9_658, %c0_659] : memref<10x128xf32, #tpu.memory_space<vmem>>, vector<1x128xf32>
    %798 = vector.broadcast %797 : vector<1x128xf32> to vector<2x128xf32>
    %799 = arith.addf %796, %798 : vector<2x128xf32>
    %cst_660 = arith.constant 0.000000e+00 : f32
    %800 = vector.broadcast %cst_660 : f32 to vector<2x128xf32>
    %801 = arith.maximumf %799, %800 : vector<2x128xf32>
    %c0_661 = arith.constant 0 : index
    %c0_662 = arith.constant 0 : index
    %802 = vector.load %arg30[%c0_661, %c0_662] : memref<129x128xf32, #tpu.memory_space<vmem>>, vector<128x128xf32>
    %cst_663 = arith.constant dense<0.000000e+00> : vector<2x128xf32>
    %803 = tpu.matmul %801, %802, %cst_663 {dimension_numbers = #tpu.dot_dimension_numbers<[1], [0], [0], [1], [0, 0, 1, 1], [], []>} : vector<2x128xf32>, vector<128x128xf32>, vector<2x128xf32> -> vector<2x128xf32>
    %c128_664 = arith.constant 128 : index
    %c0_665 = arith.constant 0 : index
    %804 = vector.load %arg30[%c128_664, %c0_665] : memref<129x128xf32, #tpu.memory_space<vmem>>, vector<1x128xf32>
    %805 = vector.broadcast %804 : vector<1x128xf32> to vector<2x128xf32>
    %806 = arith.addf %803, %805 : vector<2x128xf32>
    %cst_666 = arith.constant 0.000000e+00 : f32
    %807 = vector.broadcast %cst_666 : f32 to vector<2x128xf32>
    %808 = arith.maximumf %806, %807 : vector<2x128xf32>
    %c0_667 = arith.constant 0 : index
    %c0_668 = arith.constant 0 : index
    %809 = vector.load %arg31[%c0_667, %c0_668] : memref<129x10xf32, #tpu.memory_space<vmem>>, vector<128x10xf32>
    %cst_669 = arith.constant dense<0.000000e+00> : vector<2x10xf32>
    %810 = tpu.matmul %808, %809, %cst_669 {dimension_numbers = #tpu.dot_dimension_numbers<[1], [0], [0], [1], [0, 0, 1, 1], [], []>} : vector<2x128xf32>, vector<128x10xf32>, vector<2x10xf32> -> vector<2x10xf32>
    %c128_670 = arith.constant 128 : index
    %c0_671 = arith.constant 0 : index
    %811 = vector.load %arg31[%c128_670, %c0_671] : memref<129x10xf32, #tpu.memory_space<vmem>>, vector<1x10xf32>
    %812 = vector.broadcast %811 : vector<1x10xf32> to vector<2x10xf32>
    %813 = arith.addf %810, %812 : vector<2x10xf32>
    %c0_672 = arith.constant 0 : index
    %c0_673 = arith.constant 0 : index
    %814 = vector.load %arg32[%c0_672, %c0_673] : memref<2x10xf32, #tpu.memory_space<vmem>>, vector<2x10xf32>
    tpu.vector_store %arg32[%c0_672, %c0_673], %813 {strides = array<i32>} : memref<2x10xf32, #tpu.memory_space<vmem>>, vector<2x10xf32>,
    return
  }
}

</mosaic_0001>

<bundles_post_ra>
// kernel: forward.1
= control target key start
LH: loop header
LB: loop body
LE: loop exit
PB: predicated region body
PF: predicated region fallthrough
CT: control target
= control target key end

     0   :  { %s5541_s6 = smov 1   ;;  %s5542_s10 = smov 2   ;;  %s6742_s0 = inlined_call_operand.smem [shape: u32[33], index: -1, kind: input, shape index: {}] }
   0x1   :  { %s5596_s5 = sld [smem:[%s6742_s0]]   ;;  %s5543_s14 = smov 3  }
   0x2   :  { %s5601_s9 = sld [smem:[%s6742_s0 + %s5541_s6]]   ;;  %s5544_s18 = smov 4  }
   0x3   :  { %s5606_s13 = sld [smem:[%s6742_s0 + %s5542_s10]]   ;;  %s5545_s22 = smov 5  }
   0x4   :  { %s5611_s17 = sld [smem:[%s6742_s0 + %s5543_s14]]   ;;  %s5546_s26 = smov 6  }
   0x5   :  { %s5616_s21 = sld [smem:[%s6742_s0 + %s5544_s18]]   ;;  %s5547_s30 = smov 7  }
   0x6   :  { %s5621_s25 = sld [smem:[%s6742_s0 + %s5545_s22]]   ;;  %s5548_s4 = smov 8  }
   0x7   :  { %s5626_s29 = sld [smem:[%s6742_s0 + %s5546_s26]]   ;;  %s5549_s10 = smov 9  }
   0x8   :  { %s5631_s3 = sld [smem:[%s6742_s0 + %s5547_s30]]   ;;  %s5550_s15 = smov 10  }
   0x9   :  { %s5636_s8 = sld [smem:[%s6742_s0 + %s5548_s4]]   ;;  %s5551_s20 = smov 11  }
   0xa   :  { %s5641_s14 = sld [smem:[%s6742_s0 + %s5549_s10]]   ;;  %s5552_s26 = smov 12  }
   0xb   :  { %s5646_s19 = sld [smem:[%s6742_s0 + %s5550_s15]]   ;;  %s5553_s1 = smov 13  }
   0xc   :  { %s5651_s24 = sld [smem:[%s6742_s0 + %s5551_s20]]   ;;  %s5554_s7 = smov 14  }
   0xd   :  { %s5656_s30 = sld [smem:[%s6742_s0 + %s5552_s26]]   ;;  %s5555_s15 = smov 15  }
   0xe   :  { %s5661_s6 = sld [smem:[%s6742_s0 + %s5553_s1]]   ;;  %s5556_s22 = smov 16  }
   0xf   :  { %s5666_s12 = sld [smem:[%s6742_s0 + %s5554_s7]]   ;;  %s5557_s28 = smov 17  }
  0x10   :  { %s5671_s20 = sld [smem:[%s6742_s0 + %s5555_s15]]   ;;  %s5558_s7 = smov 18  }
  0x11   :  { %s5676_s27 = sld [smem:[%s6742_s0 + %s5556_s22]]   ;;  %s5559_s15 = smov 19  }
  0x12   :  { %s5681_s4 = sld [smem:[%s6742_s0 + %s5557_s28]]   ;;  %s5560_s22 = smov 20  }
  0x13   :  { %s5561_s28 = smov 21  }
  0x15   :  { %6757 = sst [smem:[#allocation18_spill]] %s5666_s12 }
  0x16   :  { %6758 = sst [smem:[#allocation19_spill]] %s5671_s20 }
  0x17   :  { %6759 = sst [smem:[#allocation20_spill]] %s5676_s27 }
  0x18   :  { %6760 = sst [smem:[#allocation21_spill]] %s5681_s4 }
  0x19   :  { %s5686_s12 = sld [smem:[%s6742_s0 + %s5558_s7]]   ;;  %s5562_s7 = smov 22  }
  0x1a   :  { %s5691_s20 = sld [smem:[%s6742_s0 + %s5559_s15]]   ;;  %s5563_s15 = smov 23  }
  0x1b   :  { %s5696_s27 = sld [smem:[%s6742_s0 + %s5560_s22]]   ;;  %s5564_s22 = smov 24  }
  0x1c   :  { %s5701_s4 = sld [smem:[%s6742_s0 + %s5561_s28]]   ;;  %s5565_s28 = smov 25  }
  0x1f   :  { %6761 = sst [smem:[#allocation22_spill]] %s5686_s12 }
  0x20   :  { %6762 = sst [smem:[#allocation23_spill]] %s5691_s20 }
  0x21   :  { %6763 = sst [smem:[#allocation24_spill]] %s5696_s27 }
  0x22   :  { %6764 = sst [smem:[#allocation25_spill]] %s5701_s4 }
  0x23   :  { %s5706_s12 = sld [smem:[%s6742_s0 + %s5562_s7]]   ;;  %s5566_s7 = smov 26  }
  0x24   :  { %s5711_s20 = sld [smem:[%s6742_s0 + %s5563_s15]]   ;;  %s5567_s15 = smov 27  }
  0x25   :  { %s5716_s27 = sld [smem:[%s6742_s0 + %s5564_s22]]   ;;  %s5568_s22 = smov 28  }
  0x26   :  { %s5721_s4 = sld [smem:[%s6742_s0 + %s5565_s28]]   ;;  %s5569_s28 = smov 29  }
  0x29   :  { %6765 = sst [smem:[#allocation26_spill]] %s5706_s12 }
  0x2a   :  { %6766 = sst [smem:[#allocation27_spill]] %s5711_s20 }
  0x2b   :  { %6767 = sst [smem:[#allocation28_spill]] %s5716_s27 }
  0x2c   :  { %6768 = sst [smem:[#allocation29_spill]] %s5721_s4 }
  0x2d   :  { %s5726_s12 = sld [smem:[%s6742_s0 + %s5566_s7]]   ;;  %s5570_s7 = smov 30  }
  0x2e   :  { %s5731_s20 = sld [smem:[%s6742_s0 + %s5567_s15]]   ;;  %s5571_s15 = smov 31  }
  0x2f   :  { %s5736_s27 = sld [smem:[%s6742_s0 + %s5568_s22]]   ;;  %s5572_s22 = smov 32  }
  0x30   :  { %s5741_s4 = sld [smem:[%s6742_s0 + %s5569_s28]]  }
  0x33   :  { %6769 = sst [smem:[#allocation30_spill]] %s5726_s12 }
  0x34   :  { %6770 = sst [smem:[#allocation31_spill]] %s5731_s20 }
  0x35   :  { %6771 = sst [smem:[#allocation32_spill]] %s5736_s27 }
  0x36   :  { %s5746_s12 = sld [smem:[%s6742_s0 + %s5570_s7]]  }
  0x37   :  { %s5751_s20 = sld [smem:[%s6742_s0 + %s5571_s15]]  }
  0x38   :  { %s5756_s27 = sld [smem:[%s6742_s0 + %s5572_s22]]  }
  0x39   :  { %v167_v0 = vld [vmem:[%s5601_s9 + $0x80] sm:$0xff]  ;;  %v168_v1 = vld [vmem:[%s5601_s9 + $0x88] sm:$0xff]  ;;  %v169_v11 = vld [vmem:[%s5601_s9 + $0x90] sm:$0xff] }
  0x3a   :  { %v151_v2 = vld [vmem:[%s5601_s9] sm:$0xff]  ;;  %v5100_v3 = vpack.c.bf16 %v168_v1, %v167_v0  ;;  %v152_v4 = vld [vmem:[%s5601_s9 + $0x8] sm:$0xff]  ;;  %v170_v13 = vld [vmem:[%s5601_s9 + $0x98] sm:$0xff] }
  0x3b   :  { %v199_v5 = vld [vmem:[%s5601_s9 + $0x180] sm:$0xff]  ;;  %v200_v6 = vld [vmem:[%s5601_s9 + $0x188] sm:$0xff]  ;;  %v5102_v7 = vpack.c.bf16 %v152_v4, %v151_v2  ;;  %v153_v14 = vld [vmem:[%s5601_s9 + $0x10] sm:$0xff]  ;;  %v5104_v16 = vpack.c.bf16 %v170_v13, %v169_v11 }
  0x3c   :  { %v5132_v8 = vpack.c.bf16 %v200_v6, %v199_v5  ;;  %v183_v9 = vld [vmem:[%s5601_s9 + $0x100] sm:$0xff]  ;;  %v184_v10 = vld [vmem:[%s5601_s9 + $0x108] sm:$0xff]  ;;  %5101 = vmatprep.subr.bf16.mxu0 %v5100_v3  ;;  %v154_v15 = vld [vmem:[%s5601_s9 + $0x18] sm:$0xff] }
  0x3d   :  { %v5134_v12 = vpack.c.bf16 %v184_v10, %v183_v9  ;;  %5103 = vmatpush3.bf16.msra.mxu0 %v5102_v7  ;;  %v5106_v17 = vpack.c.bf16 %v154_v15, %v153_v14  ;;  %v201_v18 = vld [vmem:[%s5601_s9 + $0x190] sm:$0xff]  ;;  %v202_v19 = vld [vmem:[%s5601_s9 + $0x198] sm:$0xff]  ;;  %v171_v23 = vld [vmem:[%s5601_s9 + $0xa0] sm:$0xff] }
  0x3e   :  { %5133 = vmatprep.subr.bf16.mxu1 %v5132_v8  ;;  %v185_v20 = vld [vmem:[%s5601_s9 + $0x110] sm:$0xff]  ;;  %v5136_v21 = vpack.c.bf16 %v202_v19, %v201_v18  ;;  %v186_v22 = vld [vmem:[%s5601_s9 + $0x118] sm:$0xff]  ;;  %v172_v24 = vld [vmem:[%s5601_s9 + $0xa8] sm:$0xff]  ;;  %5105 = vmatprep.subr.bf16.mxu0 %v5104_v16 }
  0x3f   :  { %5135 = vmatpush3.bf16.msra.mxu1 %v5134_v12  ;;  %v5138_v25 = vpack.c.bf16 %v186_v22, %v185_v20  ;;  %v5108_v26 = vpack.c.bf16 %v172_v24, %v171_v23  ;;  %v155_v27 = vld [vmem:[%s5601_s9 + $0x20] sm:$0xff]  ;;  %v156_v28 = vld [vmem:[%s5601_s9 + $0x28] sm:$0xff]  ;;  %v173_v35 = vld [vmem:[%s5601_s9 + $0xb0] sm:$0xff] }
  0x40   :  { %v203_v29 = vld [vmem:[%s5601_s9 + $0x1a0] sm:$0xff]  ;;  %5137 = vmatprep.subr.bf16.mxu1 %v5136_v21  ;;  %v204_v30 = vld [vmem:[%s5601_s9 + $0x1a8] sm:$0xff]  ;;  %v5110_v33 = vpack.c.bf16 %v156_v28, %v155_v27  ;;  %v174_v36 = vld [vmem:[%s5601_s9 + $0xb8] sm:$0xff] }
  0x41   :  { %v187_v31 = vld [vmem:[%s5601_s9 + $0x120] sm:$0xff]  ;;  %v188_v32 = vld [vmem:[%s5601_s9 + $0x128] sm:$0xff]  ;;  %5107 = vmatpush3.bf16.msra.mxu0 %v5106_v17  ;;  %v5140_v34 = vpack.c.bf16 %v204_v30, %v203_v29  ;;  %v157_v37 = vld [vmem:[%s5601_s9 + $0x30] sm:$0xff]  ;;  %v5112_v39 = vpack.c.bf16 %v174_v36, %v173_v35 }
  0x42   :  { %5109 = vmatprep.subr.bf16.mxu0 %v5108_v26  ;;  %v5142_v38 = vpack.c.bf16 %v188_v32, %v187_v31  ;;  %v158_v40 = vld [vmem:[%s5601_s9 + $0x38] sm:$0xff]  ;;  %v205_v41 = vld [vmem:[%s5601_s9 + $0x1b0] sm:$0xff]  ;;  %v175_v46 = vld [vmem:[%s5601_s9 + $0xc0] sm:$0xff] }
  0x43   :  { %5139 = vmatpush3.bf16.msra.mxu1 %v5138_v25  ;;  %v206_v42 = vld [vmem:[%s5601_s9 + $0x1b8] sm:$0xff]  ;;  %v189_v44 = vld [vmem:[%s5601_s9 + $0x130] sm:$0xff]  ;;  %v176_v47 = vld [vmem:[%s5601_s9 + $0xc8] sm:$0xff]  ;;  %v5114_v48 = vpack.c.bf16 %v158_v40, %v157_v37 }
  0x44   :  { %5141 = vmatprep.subr.bf16.mxu1 %v5140_v34  ;;  %v5144_v43 = vpack.c.bf16 %v206_v42, %v205_v41  ;;  %v190_v45 = vld [vmem:[%s5601_s9 + $0x138] sm:$0xff]  ;;  %v207_v49 = vld [vmem:[%s5601_s9 + $0x1c0] sm:$0xff]  ;;  %v208_v50 = vld [vmem:[%s5601_s9 + $0x1c8] sm:$0xff]  ;;  %v5116_v52 = vpack.c.bf16 %v176_v47, %v175_v46 }
  0x45   :  { %5111 = vmatpush3.bf16.msra.mxu0 %v5110_v33  ;;  %v5146_v51 = vpack.c.bf16 %v190_v45, %v189_v44  ;;  %v159_v53 = vld [vmem:[%s5601_s9 + $0x40] sm:$0xff]  ;;  %v160_v54 = vld [vmem:[%s5601_s9 + $0x48] sm:$0xff]  ;;  %v5148_v56 = vpack.c.bf16 %v208_v50, %v207_v49  ;;  %v177_v58 = vld [vmem:[%s5601_s9 + $0xd0] sm:$0xff] }
  0x46   :  { %5113 = vmatprep.subr.bf16.mxu0 %v5112_v39  ;;  %v191_v55 = vld [vmem:[%s5601_s9 + $0x140] sm:$0xff]  ;;  %v192_v57 = vld [vmem:[%s5601_s9 + $0x148] sm:$0xff]  ;;  %v178_v59 = vld [vmem:[%s5601_s9 + $0xd8] sm:$0xff]  ;;  %v5118_v62 = vpack.c.bf16 %v160_v54, %v159_v53 }
  0x47   :  { %5143 = vmatpush3.bf16.msra.mxu1 %v5142_v38  ;;  %v209_v60 = vld [vmem:[%s5601_s9 + $0x1d0] sm:$0xff]  ;;  %v210_v61 = vld [vmem:[%s5601_s9 + $0x1d8] sm:$0xff]  ;;  %v5150_v63 = vpack.c.bf16 %v192_v57, %v191_v55  ;;  %v5120_v0 = vpack.c.bf16 %v178_v59, %v177_v58  ;;  %v179_v6 = vld [vmem:[%s5601_s9 + $0xe0] sm:$0xff] }
  0x48   :  { %5145 = vmatprep.subr.bf16.mxu1 %v5144_v43  ;;  %v161_v1 = vld [vmem:[%s5601_s9 + $0x50] sm:$0xff]  ;;  %v162_v2 = vld [vmem:[%s5601_s9 + $0x58] sm:$0xff]  ;;  %v5152_v4 = vpack.c.bf16 %v210_v61, %v209_v60  ;;  %v180_v7 = vld [vmem:[%s5601_s9 + $0xe8] sm:$0xff] }
  0x49   :  { %5115 = vmatpush3.bf16.msra.mxu0 %v5114_v48  ;;  %v193_v3 = vld [vmem:[%s5601_s9 + $0x150] sm:$0xff]  ;;  %v194_v5 = vld [vmem:[%s5601_s9 + $0x158] sm:$0xff]  ;;  %v211_v8 = vld [vmem:[%s5601_s9 + $0x1e0] sm:$0xff]  ;;  %v5122_v10 = vpack.c.bf16 %v162_v2, %v161_v1  ;;  %v5124_v14 = vpack.c.bf16 %v180_v7, %v179_v6 }
  0x4a   :  { %5117 = vmatprep.subr.bf16.mxu0 %v5116_v52  ;;  %v212_v9 = vld [vmem:[%s5601_s9 + $0x1e8] sm:$0xff]  ;;  %v163_v11 = vld [vmem:[%s5601_s9 + $0x60] sm:$0xff]  ;;  %v5154_v13 = vpack.c.bf16 %v194_v5, %v193_v3  ;;  %v181_v19 = vld [vmem:[%s5601_s9 + $0xf0] sm:$0xff] }
  0x4b   :  { %5147 = vmatpush3.bf16.msra.mxu1 %v5146_v51  ;;  %v164_v12 = vld [vmem:[%s5601_s9 + $0x68] sm:$0xff]  ;;  %v195_v15 = vld [vmem:[%s5601_s9 + $0x160] sm:$0xff]  ;;  %v5156_v18 = vpack.c.bf16 %v212_v9, %v211_v8  ;;  %v182_v20 = vld [vmem:[%s5601_s9 + $0xf8] sm:$0xff] }
  0x4c   :  { %5149 = vmatprep.subr.bf16.mxu1 %v5148_v56  ;;  %v196_v16 = vld [vmem:[%s5601_s9 + $0x168] sm:$0xff]  ;;  %v138_v21 = vld [vmem:[%s5596_s5 + $0x18] sm:$0xff]  ;;  %v213_v22 = vld [vmem:[%s5601_s9 + $0x1f0] sm:$0xff]  ;;  %v5126_v24 = vpack.c.bf16 %v164_v12, %v163_v11  ;;  %v5128_v26 = vpack.c.bf16 %v182_v20, %v181_v19 }
  0x4d   :  { %5119 = vmatpush3.bf16.msra.mxu0 %v5118_v62  ;;  %v136_v17 = vld [vmem:[%s5596_s5 + $0x8] sm:$0xff]  ;;  %v214_v23 = vld [vmem:[%s5601_s9 + $0x1f8] sm:$0xff]  ;;  %369 = vmatprep.mubr.f32.mxu1 %v138_v21  ;;  %v5158_v25 = vpack.c.bf16 %v196_v16, %v195_v15  ;;  %v165_v27 = vld [vmem:[%s5601_s9 + $0x70] sm:$0xff] }
  0x4e   :  { %5121 = vmatprep.subr.bf16.mxu0 %v5120_v0  ;;  %284 = vmatprep.mubr.f32.mxu0 %v136_v17  ;;  %v166_v28 = vld [vmem:[%s5601_s9 + $0x78] sm:$0xff]  ;;  %v5160_v29 = vpack.c.bf16 %v214_v23, %v213_v22  ;;  %v197_v30 = vld [vmem:[%s5601_s9 + $0x170] sm:$0xff] }
  0x4f   :  { %5151 = vmatpush3.bf16.msra.mxu1 %v5150_v63  ;;  %v198_v31 = vld [vmem:[%s5601_s9 + $0x178] sm:$0xff] }
  0x50   :  { %5153 = vmatprep.subr.bf16.mxu1 %v5152_v4 }
  0x51   :  { %5123 = vmatpush3.bf16.msra.mxu0 %v5122_v10 }
  0x52   :  { %5125 = vmatprep.subr.bf16.mxu0 %v5124_v14 }
  0x53   :  { %5155 = vmatpush3.bf16.msra.mxu1 %v5154_v13 }
  0x54   :  { %5157 = vmatprep.subr.bf16.mxu1 %v5156_v18 }
  0x55   :  { %70 = vsyncpa [#allocation16], 0  ;;  %5127 = vmatpush3.bf16.msra.mxu0 %v5126_v24  ;;  %v5130_v32 = vpack.c.bf16 %v166_v28, %v165_v27  ;;  %v5162_v33 = vpack.c.bf16 %v198_v31, %v197_v30  ;;  %v135_v34 = vld [vmem:[%s5596_s5] sm:$0xff]  ;;  %v137_v35 = vld [vmem:[%s5596_s5 + $0x10] sm:$0xff]  ;;  %vm394_vm0 = vcmask 588800   ;;  %v5573_v48 = vmov 0.0  }
  0x56   :  { %5129 = vmatprep.subr.bf16.mxu0 %v5128_v26  ;;  %v140_v36 = vld [vmem:[%s5596_s5 + $0x28] sm:$0xff]  ;;  %v142_v37 = vld [vmem:[%s5596_s5 + $0x38] sm:$0xff]  ;;  %v139_v38 = vld [vmem:[%s5596_s5 + $0x20] sm:$0xff]  ;;  %395 = vst.msk [vmem:[#allocation2] sm:$0xff] %vm394_vm0, %v5573_v48  ;;  %vm399_vm1 = vcmask 584704   ;;  %s5574_s0 = smov 4  }
  0x57   :  { %5159 = vmatpush3.bf16.msra.mxu1 %v5158_v25  ;;  %v141_v39 = vld [vmem:[%s5596_s5 + $0x30] sm:$0xff]  ;;  %v144_v40 = vld [vmem:[%s5596_s5 + $0x48] sm:$0xff]  ;;  %v146_v41 = vld [vmem:[%s5596_s5 + $0x58] sm:$0xff]  ;;  %396 = vst.msk [vmem:[#allocation2 + $0x8] sm:$0xff] %vm394_vm0, %v5573_v48  ;;  %vm417_vm2 = vcmask 556064   ;;  %s5577_s28 = smov 120  }
  0x58   :  { %5161 = vmatprep.subr.bf16.mxu1 %v5160_v29  ;;  %v143_v42 = vld [vmem:[%s5596_s5 + $0x40] sm:$0xff]  ;;  %v145_v43 = vld [vmem:[%s5596_s5 + $0x50] sm:$0xff]  ;;  %v148_v44 = vld [vmem:[%s5596_s5 + $0x68] sm:$0xff]  ;;  %397 = vst.msk [vmem:[#allocation2 + $0x10] sm:$0xff] %vm394_vm0, %v5573_v48  ;;  %vm693_vm3 = vcmask 523264   ;;  %vm799_vm4 = vcmask 261120  }
  0x59   :  { %5131 = vmatpush3.bf16.msra.mxu0 %v5130_v32  ;;  %v150_v45 = vld [vmem:[%s5596_s5 + $0x78] sm:$0xff]  ;;  %v147_v46 = vld [vmem:[%s5596_s5 + $0x60] sm:$0xff]  ;;  %v149_v47 = vld [vmem:[%s5596_s5 + $0x70] sm:$0xff]  ;;  %398 = vst.msk [vmem:[#allocation2 + $0x18] sm:$0xff] %vm394_vm0, %v5573_v48  ;;  %s5575_s5 = smov 8   ;;  %vm914_vm5 = vcmask 588864  }
  0x5a   :  { %897 = vst.msk [vmem:[#allocation3] sm:$0xff] %vm394_vm0, %v5573_v48  ;;  %898 = vst.msk [vmem:[#allocation3 + $0x8] sm:$0xff] %vm394_vm0, %v5573_v48  ;;  %v4195_v50 = vld [vmem:[%s5601_s9 + $0x200] ss:$0 sm:$0xff]  ;;  %v4197_v18 = vld [vmem:[%s5606_s13 + $0x1] ss:$0 sm:$0xff] }
  0x5b   :  { %5163 = vmatpush3.bf16.msra.mxu1 %v5162_v33  ;;  %899 = vst.msk [vmem:[#allocation3 + $0x10] sm:$0xff] %vm394_vm0, %v5573_v48  ;;  %900 = vst.msk [vmem:[#allocation3 + $0x18] sm:$0xff] %vm394_vm0, %v5573_v48  ;;  %v4200_v22 = vld [vmem:[%s5606_s13 + $0x4] ss:$0 sm:$0xff]  ;;  %v4198_v24 = vld [vmem:[%s5606_s13 + $0x2] ss:$0 sm:$0xff] }
  0x5c   :  { %285 = vmatmul.mubr.f32.vlgmr.msra.gmra.mrb[0].mxu0 %v135_v34  ;;  %901 = vst.msk [vmem:[#allocation3 + $0x20] sm:$0xff] %vm394_vm0, %v5573_v48  ;;  %902 = vst.msk [vmem:[#allocation3 + $0x28] sm:$0xff] %vm394_vm0, %v5573_v48  ;;  %v4203_v25 = vld [vmem:[%s5606_s13 + $0x7] ss:$0 sm:$0xff]  ;;  %v4201_v26 = vld [vmem:[%s5606_s13 + $0x5] ss:$0 sm:$0xff] }
  0x5d   :  { %289 = vmatprep.mubr.f32.mxu0 %v140_v36  ;;  %903 = vst.msk [vmem:[#allocation3 + $0x30] sm:$0xff] %vm394_vm0, %v5573_v48  ;;  %904 = vst.msk [vmem:[#allocation3 + $0x38] sm:$0xff] %vm394_vm0, %v5573_v48  ;;  %v4204_v27 = vld [vmem:[%s5606_s13 + $0x8] ss:$0 sm:$0xff]  ;;  %s5576_s9 = smov 124   ;;  %vm1168_vm6 = vcmask 257024  }
  0x5e   :  { %370 = vmatmul.mubr.f32.vlgmr.msra.gmra.mrb[0].mxu1 %v137_v35  ;;  %905 = vst.msk [vmem:[#allocation3 + $0x40] sm:$0xff] %vm394_vm0, %v5573_v48  ;;  %1163 = vst [vmem:[#allocation4] sm:$0xff] %v5573_v48  ;;  %vm1172_vm7 = vcmask 1041408   ;;  %vm1185_vm8 = vcmask 1047682   ;;  %vm1187_vm9 = vcmask 130050   ;;  %vm1189_vm10 = vcmask 1047680  }
  0x5f   :  { %374 = vmatprep.mubr.f32.mxu1 %v142_v37  ;;  %1165 = vst [vmem:[#allocation4 + $0x10] sm:$0xff] %v5573_v48  ;;  %1167 = vst [vmem:[#allocation4 + $0x20] sm:$0xf] %v5573_v48  ;;  %vm1191_vm11 = vcmask 130048   ;;  %vm1265_vm12 = vcmask 785408   ;;  %vm1193_vm13 = vcmask 1041536  }
  0x60   :  { %290 = vmatmul.mubr.f32.gmra.mrb[2].mxu0 %v139_v38  ;;  %1897 = vst [vmem:[#allocation6] sm:$0xff] %v5573_v48  ;;  %1899 = vst [vmem:[#allocation6 + $0x10] sm:$0xf] %v5573_v48  ;;  %vm1195_vm14 = vcmask 123904   ;;  %vm1285_vm15 = vcmask 1045504   ;;  %vm1400_vm0 = vcmask 1043456  }
  0x61   :  { %294 = vmatprep.mubr.f32.mxu0 %v144_v40  ;;  %2493 = vst [vmem:[#allocation8] sm:$0xff] %v5573_v48  ;;  %2494 = vst [vmem:[#allocation8 + $0x8] sm:$0xff] %v5573_v48  ;;  %s6777_s1 = sld [smem:[#allocation23_spill]]  ;;  %s6778_s2 = sld [smem:[#allocation24_spill]] }
  0x62   :  { %375 = vmatmul.mubr.f32.gmra.mrb[2].mxu1 %v141_v39  ;;  %2729 = vst [vmem:[#allocation9] sm:$0xff] %v5573_v48  ;;  %2730 = vst [vmem:[#allocation9 + $0x8] sm:$0xff] %v5573_v48  ;;  %s6779_s7 = sld [smem:[#allocation25_spill]]  ;;  %s6780_s10 = sld [smem:[#allocation26_spill]] }
  0x63   :  { %379 = vmatprep.mubr.f32.mxu1 %v146_v41  ;;  %2963 = vst [vmem:[#allocation10] sm:$0xff] %v5573_v48  ;;  %2964 = vst [vmem:[#allocation10 + $0x8] sm:$0xff] %v5573_v48  ;;  %s6781_s11 = sld [smem:[#allocation27_spill]]  ;;  %s6782_s15 = sld [smem:[#allocation28_spill]] }
  0x64   :  { %295 = vmatmul.mubr.f32.gmra.mrb[4].mxu0 %v143_v42  ;;  %3197 = vst [vmem:[#allocation11] sm:$0xff] %v5573_v48  ;;  %3198 = vst [vmem:[#allocation11 + $0x8] sm:$0xff] %v5573_v48  ;;  %s6783_s16 = sld [smem:[#allocation29_spill]]  ;;  %s6784_s18 = sld [smem:[#allocation30_spill]] }
  0x65   :  { %299 = vmatprep.mubr.f32.mxu0 %v148_v44  ;;  %3431 = vst [vmem:[#allocation12] sm:$0xff] %v5573_v48  ;;  %3432 = vst [vmem:[#allocation12 + $0x8] sm:$0xff] %v5573_v48  ;;  %s6785_s22 = sld [smem:[#allocation31_spill]]  ;;  %s6786_s23 = sld [smem:[#allocation32_spill]] }
  0x66   :  { %380 = vmatmul.mubr.f32.gmra.mrb[4].mxu1 %v145_v43  ;;  %3665 = vst [vmem:[#allocation13] sm:$0xff] %v5573_v48  ;;  %3666 = vst [vmem:[#allocation13 + $0x8] sm:$0xff] %v5573_v48  ;;  %s5587_s26 = smov [#allocation15]  }
  0x67   :  { %384 = vmatprep.mubr.f32.mxu1 %v150_v45  ;;  %3861 = vst [vmem:[#allocation14] sm:$0x3f] %v5573_v48  ;;  %3862 = vst [vmem:[#allocation14 + $0x8] sm:$0x3f] %v5573_v48 }
  0x68   :  { %300 = vmatmul.mubr.f32.gmra.mrb[6].mxu0 %v147_v46  ;;  %3863 = vst [vmem:[#allocation14 + $0x10] sm:$0x3f] %v5573_v48  ;;  %400 = vst.msk [vmem:[#allocation2 + $0x20] sm:$0xf] %vm399_vm1, %v5573_v48  ;;  %v680_v46 = vld [vmem:[%s5611_s17] sm:$0xff]  ;;  %vm1233_vm1 = vcmask 916480  }
  0x69   :  { %1898 = vst.msk [vmem:[#allocation6 + $0x8] sm:$0xff] %vm693_vm3, %v5573_v48 }
  0x6a   :  { %385 = vmatmul.mubr.f32.gmra.mrb[6].mxu1 %v149_v47  ;;  %v681_v47 = vld [vmem:[%s5611_s17 + $0x8] sm:$0xff]  ;;  %1164 = vst.msk [vmem:[#allocation4 + $0x8] sm:$0xff] %vm799_vm4, %v5573_v48  ;;  %1166 = vst.msk [vmem:[#allocation4 + $0x18] sm:$0xff] %vm799_vm4, %v5573_v48 }
  0x6b   :  { %1169 = vst.msk [vmem:[#allocation4 + $0x28] sm:$0xf] %vm1168_vm6, %v5573_v48  ;;  %vm1900_vm6 = vcmask 519168  }
  0x6c   :  { %2293 = vst.msk [vmem:[#allocation7] sm:$0xff] %vm1265_vm12, %v5573_v48  ;;  %2294 = vst.msk [vmem:[#allocation7 + $0x8] sm:$0xff] %vm1265_vm12, %v5573_v48 }
  0x6d   :  { %2295 = vst.msk [vmem:[#allocation7 + $0x10] sm:$0xff] %vm1265_vm12, %v5573_v48 }
 0x12f   :  { %v4388_v49 = vpop.f32.mrb[0].mxu0 }
 0x130   :  { %v4389_v51 = vpop.f32.mrb[1].mxu0 }
 0x131   :  { %v4432_v52 = vpop.f32.mrb[0].mxu1  ;;  %v4390_v53 = vadd.f32 %v4389_v51, %v4388_v49  ;;  %v5164_v51 = vpack.c.bf16 %v681_v47, %v680_v46 }
 0x132   :  { %v4433_v54 = vpop.f32.mrb[1].mxu1 }
 0x133   :  { %v4434_v55 = vadd.f32 %v4433_v54, %v4432_v52  ;;  %v287_v56 = vadd.f32 %v4390_v53, %v4195_v50  ;;  %v4391_v57 = vpop.f32.mrb[2].mxu0  ;;  %5165 = vmatprep.subr.bf16.mxu0 %v5164_v51 }
 0x134   :  { %v4392_v58 = vpop.f32.mrb[3].mxu0  ;;  %5167 = vmatpush3.bf16.msra.mxu0 %v5164_v51 }
 0x135   :  { %v4435_v59 = vpop.f32.mrb[2].mxu1  ;;  %v4393_v60 = vadd.f32 %v4392_v58, %v4391_v57  ;;  %v372_v62 = vadd.f32 %v4434_v55, %v287_v56  ;;  %v682_v55 = vld [vmem:[%s5611_s17 + $0x10] sm:$0xff]  ;;  %v683_v56 = vld [vmem:[%s5611_s17 + $0x18] sm:$0xff] }
 0x136   :  { %v4436_v61 = vpop.f32.mrb[3].mxu1  ;;  %v5168_v57 = vpack.c.bf16 %v683_v56, %v682_v55 }
 0x137   :  { %v4437_v63 = vadd.f32 %v4436_v61, %v4435_v59  ;;  %v292_v0 = vadd.f32 %v4393_v60, %v4195_v50  ;;  %v4394_v1 = vpop.f32.mrb[4].mxu0  ;;  %v390_v2 = vmax.f32 %v372_v62, 0.0  ;;  %v684_v61 = vld [vmem:[%s5611_s17 + $0x20] sm:$0xff]  ;;  %v685_v62 = vld [vmem:[%s5611_s17 + $0x28] sm:$0xff] }
 0x138   :  { %v4395_v3 = vpop.f32.mrb[5].mxu0  ;;  %5169 = vmatprep.subr.bf16.mxu0 %v5168_v57 }
 0x139   :  { %v4438_v4 = vpop.f32.mrb[4].mxu1  ;;  %v377_v5 = vadd.f32 %v4437_v63, %v292_v0  ;;  %v4396_v6 = vadd.f32 %v4395_v3, %v4394_v1  ;;  %405 = vrot.lane.b32.xlu0 %v390_v2, %s5574_s0  ;;  %v5172_v63 = vpack.c.bf16 %v685_v62, %v684_v61  ;;  %5171 = vmatpush3.bf16.msra.mxu0 %v5168_v57 }
 0x13a   :  { %v4439_v7 = vpop.f32.mrb[5].mxu1 }
 0x13b   :  { %v4440_v8 = vadd.f32 %v4439_v7, %v4438_v4  ;;  %v391_v9 = vmax.f32 %v377_v5, 0.0  ;;  %v297_v10 = vadd.f32 %v4396_v6, %v4195_v50  ;;  %v4397_v11 = vpop.f32.mrb[6].mxu0  ;;  %5173 = vmatprep.subr.bf16.mxu0 %v5172_v63  ;;  %v686_v4 = vld [vmem:[%s5611_s17 + $0x30] sm:$0xff]  ;;  %v687_v5 = vld [vmem:[%s5611_s17 + $0x38] sm:$0xff] }
 0x13c   :  { %v4398_v12 = vpop.f32.mrb[7].mxu0  ;;  %v5176_v6 = vpack.c.bf16 %v687_v5, %v686_v4 }
 0x13d   :  { %v4441_v13 = vpop.f32.mrb[6].mxu1  ;;  %v4399_v14 = vadd.f32 %v4398_v12, %v4397_v11  ;;  %407 = vrot.lane.b32.xlu0 %v391_v9, %s5574_s0  ;;  %v382_v16 = vadd.f32 %v4440_v8, %v297_v10  ;;  %5175 = vmatpush3.bf16.msra.mxu0 %v5172_v63  ;;  %v4205_v63 = vld [vmem:[%s5606_s13 + $0x9] ss:$0 sm:$0xff] }
 0x13e   :  { %v4442_v15 = vpop.f32.mrb[7].mxu1  ;;  %5177 = vmatprep.subr.bf16.mxu0 %v5176_v6 }
 0x13f   :  { %v4443_v17 = vadd.f32 %v4442_v15, %v4441_v13  ;;  %v302_v19 = vadd.f32 %v4399_v14, %v4195_v50  ;;  %v392_v20 = vmax.f32 %v382_v16, 0.0 }
 0x141   :  { %v387_v21 = vadd.f32 %v4443_v17, %v302_v19  ;;  %409 = vrot.lane.b32.xlu1 %v392_v20, %s5574_s0  ;;  %441 = vrot.lane.b32.xlu0 %v4197_v18, %s5574_s0 }
 0x142   :  { %5179 = vmatpush3.bf16.msra.mxu0 %v5176_v6 }
 0x143   :  { %v393_v23 = vmax.f32 %v387_v21, 0.0 }
 0x145   :  { %411 = vrot.lane.b32.xlu1 %v393_v23, %s5574_s0  ;;  %524 = vrot.lane.b32.xlu0 %v4200_v22, %s5574_s0  ;;  %v4196_v23 = vld [vmem:[%s5606_s13] ss:$0 sm:$0xff] }
 0x149   :  { %474 = vrot.lane.b32.xlu1 %v4198_v24, %s5575_s5  ;;  %607 = vrot.lane.b32.xlu0 %v4203_v25, %s5574_s0  ;;  %s4155_s0 = sshll.u32 %s5587_s26, 4  ;;  %s4156_s0 = int_to_ptr.vmem [resolvable:$true] %s4155_s0 }
 0x14a   :  { %p5522_p1 = scmp.lt.s32.totalorder %s4156_s0, %s4156_s0 }
 0x14d   :  { %557 = vrot.lane.b32.xlu1 %v4201_v26, %s5575_s5 }
 0x151   :  { %640 = vrot.lane.b32.xlu1 %v4204_v27, %s5575_s5  ;;  %v4199_v27 = vld [vmem:[%s5606_s13 + $0x3] ss:$0 sm:$0xff] }
 0x1ab   :  { %v406_v28 = vpop.permute.xlu0 %405 }
 0x1ac   :  { %418 = vst.msk [vmem:[#allocation2 + $0x2] sm:$0xff] %vm417_vm2, %v406_v28 }
 0x1af   :  { %v408_v29 = vpop.permute.xlu0 %407 }
 0x1b0   :  { %419 = vst.msk [vmem:[#allocation2 + $0xa] sm:$0xff] %vm417_vm2, %v408_v29 }
 0x1b3   :  { %v410_v30 = vpop.permute.xlu1 %409  ;;  %v5882_v31 = vpop.permute.xlu0 %441  ;;  %v5884_v32 = vld [vmem:[#allocation2] sm:$0xff] }
 0x1b4   :  { %420 = vst.msk [vmem:[#allocation2 + $0x12] sm:$0xff] %vm417_vm2, %v410_v30  ;;  %v444_v33 = vmul.f32 %v5882_v31, %v5884_v32  ;;  %v5891_v36 = vld [vmem:[#allocation2 + $0x2] sm:$0xff]  ;;  %v431_v26 = vmul.f32 %v4196_v23, %v5884_v32 }
 0x1b6   :  { %452 = vrot.lane.b32.xlu0 %v444_v33, %s5576_s9  ;;  %v510_v33 = vmul.f32 %v4199_v27, %v5891_v36 }
 0x1b7   :  { %v412_v34 = vpop.permute.xlu1 %411  ;;  %v5889_v35 = vpop.permute.xlu0 %524  ;;  %v5895_v38 = vld [vmem:[#allocation2 + $0x8] sm:$0xff] }
 0x1b8   :  { %421 = vst.msk [vmem:[#allocation2 + $0x1a] sm:$0xff] %vm417_vm2, %v412_v34  ;;  %v527_v37 = vmul.f32 %v5889_v35, %v5891_v36  ;;  %v445_v41 = vmul.f32 %v5882_v31, %v5895_v38  ;;  %v5905_v45 = vld [vmem:[#allocation2 + $0xa] sm:$0xff]  ;;  %vm1692_vm2 = vcmask 654336  }
 0x1b9   :  { %v5913_v50 = vld [vmem:[#allocation2 + $0x4] sm:$0xff]  ;;  %v528_v53 = vmul.f32 %v5889_v35, %v5905_v45 }
 0x1ba   :  { %535 = vrot.lane.b32.xlu1 %v527_v37, %s5576_s9 }
 0x1bb   :  { %v475_v39 = vpop.permute.xlu1 %474  ;;  %v5919_v54 = vld [vmem:[#allocation2 + $0x10] sm:$0xff]  ;;  %v608_v60 = vpop.permute.xlu0 %607 }
 0x1bc   :  { %v477_v40 = vmul.f32 %v475_v39, %v5884_v32  ;;  %v478_v44 = vmul.f32 %v475_v39, %v5895_v38  ;;  %v446_v58 = vmul.f32 %v5882_v31, %v5919_v54  ;;  %v479_v0 = vmul.f32 %v475_v39, %v5919_v54  ;;  %v5936_v2 = vld [vmem:[#allocation2 + $0x12] sm:$0xff] }
 0x1bd   :  { %v610_v1 = vmul.f32 %v608_v60, %v5913_v50  ;;  %v5938_v3 = vld [vmem:[#allocation2 + $0xc] sm:$0xff]  ;;  %v529_v7 = vmul.f32 %v5889_v35, %v5936_v2  ;;  %v433_v56 = vmul.f32 %v4196_v23, %v5919_v54 }
 0x1be   :  { %485 = vrot.lane.b32.xlu0 %v477_v40, %s5577_s28  ;;  %454 = vrot.lane.b32.xlu1 %v445_v41, %s5576_s9  ;;  %v611_v8 = vmul.f32 %v608_v60, %v5938_v3  ;;  %v4202_v41 = vld [vmem:[%s5606_s13 + $0x6] ss:$0 sm:$0xff]  ;;  %s5578_s13 = smov 72  }
 0x1bf   :  { %v558_v42 = vpop.permute.xlu1 %557  ;;  %v5947_v9 = vld [vmem:[#allocation2 + $0x18] sm:$0xff]  ;;  %v593_v47 = vmul.f32 %v4202_v41, %v5913_v50  ;;  %v594_v57 = vmul.f32 %v4202_v41, %v5938_v3 }
 0x1c0   :  { %v560_v43 = vmul.f32 %v558_v42, %v5891_v36  ;;  %v561_v59 = vmul.f32 %v558_v42, %v5905_v45  ;;  %v562_v10 = vmul.f32 %v558_v42, %v5936_v2  ;;  %v447_v11 = vmul.f32 %v5882_v31, %v5947_v9  ;;  %v5959_v14 = vld [vmem:[#allocation2 + $0x1a] sm:$0xff] }
 0x1c1   :  { %v480_v12 = vmul.f32 %v475_v39, %v5947_v9  ;;  %v563_v15 = vmul.f32 %v558_v42, %v5959_v14  ;;  %v530_v16 = vmul.f32 %v5889_v35, %v5959_v14  ;;  %v5966_v17 = vld [vmem:[#allocation2 + $0x14] sm:$0xff]  ;;  %v5968_v18 = vld [vmem:[#allocation2 + $0x1c] sm:$0xff]  ;;  %v432_v31 = vmul.f32 %v4196_v23, %v5895_v38 }
 0x1c2   :  { %568 = vrot.lane.b32.xlu0 %v560_v43, %s5577_s28  ;;  %487 = vrot.lane.b32.xlu1 %v478_v44, %s5577_s28  ;;  %v612_v19 = vmul.f32 %v608_v60, %v5966_v17  ;;  %v613_v20 = vmul.f32 %v608_v60, %v5968_v18  ;;  %v511_v44 = vmul.f32 %v4199_v27, %v5905_v45 }
 0x1c3   :  { %v5911_v49 = vpop.permute.xlu1 %640 }
 0x1c4   :  { %v643_v52 = vmul.f32 %v5911_v49, %v5913_v50  ;;  %v644_v13 = vmul.f32 %v5911_v49, %v5938_v3  ;;  %v645_v21 = vmul.f32 %v5911_v49, %v5966_v17  ;;  %v646_v22 = vmul.f32 %v5911_v49, %v5968_v18 }
 0x1c5   :  { %v512_v50 = vmul.f32 %v4199_v27, %v5936_v2  ;;  %v434_v3 = vmul.f32 %v4196_v23, %v5947_v9 }
 0x1c6   :  { %651 = vrot.lane.b32.xlu0 %v643_v52, %s5577_s28  ;;  %537 = vrot.lane.b32.xlu1 %v528_v53, %s5576_s9 }
 0x1ca   :  { %456 = vrot.lane.b32.xlu0 %v446_v58, %s5576_s9  ;;  %570 = vrot.lane.b32.xlu1 %v561_v59, %s5577_s28 }
 0x1ce   :  { %489 = vrot.lane.b32.xlu0 %v479_v0, %s5577_s28  ;;  %618 = vrot.lane.b32.xlu1 %v610_v1, %s5576_s9 }
 0x1d2   :  { %539 = vrot.lane.b32.xlu0 %v529_v7, %s5576_s9  ;;  %620 = vrot.lane.b32.xlu1 %v611_v8, %s5576_s9 }
 0x1d6   :  { %572 = vrot.lane.b32.xlu0 %v562_v10, %s5577_s28  ;;  %458 = vrot.lane.b32.xlu1 %v447_v11, %s5576_s9 }
 0x1da   :  { %491 = vrot.lane.b32.xlu0 %v480_v12, %s5577_s28  ;;  %653 = vrot.lane.b32.xlu1 %v644_v13, %s5577_s28  ;;  %v595_v12 = vmul.f32 %v4202_v41, %v5966_v17  ;;  %v596_v17 = vmul.f32 %v4202_v41, %v5968_v18  ;;  %v795_v18 = vld [vmem:[%s5616_s21] sm:$0xff] }
 0x1db   :  { %4691 = vmatprep.mubr.msk.f32.mxu1 %vm799_vm4, %v795_v18  ;;  %v4206_v41 = vld [vmem:[%s5611_s17 + $0x40] ss:$0 sm:$0xff]  ;;  %s5579_s17 = smov 16  }
 0x1de   :  { %574 = vrot.lane.b32.xlu0 %v563_v15, %s5577_s28  ;;  %541 = vrot.lane.b32.xlu1 %v530_v16, %s5576_s9 }
 0x1e2   :  { %622 = vrot.lane.b32.xlu0 %v612_v19, %s5576_s9  ;;  %624 = vrot.lane.b32.xlu1 %v613_v20, %s5576_s9 }
 0x1e6   :  { %655 = vrot.lane.b32.xlu0 %v645_v21, %s5577_s28  ;;  %657 = vrot.lane.b32.xlu1 %v646_v22, %s5577_s28  ;;  %v513_v22 = vmul.f32 %v4199_v27, %v5959_v14 }
 0x228   :  { %v453_v24 = vpop.permute.xlu0 %452 }
 0x229   :  { %v464_v28 = vadd.f32 %v453_v24, %v431_v26 }
 0x22c   :  { %v536_v25 = vpop.permute.xlu1 %535 }
 0x230   :  { %v455_v29 = vpop.permute.xlu1 %454  ;;  %v486_v30 = vpop.permute.xlu0 %485 }
 0x231   :  { %v497_v34 = vadd.f32 %v486_v30, %v464_v28  ;;  %v465_v35 = vadd.f32 %v455_v29, %v432_v31 }
 0x233   :  { %v514_v37 = vadd.f32 %v510_v33, %v497_v34 }
 0x234   :  { %v488_v39 = vpop.permute.xlu1 %487  ;;  %v569_v40 = vpop.permute.xlu0 %568 }
 0x235   :  { %v498_v42 = vadd.f32 %v488_v39, %v465_v35  ;;  %v547_v43 = vadd.f32 %v536_v25, %v514_v37 }
 0x237   :  { %v580_v46 = vadd.f32 %v569_v40, %v547_v43  ;;  %v515_v32 = vadd.f32 %v511_v44, %v498_v42 }
 0x238   :  { %v538_v49 = vpop.permute.xlu1 %537  ;;  %v652_v51 = vpop.permute.xlu0 %651 }
 0x239   :  { %v597_v38 = vadd.f32 %v593_v47, %v580_v46  ;;  %v548_v52 = vadd.f32 %v538_v49, %v515_v32 }
 0x23c   :  { %v571_v36 = vpop.permute.xlu1 %570  ;;  %v457_v53 = vpop.permute.xlu0 %456 }
 0x23d   :  { %v581_v55 = vadd.f32 %v571_v36, %v548_v52  ;;  %v466_v58 = vadd.f32 %v457_v53, %v433_v56 }
 0x23f   :  { %v598_v59 = vadd.f32 %v594_v57, %v581_v55 }
 0x240   :  { %v619_v60 = vpop.permute.xlu1 %618  ;;  %v490_v45 = vpop.permute.xlu0 %489 }
 0x241   :  { %v630_v61 = vadd.f32 %v619_v60, %v597_v38  ;;  %v499_v62 = vadd.f32 %v490_v45, %v466_v58  ;;  %v796_v60 = vld [vmem:[%s5616_s21 + $0x8] sm:$0xff]  ;;  %v797_v45 = vld [vmem:[%s5616_s21 + $0x10] sm:$0xff] }
 0x243   :  { %v663_v0 = vadd.f32 %v652_v51, %v630_v61  ;;  %v516_v1 = vadd.f32 %v512_v50, %v499_v62  ;;  %v798_v61 = vld [vmem:[%s5616_s21 + $0x18] sm:$0xff]  ;;  %s5580_s21 = smov 32  }
 0x244   :  { %v621_v4 = vpop.permute.xlu1 %620  ;;  %v540_v5 = vpop.permute.xlu0 %539 }
 0x245   :  { %v672_v6 = vadd.f32 %v4205_v63, %v663_v0  ;;  %v549_v8 = vadd.f32 %v540_v5, %v516_v1  ;;  %v631_v13 = vadd.f32 %v621_v4, %v598_v59  ;;  %v4220_v1 = vld [vmem:[%s5621_s25 + $0x5] ss:$0 sm:$0xff]  ;;  %v4217_v4 = vld [vmem:[%s5621_s25 + $0x2] ss:$0 sm:$0xff]  ;;  %v4223_v5 = vld [vmem:[%s5621_s25 + $0x8] ss:$0 sm:$0xff] }
 0x247   :  { %v676_v7 = vmax.f32 %v672_v6, 0.0 }
 0x248   :  { %v459_v10 = vpop.permute.xlu1 %458  ;;  %v573_v54 = vpop.permute.xlu0 %572 }
 0x249   :  { %v582_v11 = vadd.f32 %v573_v54, %v549_v8  ;;  %4677 = vmatprep.mubr.msk.f32.mxu0 %vm693_vm3, %v676_v7  ;;  %v467_v15 = vadd.f32 %v459_v10, %v434_v3  ;;  %v1067_v8 = vld [vmem:[%s5626_s29] sm:$0xff]  ;;  %v1068_v10 = vld [vmem:[%s5626_s29 + $0x8] sm:$0xff] }
 0x24a   :  { %v5188_v54 = vpack.c.bf16 %v1068_v10, %v1067_v8 }
 0x24b   :  { %v599_v2 = vadd.f32 %v595_v12, %v582_v11  ;;  %v1069_v12 = vld [vmem:[%s5626_s29 + $0x10] sm:$0xff] }
 0x24c   :  { %v654_v16 = vpop.permute.xlu1 %653  ;;  %v492_v19 = vpop.permute.xlu0 %491  ;;  %5189 = vmatprep.subr.bf16.mxu0 %v5188_v54 }
 0x24d   :  { %v664_v20 = vadd.f32 %v654_v16, %v631_v13  ;;  %v500_v21 = vadd.f32 %v492_v19, %v467_v15  ;;  %v1070_v13 = vld [vmem:[%s5626_s29 + $0x18] sm:$0xff] }
 0x24e   :  { %v5192_v15 = vpack.c.bf16 %v1070_v13, %v1069_v12 }
 0x24f   :  { %v673_v24 = vadd.f32 %v4205_v63, %v664_v20  ;;  %v517_v25 = vadd.f32 %v513_v22, %v500_v21 }
 0x250   :  { %v542_v26 = vpop.permute.xlu1 %541  ;;  %v575_v28 = vpop.permute.xlu0 %574 }
 0x251   :  { %v677_v29 = vmax.f32 %v673_v24, 0.0  ;;  %v550_v9 = vadd.f32 %v542_v26, %v517_v25  ;;  %v1071_v24 = vld [vmem:[%s5626_s29 + $0x20] sm:$0xff]  ;;  %v1072_v25 = vld [vmem:[%s5626_s29 + $0x28] sm:$0xff] }
 0x252   :  { %v5196_v26 = vpack.c.bf16 %v1072_v25, %v1071_v24 }
 0x253   :  { %v583_v23 = vadd.f32 %v575_v28, %v550_v9  ;;  %4678 = vmatmul.mubr.msk.f32.vlgmr.msra.gmra.mrb[8].mxu0 %vm693_vm3, %v677_v29 }
 0x254   :  { %v625_v30 = vpop.permute.xlu1 %624  ;;  %v623_v31 = vpop.permute.xlu0 %622  ;;  %5191 = vmatpush3.bf16.msra.mxu0 %v5188_v54 }
 0x255   :  { %v600_v33 = vadd.f32 %v596_v17, %v583_v23  ;;  %v632_v35 = vadd.f32 %v623_v31, %v599_v2  ;;  %5193 = vmatprep.subr.bf16.mxu0 %v5192_v15  ;;  %v1073_v17 = vld [vmem:[%s5626_s29 + $0x30] sm:$0xff] }
 0x257   :  { %v633_v34 = vadd.f32 %v625_v30, %v600_v33  ;;  %v1074_v30 = vld [vmem:[%s5626_s29 + $0x38] sm:$0xff] }
 0x258   :  { %v658_v37 = vpop.permute.xlu1 %657  ;;  %v656_v14 = vpop.permute.xlu0 %655  ;;  %5195 = vmatpush3.bf16.msra.mxu0 %v5192_v15  ;;  %v5200_v33 = vpack.c.bf16 %v1074_v30, %v1073_v17 }
 0x259   :  { %v666_v27 = vadd.f32 %v658_v37, %v633_v34  ;;  %v665_v39 = vadd.f32 %v656_v14, %v632_v35  ;;  %5197 = vmatprep.subr.bf16.mxu0 %v5196_v26 }
 0x25b   :  { %v675_v40 = vadd.f32 %v4205_v63, %v666_v27  ;;  %v674_v42 = vadd.f32 %v4205_v63, %v665_v39  ;;  %v4215_v27 = vld [vmem:[%s5621_s25] ss:$0 sm:$0xff]  ;;  %v4216_v39 = vld [vmem:[%s5621_s25 + $0x1] ss:$0 sm:$0xff] }
 0x25c   :  { %5199 = vmatpush3.bf16.msra.mxu0 %v5196_v26 }
 0x25d   :  { %v679_v43 = vmax.f32 %v675_v40, 0.0  ;;  %v678_v44 = vmax.f32 %v674_v42, 0.0  ;;  %5201 = vmatprep.subr.bf16.mxu0 %v5200_v33 }
 0x25f   :  { %4680 = vmatprep.mubr.msk.f32.mxu0 %vm693_vm3, %v678_v44 }
 0x260   :  { %4681 = vmatmul.mubr.msk.f32.gmra.mrb[10].mxu0 %vm693_vm3, %v679_v43 }
 0x261   :  { %5203 = vmatpush3.bf16.msra.mxu0 %v5200_v33 }
 0x326   :  { %v4679_v46 = vpop.f32.mrb[8].mxu0 }
 0x327   :  { %v778_v32 = vadd.f32 %v4679_v46, %v4206_v41  ;;  %v772_v47 = vpop.f32.mrb[9].mxu0  ;;  %v4218_v46 = vld [vmem:[%s5621_s25 + $0x3] ss:$0 sm:$0xff] }
 0x328   :  { %v773_v49 = vadd.f32 %v4206_v41, %v772_v47 }
 0x329   :  { %v792_v51 = vmax.f32 %v778_v32, 0.0 }
 0x32a   :  { %v791_v38 = vmax.f32 %v773_v49, 0.0 }
 0x32c   :  { %v5180_v52 = vpack.c.bf16 %v792_v51, %v791_v38 }
 0x32e   :  { %5181 = vmatprep.subr.bf16.mxu1 %v5180_v52 }
 0x32f   :  { %5183 = vmatpush3.bf16.msra.mxu1 %v5180_v52  ;;  %v4219_v52 = vld [vmem:[%s5621_s25 + $0x4] ss:$0 sm:$0xff] }
 0x333   :  { %v4682_v36 = vpop.f32.mrb[10].mxu0 }
 0x334   :  { %v788_v53 = vadd.f32 %v4682_v36, %v4206_v41  ;;  %v782_v55 = vpop.f32.mrb[11].mxu0 }
 0x335   :  { %v783_v56 = vadd.f32 %v4206_v41, %v782_v55 }
 0x336   :  { %v794_v57 = vmax.f32 %v788_v53, 0.0 }
 0x337   :  { %v793_v58 = vmax.f32 %v783_v56, 0.0 }
 0x339   :  { %v5184_v59 = vpack.c.bf16 %v794_v57, %v793_v58 }
 0x33b   :  { %5185 = vmatprep.subr.bf16.mxu1 %v5184_v59 }
 0x33c   :  { %5187 = vmatpush3.bf16.msra.mxu1 %v5184_v59 }
 0x33f   :  { %4692 = vmatmul.mubr.msk.f32.vlgmr.msra.gmra.mrb[8].mxu1 %vm799_vm4, %v796_v60 }
 0x340   :  { %4694 = vmatprep.mubr.msk.f32.mxu1 %vm799_vm4, %v797_v45 }
 0x343   :  { %4695 = vmatmul.mubr.msk.f32.gmra.mrb[10].mxu1 %vm799_vm4, %v798_v61  ;;  %v4221_v61 = vld [vmem:[%s5621_s25 + $0x6] ss:$0 sm:$0xff]  ;;  %vm1702_vm4 = vcmask 654464  }
 0x412   :  { %v4693_v62 = vpop.f32.mrb[8].mxu1 }
 0x413   :  { %930 = vst.msk [vmem:[#allocation3 + $0x3e] sm:$0xff] %vm693_vm3, %v4693_v62  ;;  %v878_v50 = vpop.f32.mrb[9].mxu1 }
 0x414   :  { %929 = vst.msk [vmem:[#allocation3 + $0x36] sm:$0xff] %vm693_vm3, %v878_v50 }
 0x416   :  { %v4696_v63 = vpop.f32.mrb[10].mxu1 }
 0x417   :  { %918 = vst.msk [vmem:[#allocation3 + $0x1c] sm:$0xff] %vm693_vm3, %v4696_v63  ;;  %910 = vrot.lane.b32.xlu1 %v4696_v63, %s5578_s13  ;;  %v888_v0 = vpop.f32.mrb[11].mxu1 }
 0x418   :  { %917 = vst.msk [vmem:[#allocation3 + $0x14] sm:$0xff] %vm693_vm3, %v888_v0  ;;  %908 = vrot.lane.b32.xlu0 %v888_v0, %s5578_s13 }
 0x41a   :  { %v984_v36 = vld [vmem:[#allocation3 + $0x3e] sm:$0xff] }
 0x41b   :  { %923 = vrot.lane.b32.xlu1 %v4693_v62, %s5578_s13  ;;  %v983_v38 = vld [vmem:[#allocation3 + $0x36] sm:$0xff]  ;;  %v991_v45 = vmul.f32 %v4219_v52, %v984_v36 }
 0x41c   :  { %921 = vrot.lane.b32.xlu0 %v878_v50, %s5578_s13  ;;  %v990_v60 = vmul.f32 %v4219_v52, %v983_v38 }
 0x41f   :  { %1000 = vrot.lane.b32.xlu1 %v4220_v1, %s5575_s5  ;;  %v940_v40 = vld [vmem:[#allocation3 + $0x12] sm:$0xff]  ;;  %v941_v42 = vld [vmem:[#allocation3 + $0x1a] sm:$0xff] }
 0x420   :  { %957 = vrot.lane.b32.xlu0 %v4217_v4, %s5575_s5  ;;  %v947_v18 = vmul.f32 %v4216_v39, %v940_v40  ;;  %v948_v41 = vmul.f32 %v4216_v39, %v941_v42  ;;  %v4222_v1 = vld [vmem:[%s5621_s25 + $0x7] ss:$0 sm:$0xff]  ;;  %v1026_v4 = vld [vmem:[#allocation3 + $0x14] sm:$0xff]  ;;  %v4233_v39 = vld [vmem:[%s5631_s3 + $0x5] ss:$0 sm:$0xff] }
 0x421   :  { %v4235_v40 = vld [vmem:[%s5631_s3 + $0x7] ss:$0 sm:$0xff]  ;;  %v4236_v42 = vld [vmem:[%s5631_s3 + $0x8] ss:$0 sm:$0xff] }
 0x424   :  { %1043 = vrot.lane.b32.xlu0 %v4223_v5, %s5575_s5  ;;  %v1027_v5 = vld [vmem:[#allocation3 + $0x1c] sm:$0xff] }
 0x425   :  { %v1034_v12 = vmul.f32 %v4222_v1, %v1027_v5 }
 0x489   :  { %v911_v6 = vpop.permute.xlu1 %910 }
 0x48a   :  { %916 = vst.msk [vmem:[#allocation3 + $0xa] sm:$0xff] %vm914_vm5, %v911_v6  ;;  %v909_v7 = vpop.permute.xlu0 %908 }
 0x48b   :  { %915 = vst.msk [vmem:[#allocation3 + $0x2] sm:$0xff] %vm914_vm5, %v909_v7 }
 0x48d   :  { %v924_v3 = vpop.permute.xlu1 %923 }
 0x48e   :  { %928 = vst.msk [vmem:[#allocation3 + $0x2c] sm:$0xff] %vm914_vm5, %v924_v3  ;;  %v922_v11 = vpop.permute.xlu0 %921 }
 0x48f   :  { %927 = vst.msk [vmem:[#allocation3 + $0x24] sm:$0xff] %vm914_vm5, %v922_v11  ;;  %v1033_v11 = vmul.f32 %v4222_v1, %v1026_v4  ;;  %vm5585_vm5 = vmmov 0  }
 0x491   :  { %v1001_v22 = vpop.permute.xlu1 %1000  ;;  %v1016_v35 = vld [vmem:[#allocation3 + $0xa] sm:$0xff] }
 0x492   :  { %v931_v2 = vld [vmem:[#allocation3] sm:$0xff]  ;;  %v932_v16 = vld [vmem:[#allocation3 + $0x8] sm:$0xff]  ;;  %v958_v19 = vpop.permute.xlu0 %957  ;;  %v1023_v7 = vmul.f32 %v4221_v61, %v1016_v35 }
 0x493   :  { %v960_v20 = vmul.f32 %v958_v19, %v931_v2  ;;  %v961_v21 = vmul.f32 %v958_v19, %v932_v16  ;;  %v1015_v34 = vld [vmem:[#allocation3 + $0x2] sm:$0xff]  ;;  %v938_v43 = vmul.f32 %v4215_v27, %v931_v2  ;;  %v939_v44 = vmul.f32 %v4215_v27, %v932_v16  ;;  %v4224_v2 = vld [vmem:[%s5621_s25 + $0x9] ss:$0 sm:$0xff]  ;;  %v4232_v27 = vld [vmem:[%s5631_s3 + $0x4] ss:$0 sm:$0xff]  ;;  %s5581_s25 = smov 112  }
 0x494   :  { %v1022_v6 = vmul.f32 %v4221_v61, %v1015_v34 }
 0x495   :  { %v973_v28 = vld [vmem:[#allocation3 + $0x2c] sm:$0xff]  ;;  %966 = vrot.lane.b32.xlu0 %v961_v21, %s5577_s28  ;;  %964 = vrot.lane.b32.xlu1 %v960_v20, %s5577_s28  ;;  %v949_v32 = vadd.f32 %v947_v18, %v938_v43  ;;  %v950_v47 = vadd.f32 %v948_v41, %v939_v44 }
 0x496   :  { %v972_v29 = vld [vmem:[#allocation3 + $0x24] sm:$0xff]  ;;  %v1004_v9 = vmul.f32 %v1001_v22, %v973_v28  ;;  %v1044_v31 = vpop.permute.xlu0 %1043  ;;  %v980_v53 = vmul.f32 %v4218_v46, %v973_v28  ;;  %v4225_v28 = vld [vmem:[%s5626_s29 + $0x40] ss:$0 sm:$0xff]  ;;  %s5582_s29 = smov 96  }
 0x497   :  { %v1003_v23 = vmul.f32 %v1001_v22, %v972_v29  ;;  %v1046_v37 = vmul.f32 %v1044_v31, %v1015_v34  ;;  %v1047_v14 = vmul.f32 %v1044_v31, %v1016_v35  ;;  %v979_v55 = vmul.f32 %v4218_v46, %v972_v29 }
 0x499   :  { %1009 = vrot.lane.b32.xlu0 %v1004_v9, %s5577_s28  ;;  %1007 = vrot.lane.b32.xlu1 %v1003_v23, %s5577_s28 }
 0x49d   :  { %1052 = vrot.lane.b32.xlu0 %v1047_v14, %s5577_s28  ;;  %1050 = vrot.lane.b32.xlu1 %v1046_v37, %s5577_s28  ;;  %v4229_v37 = vld [vmem:[%s5631_s3 + $0x1] ss:$0 sm:$0xff]  ;;  %v4230_v14 = vld [vmem:[%s5631_s3 + $0x2] ss:$0 sm:$0xff] }
 0x507   :  { %v965_v49 = vpop.permute.xlu1 %964  ;;  %v967_v51 = vpop.permute.xlu0 %966 }
 0x508   :  { %v970_v56 = vadd.f32 %v965_v49, %v949_v32  ;;  %v971_v57 = vadd.f32 %v967_v51, %v950_v47 }
 0x50a   :  { %v981_v58 = vadd.f32 %v979_v55, %v970_v56  ;;  %v982_v59 = vadd.f32 %v980_v53, %v971_v57 }
 0x50b   :  { %v1008_v63 = vpop.permute.xlu1 %1007  ;;  %v1010_v0 = vpop.permute.xlu0 %1009 }
 0x50c   :  { %v992_v62 = vadd.f32 %v990_v60, %v981_v58  ;;  %v993_v50 = vadd.f32 %v991_v45, %v982_v59 }
 0x50e   :  { %v1013_v8 = vadd.f32 %v1008_v63, %v992_v62  ;;  %v1014_v10 = vadd.f32 %v1010_v0, %v993_v50  ;;  %v4231_v63 = vld [vmem:[%s5631_s3 + $0x3] ss:$0 sm:$0xff] }
 0x50f   :  { %v1051_v16 = vpop.permute.xlu1 %1050  ;;  %v1053_v19 = vpop.permute.xlu0 %1052 }
 0x510   :  { %v1024_v54 = vadd.f32 %v1022_v6, %v1013_v8  ;;  %v1025_v3 = vadd.f32 %v1023_v7, %v1014_v10 }
 0x512   :  { %v1035_v13 = vadd.f32 %v1033_v11, %v1024_v54  ;;  %v1036_v15 = vadd.f32 %v1034_v12, %v1025_v3 }
 0x514   :  { %v1056_v20 = vadd.f32 %v1051_v16, %v1035_v13  ;;  %v1057_v21 = vadd.f32 %v1053_v19, %v1036_v15  ;;  %v1512_v16 = vld [vmem:[%s5636_s8 + $0x8] sm:$0xff] }
 0x516   :  { %v1063_v22 = vadd.f32 %v4224_v2, %v1056_v20  ;;  %v1064_v24 = vadd.f32 %v4224_v2, %v1057_v21  ;;  %v1511_v2 = vld [vmem:[%s5636_s8] sm:$0xff]  ;;  %v1513_v21 = vld [vmem:[%s5636_s8 + $0x10] sm:$0xff] }
 0x518   :  { %v1065_v25 = vmax.f32 %v1063_v22, 0.0  ;;  %v1066_v26 = vmax.f32 %v1064_v24, 0.0  ;;  %v1514_v22 = vld [vmem:[%s5636_s8 + $0x18] sm:$0xff] }
 0x51a   :  { %4713 = vmatprep.mubr.msk.f32.mxu0 %vm693_vm3, %v1065_v25 }
 0x51b   :  { %4714 = vmatmul.mubr.msk.f32.vlgmr.msra.gmra.mrb[12].mxu0 %vm693_vm3, %v1066_v26 }
 0x5ee   :  { %v4715_v29 = vpop.f32.mrb[12].mxu0 }
 0x5ef   :  { %v1158_v9 = vadd.f32 %v4715_v29, %v4225_v28  ;;  %v1152_v23 = vpop.f32.mrb[13].mxu0 }
 0x5f0   :  { %v1153_v17 = vadd.f32 %v4225_v28, %v1152_v23 }
 0x5f1   :  { %v1162_v30 = vmax.f32 %v1158_v9, 0.0 }
 0x5f2   :  { %v1161_v31 = vmax.f32 %v1153_v17, 0.0  ;;  %v5204_v17 = vpack.c.bf16 %v1512_v16, %v1511_v2 }
 0x5f3   :  { %v1174_v33 = vrot.slane %v1162_v30, 6 }
 0x5f4   :  { %v1173_v34 = vrot.slane %v1161_v31, 6  ;;  %v4234_v31 = vld [vmem:[%s5631_s3 + $0x6] ss:$0 sm:$0xff]  ;;  %5205 = vmatprep.subr.bf16.mxu1 %v5204_v17 }
 0x5f5   :  { %5207 = vmatpush3.bf16.msra.mxu1 %v5204_v17 }
 0x5f6   :  { %1176 = vrot.lane.b32.xlu1 %v1173_v34, %s5579_s17  ;;  %v1175_v35 = vsel %vm1172_vm7, %v1173_v34, %v1174_v33  ;;  %vm1907_vm7 = vcmask 1047810  }
 0x5f7   :  { %1178 = vrot.lane.b32.xlu0 %v1175_v35, %s5579_s17 }
 0x5fa   :  { %1180 = vrot.lane.b32.xlu1 %v1174_v33, %s5579_s17 }
 0x5fb   :  { %1214 = vrot.lane.b32.xlu0 %v4229_v37, %s5579_s17 }
 0x5fe   :  { %1246 = vrot.lane.b32.xlu1 %v4230_v14, %s5580_s21  ;;  %v5208_v14 = vpack.c.bf16 %v1514_v22, %v1513_v21 }
 0x5ff   :  { %1303 = vrot.lane.b32.xlu0 %v4232_v27, %s5579_s17 }
 0x600   :  { %5209 = vmatprep.subr.bf16.mxu1 %v5208_v14 }
 0x601   :  { %5211 = vmatpush3.bf16.msra.mxu1 %v5208_v14  ;;  %v1523_v14 = vld [vmem:[%s5636_s8 + $0x60] sm:$0xff] }
 0x602   :  { %1348 = vrot.lane.b32.xlu1 %v4233_v39, %s5580_s21 }
 0x603   :  { %1418 = vrot.lane.b32.xlu0 %v4235_v40, %s5579_s17 }
 0x606   :  { %1463 = vrot.lane.b32.xlu1 %v4236_v42, %s5580_s21 }
 0x668   :  { %v1177_v43 = vpop.permute.xlu1 %1176 }
 0x669   :  { %1186 = vst.msk [vmem:[#allocation4] sm:$0xfc] %vm1185_vm8, %v1177_v43  ;;  %v1179_v44 = vpop.permute.xlu0 %1178  ;;  %vm1909_vm8 = vcmask 261122  }
 0x66a   :  { %1188 = vst.msk [vmem:[#allocation4 + $0x8] sm:$0xfc] %vm1187_vm9, %v1177_v43  ;;  %vm1911_vm9 = vcmask 1041664  }
 0x66b   :  { %1190 = vst.msk [vmem:[#allocation4 + $0x10] sm:$0xff] %vm1189_vm10, %v1179_v44  ;;  %vm1913_vm10 = vcmask 254976  }
 0x66c   :  { %1192 = vst.msk [vmem:[#allocation4 + $0x18] sm:$0xff] %vm1191_vm11, %v1179_v44  ;;  %v1181_v18 = vpop.permute.xlu1 %1180  ;;  %v1515_v44 = vld [vmem:[%s5636_s8 + $0x20] sm:$0xff] }
 0x66d   :  { %1194 = vst.msk [vmem:[#allocation4 + $0x20] sm:$0x3] %vm1193_vm13, %v1181_v18  ;;  %v1215_v41 = vpop.permute.xlu0 %1214  ;;  %vm2300_vm13 = vcmask 785668  }
 0x66e   :  { %1196 = vst.msk [vmem:[#allocation4 + $0x28] sm:$0x3] %vm1195_vm14, %v1181_v18  ;;  %v1516_v18 = vld [vmem:[%s5636_s8 + $0x28] sm:$0xff]  ;;  %vm2304_vm14 = vcmask 781568  }
 0x670   :  { %v6072_v32 = vld [vmem:[#allocation4] sm:$0xff]  ;;  %v1247_v51 = vpop.permute.xlu1 %1246 }
 0x671   :  { %v1206_v46 = vld [vmem:[#allocation4 + $0x8] sm:$0xff]  ;;  %v1217_v49 = vmul.f32 %v1215_v41, %v6072_v32  ;;  %v1249_v52 = vmul.f32 %v1247_v51, %v6072_v32  ;;  %v1304_v53 = vpop.permute.xlu0 %1303  ;;  %v1272_v56 = vld [vmem:[#allocation4] sm:$0xfc] }
 0x672   :  { %v1218_v47 = vmul.f32 %v1215_v41, %v1206_v46  ;;  %v1250_v38 = vmul.f32 %v1247_v51, %v1206_v46  ;;  %v6080_v36 = vld [vmem:[#allocation4 + $0x10] sm:$0xff]  ;;  %v1295_v55 = vld [vmem:[#allocation4 + $0x8] sm:$0xfc]  ;;  %v1306_v61 = vmul.f32 %v1304_v53, %v1272_v56  ;;  %v1279_v7 = vmul.f32 %v4231_v63, %v1272_v56  ;;  %v6111_v23 = vld [vmem:[#allocation4] sm:$0xf0] }
 0x673   :  { %1225 = vrot.lane.b32.xlu0 %v1217_v49, %s5581_s25  ;;  %v6078_v48 = vld [vmem:[#allocation4 + $0x18] sm:$0xff]  ;;  %v1219_v58 = vmul.f32 %v1215_v41, %v6080_v36  ;;  %v1307_v60 = vmul.f32 %v1304_v53, %v1295_v55  ;;  %v1308_v62 = vmul.f32 %v1304_v53, %v6080_v36  ;;  %v1251_v5 = vmul.f32 %v1247_v51, %v6080_v36 }
 0x674   :  { %1227 = vrot.lane.b32.xlu1 %v1218_v47, %s5581_s25  ;;  %v1220_v57 = vmul.f32 %v1215_v41, %v6078_v48  ;;  %v1309_v45 = vmul.f32 %v1304_v53, %v6078_v48  ;;  %v1273_v50 = vld [vmem:[#allocation4 + $0x20] sm:$0x3]  ;;  %v1349_v0 = vpop.permute.xlu1 %1348  ;;  %v1252_v4 = vmul.f32 %v1247_v51, %v6078_v48  ;;  %v1318_v54 = vrot.slane %v1306_v61, 2 }
 0x675   :  { %v1296_v59 = vld [vmem:[#allocation4 + $0x28] sm:$0x3]  ;;  %v1310_v6 = vmul.f32 %v1304_v53, %v1273_v50  ;;  %v1321_v8 = vrot.slane %v1307_v60, 2  ;;  %v1319_v3 = vrot.slane %v1308_v62, 2  ;;  %v1352_v11 = vmul.f32 %v1349_v0, %v1295_v55  ;;  %v6115_v35 = vld [vmem:[#allocation4 + $0x20] sm:$0xf]  ;;  %v1419_v27 = vpop.permute.xlu0 %1418 }
 0x676   :  { %v1311_v1 = vmul.f32 %v1304_v53, %v1296_v59  ;;  %v1322_v10 = vrot.slane %v1309_v45, 2  ;;  %v6096_v12 = vmul.f32 %v1349_v0, %v6078_v48  ;;  %v1351_v15 = vmul.f32 %v1349_v0, %v1272_v56  ;;  %v1517_v61 = vld [vmem:[%s5636_s8 + $0x30] sm:$0xff]  ;;  %v1518_v62 = vld [vmem:[%s5636_s8 + $0x38] sm:$0xff] }
 0x677   :  { %1257 = vrot.lane.b32.xlu0 %v1249_v52, %s5582_s29  ;;  %v1324_v19 = vrot.slane %v1310_v6, 2  ;;  %v6101_v20 = vmul.f32 %v1349_v0, %v6080_v36  ;;  %v1320_v25 = vsel %vm1285_vm15, %v1318_v54, %v1319_v3  ;;  %v1280_v26 = vmul.f32 %v4231_v63, %v6080_v36 }
 0x678   :  { %1259 = vrot.lane.b32.xlu1 %v1250_v38, %s5582_s29  ;;  %v1326_v13 = vrot.slane %v1311_v1, 2  ;;  %v1323_v24 = vsel %vm1285_vm15, %v1321_v8, %v1322_v10  ;;  %v1286_v28 = vrot.slane %v1279_v7, 2  ;;  %v1366_v29 = vrot.slane %v1352_v11, 2  ;;  %v1410_v38 = vld [vmem:[#allocation4 + $0x8] sm:$0xf0]  ;;  %v1519_v11 = vld [vmem:[%s5636_s8 + $0x40] sm:$0xff] }
 0x679   :  { %v1367_v9 = vrot.slane %v6096_v12, 2  ;;  %v1281_v30 = vmul.f32 %v4231_v63, %v1273_v50  ;;  %v1363_v34 = vrot.slane %v1351_v15, 2  ;;  %v1287_v37 = vrot.slane %v1280_v26, 2  ;;  %v1520_v12 = vld [vmem:[%s5636_s8 + $0x48] sm:$0xff]  ;;  %v1521_v26 = vld [vmem:[%s5636_s8 + $0x50] sm:$0xff] }
 0x67a   :  { %v1327_v33 = vsel %vm1285_vm15, %v1322_v10, %v1326_v13  ;;  %v1325_v39 = vsel %vm1285_vm15, %v1319_v3, %v1324_v19  ;;  %v1364_v40 = vrot.slane %v6101_v20, 2  ;;  %v1356_v42 = vmul.f32 %v1349_v0, %v1296_v59  ;;  %v1464_v13 = vpop.permute.xlu1 %1463 }
 0x67b   :  { %1229 = vrot.lane.b32.xlu0 %v1219_v58, %s5581_s25  ;;  %v1289_v43 = vrot.slane %v1281_v30, 2  ;;  %v1355_v41 = vmul.f32 %v1349_v0, %v1273_v50  ;;  %v6122_v46 = vsel %vm1285_vm15, %v1286_v28, %v1287_v37  ;;  %v1394_v47 = vmul.f32 %v4234_v31, %v6111_v23  ;;  %v1522_v28 = vld [vmem:[%s5636_s8 + $0x58] sm:$0xff] }
 0x67c   :  { %1231 = vrot.lane.b32.xlu1 %v1220_v57, %s5581_s25  ;;  %v1395_v49 = vmul.f32 %v4234_v31, %v6080_v36  ;;  %v1368_v51 = vsel %vm1285_vm15, %v1366_v29, %v1367_v9  ;;  %v1396_v53 = vmul.f32 %v4234_v31, %v6115_v35  ;;  %v1422_v55 = vmul.f32 %v1419_v27, %v1410_v38 }
 0x67d   :  { %v6130_v52 = vsel %vm1285_vm15, %v1287_v37, %v1289_v43  ;;  %v5212_v56 = vpack.c.bf16 %v1516_v18, %v1515_v44  ;;  %v1401_v57 = vrot.slane %v1394_v47, 4  ;;  %v1365_v59 = vsel %vm1285_vm15, %v1363_v34, %v1364_v40  ;;  %v1525_v44 = vld [vmem:[%s5636_s8 + $0x70] sm:$0xff]  ;;  %v1526_v18 = vld [vmem:[%s5636_s8 + $0x78] sm:$0xff] }
 0x67e   :  { %v1402_v58 = vrot.slane %v1395_v49, 4  ;;  %v1371_v60 = vrot.slane %v1356_v42, 2  ;;  %v1424_v45 = vmul.f32 %v1419_v27, %v6078_v48  ;;  %v1404_v50 = vrot.slane %v1396_v53, 4 }
 0x67f   :  { %1261 = vrot.lane.b32.xlu0 %v1251_v5, %s5582_s29  ;;  %v1369_v63 = vrot.slane %v1355_v41, 2  ;;  %v1421_v0 = vmul.f32 %v1419_v27, %v6111_v23  ;;  %v1423_v1 = vmul.f32 %v1419_v27, %v6080_v36  ;;  %5213 = vmatprep.subr.bf16.mxu1 %v5212_v56  ;;  %v5216_v7 = vpack.c.bf16 %v1518_v62, %v1517_v61 }
 0x680   :  { %1263 = vrot.lane.b32.xlu1 %v1252_v4, %s5582_s29  ;;  %v1411_v4 = vld [vmem:[#allocation4 + $0x28] sm:$0xf]  ;;  %v6140_v5 = vsel %vm1400_vm0, %v1401_v57, %v1402_v58  ;;  %v6145_v6 = vsel %vm1400_vm0, %v1402_v58, %v1404_v50  ;;  %v1372_v8 = vsel %vm1285_vm15, %v1367_v9, %v1371_v60  ;;  %v1436_v10 = vrot.slane %v1422_v55, 4  ;;  %5215 = vmatpush3.bf16.msra.mxu1 %v5212_v56  ;;  %v4228_v55 = vld [vmem:[%s5631_s3] ss:$0 sm:$0xff] }
 0x681   :  { %v1426_v54 = vmul.f32 %v1419_v27, %v1411_v4  ;;  %v1425_v3 = vmul.f32 %v1419_v27, %v6115_v35  ;;  %v1370_v15 = vsel %vm1285_vm15, %v1364_v40, %v1369_v63  ;;  %v1437_v2 = vrot.slane %v1424_v45, 4  ;;  %5217 = vmatprep.subr.bf16.mxu1 %v5216_v7  ;;  %v1524_v27 = vld [vmem:[%s5636_s8 + $0x68] sm:$0xff] }
 0x682   :  { %v1433_v16 = vrot.slane %v1421_v0, 4  ;;  %v1434_v19 = vrot.slane %v1423_v1, 4  ;;  %v5220_v20 = vpack.c.bf16 %v1520_v12, %v1519_v11  ;;  %v1466_v17 = vmul.f32 %v1464_v13, %v6111_v23 }
 0x683   :  { %1328 = vrot.lane.b32.xlu0 %v1320_v25, %s5581_s25  ;;  %v1441_v21 = vrot.slane %v1426_v54, 4  ;;  %v1439_v22 = vrot.slane %v1425_v3, 4  ;;  %v1469_v25 = vmul.f32 %v1464_v13, %v6078_v48  ;;  %v1438_v29 = vsel %vm1400_vm0, %v1436_v10, %v1437_v2 }
 0x684   :  { %1330 = vrot.lane.b32.xlu1 %v1323_v24, %s5581_s25  ;;  %v1467_v24 = vmul.f32 %v1464_v13, %v1410_v38  ;;  %v1435_v9 = vsel %vm1400_vm0, %v1433_v16, %v1434_v19  ;;  %v1468_v30 = vmul.f32 %v1464_v13, %v6080_v36  ;;  %5219 = vmatpush3.bf16.msra.mxu1 %v5216_v7  ;;  %v1478_v23 = vrot.slane %v1466_v17, 4 }
 0x685   :  { %5221 = vmatprep.subr.bf16.mxu1 %v5220_v20  ;;  %v5224_v31 = vpack.c.bf16 %v1522_v28, %v1521_v26  ;;  %v1442_v48 = vsel %vm1400_vm0, %v1437_v2, %v1441_v21  ;;  %v1482_v37 = vrot.slane %v1469_v25, 4  ;;  %v1471_v40 = vmul.f32 %v1464_v13, %v1411_v4 }
 0x686   :  { %v1481_v34 = vrot.slane %v1467_v24, 4  ;;  %v1470_v42 = vmul.f32 %v1464_v13, %v6115_v35  ;;  %v5228_v43 = vpack.c.bf16 %v1524_v27, %v1523_v14  ;;  %v5232_v35 = vpack.c.bf16 %v1526_v18, %v1525_v44 }
 0x687   :  { %1332 = vrot.lane.b32.xlu0 %v1325_v39, %s5581_s25  ;;  %v1479_v39 = vrot.slane %v1468_v30, 4  ;;  %v1486_v49 = vrot.slane %v1471_v40, 4  ;;  %v1205_v7 = vmul.f32 %v4228_v55, %v6080_v36 }
 0x688   :  { %1334 = vrot.lane.b32.xlu1 %v1327_v33, %s5581_s25  ;;  %v1440_v33 = vsel %vm1400_vm0, %v1434_v19, %v1439_v22  ;;  %5223 = vmatpush3.bf16.msra.mxu1 %v5220_v20  ;;  %v1483_v41 = vsel %vm1400_vm0, %v1481_v34, %v1482_v37 }
 0x689   :  { %5225 = vmatprep.subr.bf16.mxu1 %v5224_v31  ;;  %v1480_v47 = vsel %vm1400_vm0, %v1478_v23, %v1479_v39  ;;  %v1487_v38 = vsel %vm1400_vm0, %v1482_v37, %v1486_v49 }
 0x68b   :  { %1373 = vrot.lane.b32.xlu0 %v1365_v59, %s5582_s29  ;;  %v1204_v59 = vmul.f32 %v4228_v55, %v6072_v32 }
 0x68c   :  { %1375 = vrot.lane.b32.xlu1 %v1368_v51, %s5582_s29  ;;  %v1484_v51 = vrot.slane %v1470_v42, 4  ;;  %5227 = vmatpush3.bf16.msra.mxu1 %v5224_v31 }
 0x68d   :  { %5229 = vmatprep.subr.bf16.mxu1 %v5228_v43 }
 0x68e   :  { %v1485_v53 = vsel %vm1400_vm0, %v1479_v39, %v1484_v51  ;;  %v1609_v51 = vld [vmem:[%s5641_s14] sm:$0xff] }
 0x68f   :  { %1377 = vrot.lane.b32.xlu0 %v1370_v15, %s5582_s29 }
 0x690   :  { %1379 = vrot.lane.b32.xlu1 %v1372_v8, %s5582_s29  ;;  %5231 = vmatpush3.bf16.msra.mxu1 %v5228_v43 }
 0x691   :  { %5233 = vmatprep.subr.bf16.mxu1 %v5232_v35 }
 0x693   :  { %1443 = vrot.lane.b32.xlu0 %v1435_v9, %s5581_s25 }
 0x694   :  { %1445 = vrot.lane.b32.xlu1 %v1438_v29, %s5581_s25  ;;  %5235 = vmatpush3.bf16.msra.mxu1 %v5232_v35  ;;  %v4238_v35 = vld [vmem:[%s5636_s8 + $0x80] ss:$0 sm:$0xff]  ;;  %s5586_s8 = smov 64  }
 0x697   :  { %1447 = vrot.lane.b32.xlu0 %v1440_v33, %s5581_s25 }
 0x698   :  { %1449 = vrot.lane.b32.xlu1 %v1442_v48, %s5581_s25 }
 0x69b   :  { %1488 = vrot.lane.b32.xlu0 %v1480_v47, %s5582_s29 }
 0x69c   :  { %1490 = vrot.lane.b32.xlu1 %v1483_v41, %s5582_s29 }
 0x69f   :  { %1492 = vrot.lane.b32.xlu0 %v1485_v53, %s5582_s29 }
 0x6a0   :  { %1494 = vrot.lane.b32.xlu1 %v1487_v38, %s5582_s29 }
 0x6e5   :  { %v1226_v57 = vpop.permute.xlu0 %1225 }
 0x6e6   :  { %v1228_v56 = vpop.permute.xlu1 %1227 }
 0x6e7   :  { %v1234_v58 = vsel %vm1233_vm1, %v1226_v57, %v1228_v56 }
 0x6e8   :  { %v1238_v60 = vadd.f32 %v1234_v58, %v1204_v59 }
 0x6e9   :  { %v1258_v61 = vpop.permute.xlu0 %1257 }
 0x6ea   :  { %v1260_v45 = vpop.permute.xlu1 %1259 }
 0x6eb   :  { %v1266_v62 = vsel %vm1265_vm12, %v1258_v61, %v1260_v45  ;;  %v6205_v45 = vld [vmem:[#allocation6] sm:$0xff] }
 0x6ec   :  { %v1270_v50 = vadd.f32 %v1266_v62, %v1238_v60  ;;  %v1610_v60 = vld [vmem:[%s5641_s14 + $0x8] sm:$0xff]  ;;  %1694 = vst.msk [vmem:[#allocation5 + $0x8] sm:$0xff] %vm1692_vm2, %v6205_v45  ;;  %1695 = vst.msk [vmem:[#allocation5 + $0x10] sm:$0xff] %vm1692_vm2, %v6205_v45  ;;  %4774 = vmatprep.mubr.msk.f32.mxu0 %vm5585_vm5, %v6205_v45  ;;  %s6772_s14 = sld [smem:[#allocation18_spill]] }
 0x6ed   :  { %v1230_v0 = vpop.permute.xlu0 %1229  ;;  %1693 = vst.msk [vmem:[#allocation5] sm:$0xff] %vm1692_vm2, %v6205_v45  ;;  %1696 = vst.msk [vmem:[#allocation5 + $0x18] sm:$0xff] %vm1692_vm2, %v6205_v45 }
 0x6ee   :  { %v1232_v63 = vpop.permute.xlu1 %1231  ;;  %v1293_v1 = vadd.f32 %v6122_v46, %v1270_v50  ;;  %1697 = vst.msk [vmem:[#allocation5 + $0x20] sm:$0xff] %vm1692_vm2, %v6205_v45  ;;  %v4243_v50 = vld [vmem:[%s5646_s19 + $0x2] ss:$0 sm:$0xff]  ;;  %vm3669_vm2 = vcmask 519170  }
 0x6ef   :  { %v1235_v4 = vsel %vm1233_vm1, %v1230_v0, %v1232_v63  ;;  %v4246_v63 = vld [vmem:[%s5646_s19 + $0x5] ss:$0 sm:$0xff]  ;;  %v4249_v0 = vld [vmem:[%s5646_s19 + $0x8] ss:$0 sm:$0xff]  ;;  %1901 = vst.msk [vmem:[#allocation6 + $0x18] sm:$0xf] %vm1900_vm6, %v6205_v45 }
 0x6f0   :  { %v1239_v8 = vadd.f32 %v1235_v4, %v1205_v7 }
 0x6f1   :  { %v1262_v54 = vpop.permute.xlu0 %1261 }
 0x6f2   :  { %v1264_v10 = vpop.permute.xlu1 %1263 }
 0x6f3   :  { %v1267_v3 = vsel %vm1265_vm12, %v1262_v54, %v1264_v10  ;;  %v1811_v10 = vld [vmem:[%s5651_s24 + $0x8] sm:$0xff] }
 0x6f4   :  { %v1271_v32 = vadd.f32 %v1267_v3, %v1239_v8  ;;  %v1810_v8 = vld [vmem:[%s5651_s24] sm:$0xff]  ;;  %v5584_v3 = vmov 0.0|0.0  }
 0x6f5   :  { %v1329_v12 = vpop.permute.xlu0 %1328  ;;  %5240 = vmatprep.subr.bf16.mxu0 %v5584_v3 }
 0x6f6   :  { %v1331_v11 = vpop.permute.xlu1 %1330  ;;  %v1294_v13 = vadd.f32 %v6130_v52, %v1271_v32  ;;  %v5241_v32 = vpack.c.bf16 %v1811_v10, %v1810_v8  ;;  %v2127_v8 = vld [vmem:[%s5661_s6 + $0x8] sm:$0xff] }
 0x6f7   :  { %v1336_v16 = vsel %vm1233_vm1, %v1329_v12, %v1331_v11 }
 0x6f8   :  { %v1340_v19 = vadd.f32 %v1336_v16, %v1293_v1  ;;  %5242 = vmatpush3.bf16.msra.mxu0 %v5241_v32 }
 0x6f9   :  { %v1333_v2 = vpop.permute.xlu0 %1332  ;;  %5243 = vmatprep.subr.bf16.mxu0 %v5584_v3 }
 0x6fa   :  { %v1335_v15 = vpop.permute.xlu1 %1334 }
 0x6fb   :  { %v1337_v21 = vsel %vm1233_vm1, %v1333_v2, %v1335_v15 }
 0x6fc   :  { %v1341_v24 = vadd.f32 %v1337_v21, %v1294_v13  ;;  %v1814_v21 = vld [vmem:[%s5651_s24 + $0x20] sm:$0xff] }
 0x6fd   :  { %v1374_v20 = vpop.permute.xlu0 %1373 }
 0x6fe   :  { %v1376_v46 = vpop.permute.xlu1 %1375 }
 0x6ff   :  { %v1381_v36 = vsel %vm1265_vm12, %v1374_v20, %v1376_v46  ;;  %v1812_v46 = vld [vmem:[%s5651_s24 + $0x10] sm:$0xff]  ;;  %v1813_v20 = vld [vmem:[%s5651_s24 + $0x18] sm:$0xff] }
 0x700   :  { %v1385_v22 = vadd.f32 %v1381_v36, %v1340_v19  ;;  %v5244_v36 = vpack.c.bf16 %v1813_v20, %v1812_v46 }
 0x701   :  { %v1378_v26 = vpop.permute.xlu0 %1377 }
 0x702   :  { %v1380_v25 = vpop.permute.xlu1 %1379  ;;  %v1408_v28 = vadd.f32 %v6140_v5, %v1385_v22  ;;  %v4237_v5 = vld [vmem:[%s5631_s3 + $0x9] ss:$0 sm:$0xff]  ;;  %s5583_s3 = smov 80   ;;  %5245 = vmatpush3.bf16.msra.mxu0 %v5244_v36 }
 0x703   :  { %v1382_v52 = vsel %vm1265_vm12, %v1378_v26, %v1380_v25  ;;  %v1815_v22 = vld [vmem:[%s5651_s24 + $0x28] sm:$0xff]  ;;  %5246 = vmatprep.subr.bf16.mxu0 %v5584_v3  ;;  %v1816_v25 = vld [vmem:[%s5651_s24 + $0x30] sm:$0xff]  ;;  %v1817_v26 = vld [vmem:[%s5651_s24 + $0x38] sm:$0xff] }
 0x704   :  { %v1386_v29 = vadd.f32 %v1382_v52, %v1341_v24  ;;  %v5247_v24 = vpack.c.bf16 %v1815_v22, %v1814_v21  ;;  %v4241_v52 = vld [vmem:[%s5646_s19] ss:$0 sm:$0xff]  ;;  %v4256_v22 = vld [vmem:[%s5656_s30 + $0x3] ss:$0 sm:$0xff] }
 0x705   :  { %v1444_v17 = vpop.permute.xlu0 %1443 }
 0x706   :  { %v1446_v9 = vpop.permute.xlu1 %1445  ;;  %v1409_v30 = vadd.f32 %v6145_v6, %v1386_v29  ;;  %5248 = vmatpush3.bf16.msra.mxu0 %v5247_v24 }
 0x707   :  { %v1451_v33 = vsel %vm1233_vm1, %v1444_v17, %v1446_v9  ;;  %5249 = vmatprep.subr.bf16.mxu0 %v5584_v3  ;;  %v4242_v9 = vld [vmem:[%s5646_s19 + $0x1] ss:$0 sm:$0xff] }
 0x708   :  { %v1455_v34 = vadd.f32 %v1451_v33, %v1408_v28  ;;  %v5250_v28 = vpack.c.bf16 %v1817_v26, %v1816_v25 }
 0x709   :  { %v1448_v48 = vpop.permute.xlu0 %1447 }
 0x70a   :  { %v1450_v31 = vpop.permute.xlu1 %1449  ;;  %5251 = vmatpush3.bf16.msra.mxu0 %v5250_v28 }
 0x70b   :  { %v1452_v27 = vsel %vm1233_vm1, %v1448_v48, %v1450_v31  ;;  %4812 = vmatprep.subr.mxu0 %v6205_v45  ;;  %v4244_v31 = vld [vmem:[%s5646_s19 + $0x3] ss:$0 sm:$0xff]  ;;  %vm3667_vm1 = vcmask 1043970  }
 0x70c   :  { %v1456_v40 = vadd.f32 %v1452_v27, %v1409_v30 }
 0x70d   :  { %v1489_v14 = vpop.permute.xlu0 %1488 }
 0x70e   :  { %v1491_v37 = vpop.permute.xlu1 %1490 }
 0x70f   :  { %v1496_v23 = vsel %vm1265_vm12, %v1489_v14, %v1491_v37 }
 0x710   :  { %v1500_v39 = vadd.f32 %v1496_v23, %v1455_v34  ;;  %v4245_v34 = vld [vmem:[%s5646_s19 + $0x4] ss:$0 sm:$0xff] }
 0x711   :  { %v1493_v43 = vpop.permute.xlu0 %1492 }
 0x712   :  { %v1495_v42 = vpop.permute.xlu1 %1494  ;;  %v1507_v44 = vadd.f32 %v4237_v5, %v1500_v39  ;;  %v4247_v39 = vld [vmem:[%s5646_s19 + $0x6] ss:$0 sm:$0xff] }
 0x713   :  { %v1497_v6 = vsel %vm1265_vm12, %v1493_v43, %v1495_v42 }
 0x714   :  { %v1501_v18 = vadd.f32 %v1497_v6, %v1456_v40  ;;  %v1509_v41 = vmax.f32 %v1507_v44, 0.0  ;;  %v4248_v44 = vld [vmem:[%s5646_s19 + $0x7] ss:$0 sm:$0xff] }
 0x716   :  { %v1508_v47 = vadd.f32 %v4237_v5, %v1501_v18  ;;  %4748 = vmatprep.mubr.f32.mxu1 %v1509_v41 }
 0x718   :  { %v1510_v49 = vmax.f32 %v1508_v47, 0.0 }
 0x71a   :  { %4749 = vmatmul.mubr.f32.vlgmr.msra.gmra.mrb[12].mxu1 %v1510_v49 }
 0x71b   :  { %4755 = vmatprep.mubr.msk.f32.mxu1 %vm1191_vm11, %v1609_v51  ;;  %v4250_v51 = vld [vmem:[%s5646_s19 + $0x9] ss:$0 sm:$0xff]  ;;  %s6773_s19 = sld [smem:[#allocation19_spill]] }
 0x7ed   :  { %v4750_v38 = vpop.f32.mrb[12].mxu1 }
 0x7ee   :  { %v1604_v53 = vadd.f32 %v4750_v38, %v4238_v35  ;;  %v1598_v55 = vpop.f32.mrb[13].mxu1 }
 0x7ef   :  { %v1599_v56 = vadd.f32 %v4238_v35, %v1598_v55 }
 0x7f0   :  { %v1608_v57 = vmax.f32 %v1604_v53, 0.0 }
 0x7f1   :  { %v1607_v58 = vmax.f32 %v1599_v56, 0.0  ;;  %v4254_v56 = vld [vmem:[%s5656_s30 + $0x1] ss:$0 sm:$0xff] }
 0x7f3   :  { %v5236_v59 = vpack.c.bf16 %v1608_v57, %v1607_v58  ;;  %v4257_v57 = vld [vmem:[%s5656_s30 + $0x4] ss:$0 sm:$0xff]  ;;  %v4260_v58 = vld [vmem:[%s5656_s30 + $0x7] ss:$0 sm:$0xff] }
 0x7f5   :  { %5237 = vmatprep.subr.bf16.mxu1 %v5236_v59 }
 0x7f6   :  { %5239 = vmatpush3.bf16.msra.mxu1 %v5236_v59  ;;  %v4251_v59 = vld [vmem:[%s5651_s24 + $0x40] ss:$0 sm:$0xff]  ;;  %s6774_s24 = sld [smem:[#allocation20_spill]] }
 0x7f7   :  { %5252 = vmatprep.subr.bf16.mxu1 %v5584_v3 }
 0x7f9   :  { %4756 = vmatmul.mubr.msk.f32.vlgmr.msra.gmra.mrb[14].mxu1 %vm1191_vm11, %v1610_v60  ;;  %vm2219_vm11 = vcmask 64512  }
 0x7fa   :  { %4809 = vmatprep.mubr.msk.f32.mxu1 %vm5585_vm5, %v6205_v45 }
 0x8cc   :  { %v4757_v61 = vpop.f32.mrb[14].mxu1 }
 0x8cd   :  { %1704 = vst.msk [vmem:[#allocation5 + $0xc] sm:$0xff] %vm693_vm3, %v4757_v61  ;;  %1699 = vrot.lane.b32.xlu0 %v4757_v61, %s5583_s3  ;;  %v1683_v62 = vpop.f32.mrb[15].mxu1 }
 0x8ce   :  { %1710 = vst.msk [vmem:[#allocation5 + $0x1e] sm:$0xff] %vm693_vm3, %v1683_v62  ;;  %1706 = vrot.lane.b32.xlu1 %v1683_v62, %s5583_s3 }
 0x8d1   :  { %1732 = vrot.lane.b32.xlu0 %v4243_v50, %s5579_s17 }
 0x8d2   :  { %1763 = vrot.lane.b32.xlu1 %v4246_v63, %s5579_s17 }
 0x8d4   :  { %v1718_v29 = vld [vmem:[#allocation5 + $0xa] sm:$0xff] }
 0x8d5   :  { %1794 = vrot.lane.b32.xlu0 %v4249_v0, %s5579_s17  ;;  %v1724_v30 = vmul.f32 %v4242_v9, %v1718_v29  ;;  %v1749_v37 = vld [vmem:[#allocation5 + $0x1e] sm:$0xff]  ;;  %v1780_v43 = vld [vmem:[#allocation5 + $0xc] sm:$0xff]  ;;  %v4259_v29 = vld [vmem:[%s5656_s30 + $0x6] ss:$0 sm:$0xff] }
 0x8d6   :  { %v1755_v5 = vmul.f32 %v4245_v34, %v1749_v37  ;;  %v1786_v47 = vmul.f32 %v4248_v44, %v1780_v43  ;;  %v4255_v0 = vld [vmem:[%s5656_s30 + $0x2] ss:$0 sm:$0xff]  ;;  %v2131_v44 = vld [vmem:[%s5661_s6 + $0x28] sm:$0xff] }
 0x8d7   :  { %v2130_v43 = vld [vmem:[%s5661_s6 + $0x20] sm:$0xff] }
 0x93f   :  { %v1700_v1 = vpop.permute.xlu0 %1699 }
 0x940   :  { %1703 = vst.msk [vmem:[#allocation5 + $0x2] sm:$0xff] %vm1702_vm4, %v1700_v1  ;;  %v1707_v4 = vpop.permute.xlu1 %1706  ;;  %v4258_v1 = vld [vmem:[%s5656_s30 + $0x5] ss:$0 sm:$0xff] }
 0x941   :  { %1709 = vst.msk [vmem:[#allocation5 + $0x14] sm:$0xff] %vm1702_vm4, %v1707_v4  ;;  %v4261_v4 = vld [vmem:[%s5656_s30 + $0x8] ss:$0 sm:$0xff]  ;;  %vm3671_vm4 = vcmask 1041920  }
 0x943   :  { %v1733_v7 = vpop.permute.xlu0 %1732 }
 0x944   :  { %v1764_v54 = vpop.permute.xlu1 %1763 }
 0x947   :  { %v1711_v11 = vld [vmem:[#allocation5] sm:$0xff]  ;;  %v1795_v2 = vpop.permute.xlu0 %1794 }
 0x948   :  { %v1735_v12 = vmul.f32 %v1733_v7, %v1711_v11  ;;  %v1741_v13 = vld [vmem:[#allocation5 + $0x14] sm:$0xff]  ;;  %v1772_v15 = vld [vmem:[#allocation5 + $0x2] sm:$0xff]  ;;  %v1717_v17 = vmul.f32 %v4241_v52, %v1711_v11 }
 0x949   :  { %v1766_v16 = vmul.f32 %v1764_v54, %v1741_v13  ;;  %v1797_v19 = vmul.f32 %v1795_v2, %v1772_v15  ;;  %v1747_v14 = vmul.f32 %v4244_v31, %v1741_v13  ;;  %v1778_v6 = vmul.f32 %v4247_v39, %v1772_v15  ;;  %v2126_v7 = vld [vmem:[%s5661_s6] sm:$0xff]  ;;  %v2129_v13 = vld [vmem:[%s5661_s6 + $0x18] sm:$0xff] }
 0x94a   :  { %1737 = vrot.lane.b32.xlu1 %v1735_v12, %s5581_s25  ;;  %v1725_v48 = vadd.f32 %v1724_v30, %v1717_v17  ;;  %v5253_v10 = vpack.c.bf16 %v2127_v8, %v2126_v7  ;;  %v2128_v12 = vld [vmem:[%s5661_s6 + $0x10] sm:$0xff] }
 0x94b   :  { %1768 = vrot.lane.b32.xlu0 %v1766_v16, %s5581_s25  ;;  %v5256_v15 = vpack.c.bf16 %v2129_v13, %v2128_v12 }
 0x94c   :  { %5254 = vmatpush3.bf16.msra.mxu1 %v5253_v10 }
 0x94d   :  { %5255 = vmatprep.subr.bf16.mxu1 %v5584_v3 }
 0x94e   :  { %1799 = vrot.lane.b32.xlu1 %v1797_v19, %s5581_s25 }
 0x950   :  { %5257 = vmatpush3.bf16.msra.mxu1 %v5256_v15 }
 0x951   :  { %5258 = vmatprep.subr.bf16.mxu1 %v5584_v3 }
 0x952   :  { %1929 = vrot.lane.b32.xlu1 %v4254_v56, %s5580_s21 }
 0x956   :  { %1987 = vrot.lane.b32.xlu1 %v4257_v57, %s5580_s21 }
 0x95a   :  { %2065 = vrot.lane.b32.xlu1 %v4260_v58, %s5580_s21 }
 0x9bc   :  { %v1738_v33 = vpop.permute.xlu1 %1737 }
 0x9bd   :  { %v1740_v27 = vadd.f32 %v1738_v33, %v1725_v48  ;;  %v1769_v42 = vpop.permute.xlu0 %1768 }
 0x9bf   :  { %v1748_v23 = vadd.f32 %v1747_v14, %v1740_v27 }
 0x9c0   :  { %v1800_v35 = vpop.permute.xlu1 %1799 }
 0x9c1   :  { %v1756_v40 = vadd.f32 %v1755_v5, %v1748_v23 }
 0x9c3   :  { %v1771_v18 = vadd.f32 %v1769_v42, %v1756_v40 }
 0x9c4   :  { %v1930_v32 = vpop.permute.xlu1 %1929 }
 0x9c5   :  { %v1779_v41 = vadd.f32 %v1778_v6, %v1771_v18 }
 0x9c7   :  { %v1787_v49 = vadd.f32 %v1786_v47, %v1779_v41 }
 0x9c8   :  { %v1988_v2 = vpop.permute.xlu1 %1987 }
 0x9c9   :  { %v1802_v38 = vadd.f32 %v1800_v35, %v1787_v49 }
 0x9cb   :  { %v1808_v53 = vadd.f32 %v4250_v51, %v1802_v38  ;;  %v2132_v38 = vld [vmem:[%s5661_s6 + $0x30] sm:$0xff] }
 0x9cc   :  { %v2066_v9 = vpop.permute.xlu1 %2065 }
 0x9cd   :  { %v1809_v55 = vmax.f32 %v1808_v53, 0.0  ;;  %v2133_v53 = vld [vmem:[%s5661_s6 + $0x38] sm:$0xff] }
 0x9cf   :  { %4775 = vmatmul.mubr.msk.f32.vlgmr.msra.gmra.mrb[14].mxu0 %vm693_vm3, %v1809_v55 }
 0x9d0   :  { %4814 = vmatprep.mubr.msk.f32.mxu0 %vm5585_vm5, %v6205_v45 }
 0xaa2   :  { %v1892_v60 = vpop.f32.mrb[14].mxu0 }
 0xaa3   :  { %v1893_v61 = vadd.f32 %v4251_v59, %v1892_v60  ;;  %v4776_v62 = vpop.f32.mrb[15].mxu0  ;;  %v5259_v59 = vpack.c.bf16 %v2131_v44, %v2130_v43  ;;  %v4253_v43 = vld [vmem:[%s5656_s30] ss:$0 sm:$0xff] }
 0xaa5   :  { %v1896_v50 = vmax.f32 %v1893_v61, 0.0  ;;  %5260 = vmatpush3.bf16.msra.mxu1 %v5259_v59 }
 0xaa6   :  { %5261 = vmatprep.subr.bf16.mxu1 %v5584_v3 }
 0xaa7   :  { %v1903_v63 = vrot.slane %v1896_v50, 6 }
 0xaa9   :  { %1904 = vrot.lane.b32.xlu0 %v1903_v63, %s5580_s21 }
 0xaad   :  { %1949 = vrot.lane.b32.xlu0 %v4255_v0, %s5586_s8  ;;  %v5262_v0 = vpack.c.bf16 %v2133_v53, %v2132_v38 }
 0xaaf   :  { %5263 = vmatpush3.bf16.msra.mxu1 %v5262_v0 }
 0xab0   :  { %5264 = vmatprep.subr.bf16.mxu1 %v5584_v3 }
 0xab1   :  { %2017 = vrot.lane.b32.xlu0 %v4258_v1, %s5586_s8 }
 0xab5   :  { %2095 = vrot.lane.b32.xlu0 %v4261_v4, %s5586_s8 }
 0xb1b   :  { %v1905_v54 = vpop.permute.xlu0 %1904 }
 0xb1c   :  { %1908 = vst.msk [vmem:[#allocation6] sm:$0xfc] %vm1907_vm7, %v1905_v54 }
 0xb1d   :  { %1910 = vst.msk [vmem:[#allocation6 + $0x8] sm:$0xfc] %vm1909_vm8, %v1905_v54 }
 0xb1e   :  { %1912 = vst.msk [vmem:[#allocation6 + $0x10] sm:$0x3] %vm1911_vm9, %v1905_v54 }
 0xb1f   :  { %1914 = vst.msk [vmem:[#allocation6 + $0x18] sm:$0x3] %vm1913_vm10, %v1905_v54  ;;  %v1950_v11 = vpop.permute.xlu0 %1949 }
 0xb23   :  { %v2018_v24 = vpop.permute.xlu0 %2017  ;;  %v1963_v25 = vld [vmem:[#allocation6] sm:$0xfc] }
 0xb24   :  { %v1979_v16 = vld [vmem:[#allocation6 + $0x8] sm:$0xfc]  ;;  %v6275_v28 = vld [vmem:[#allocation6] sm:$0xff]  ;;  %v1990_v27 = vmul.f32 %v1988_v2, %v1963_v25  ;;  %v1970_v39 = vmul.f32 %v4256_v22, %v1963_v25  ;;  %v2020_v57 = vmul.f32 %v2018_v24, %v1963_v25 }
 0xb25   :  { %v1922_v46 = vld [vmem:[#allocation6 + $0x8] sm:$0xff]  ;;  %v1991_v21 = vmul.f32 %v1988_v2, %v1979_v16  ;;  %v1964_v26 = vld [vmem:[#allocation6 + $0x10] sm:$0x3]  ;;  %v6278_v17 = vld [vmem:[#allocation6] sm:$0xf0]  ;;  %v2021_v37 = vmul.f32 %v2018_v24, %v1979_v16  ;;  %v1932_v5 = vmul.f32 %v1930_v32, %v6275_v28  ;;  %v1952_v47 = vmul.f32 %v1950_v11, %v6275_v28 }
 0xb26   :  { %v1980_v19 = vld [vmem:[#allocation6 + $0x18] sm:$0x3]  ;;  %v1933_v20 = vmul.f32 %v1930_v32, %v1922_v46  ;;  %v1953_v52 = vmul.f32 %v1950_v11, %v1922_v46  ;;  %v2057_v30 = vld [vmem:[#allocation6 + $0x8] sm:$0xf0]  ;;  %v6280_v33 = vld [vmem:[#allocation6 + $0x10] sm:$0xf]  ;;  %v1992_v23 = vmul.f32 %v1988_v2, %v1964_v26  ;;  %v1971_v40 = vmul.f32 %v4256_v22, %v1964_v26 }
 0xb27   :  { %v1993_v36 = vmul.f32 %v1988_v2, %v1980_v19  ;;  %v2001_v31 = vrot.slane %v1991_v21, 2  ;;  %v2058_v34 = vld [vmem:[#allocation6 + $0x18] sm:$0xf]  ;;  %v2023_v14 = vmul.f32 %v2018_v24, %v1980_v19  ;;  %v2069_v42 = vmul.f32 %v2066_v9, %v2057_v30  ;;  %1936 = vrot.lane.b32.xlu1 %v1932_v5, %s5582_s29  ;;  %v2096_v58 = vpop.permute.xlu0 %2095  ;;  %v2135_v11 = vld [vmem:[%s5661_s6 + $0x48] sm:$0xff]  ;;  %v2136_v22 = vld [vmem:[%s5661_s6 + $0x50] sm:$0xff] }
 0xb28   :  { %1938 = vrot.lane.b32.xlu0 %v1933_v20, %s5582_s29  ;;  %v2048_v6 = vmul.f32 %v4259_v29, %v6278_v17  ;;  %v2049_v18 = vmul.f32 %v4259_v29, %v6280_v33  ;;  %v2071_v41 = vmul.f32 %v2066_v9, %v2058_v34  ;;  %v2031_v49 = vrot.slane %v2021_v37, 2  ;;  %v2134_v32 = vld [vmem:[%s5661_s6 + $0x40] sm:$0xff] }
 0xb29   :  { %v2002_v48 = vrot.slane %v1993_v36, 2  ;;  %v2032_v51 = vrot.slane %v2023_v14, 2  ;;  %v1998_v55 = vrot.slane %v1990_v27, 2  ;;  %v1999_v56 = vrot.slane %v1992_v23, 2  ;;  %v2140_v27 = vld [vmem:[%s5661_s6 + $0x70] sm:$0xff]  ;;  %v2141_v23 = vld [vmem:[%s5661_s6 + $0x78] sm:$0xff] }
 0xb2a   :  { %v2079_v60 = vrot.slane %v2069_v42, 4  ;;  %v2022_v61 = vmul.f32 %v2018_v24, %v1964_v26  ;;  %v1974_v62 = vrot.slane %v1970_v39, 2  ;;  %v1975_v50 = vrot.slane %v1971_v40, 2  ;;  %v2137_v24 = vld [vmem:[%s5661_s6 + $0x58] sm:$0xff] }
 0xb2b   :  { %v2003_v35 = vsel %vm1285_vm15, %v2001_v31, %v2002_v48  ;;  %v2080_v63 = vrot.slane %v2071_v41, 4  ;;  %1956 = vrot.lane.b32.xlu1 %v1952_v47, %s5586_s8  ;;  %v2052_v1 = vrot.slane %v2048_v6, 4  ;;  %v2053_v4 = vrot.slane %v2049_v18, 4  ;;  %v2138_v48 = vld [vmem:[%s5661_s6 + $0x60] sm:$0xff] }
 0xb2c   :  { %1958 = vrot.lane.b32.xlu0 %v1953_v52, %s5586_s8  ;;  %v2099_v7 = vmul.f32 %v2096_v58, %v2057_v30  ;;  %v2101_v8 = vmul.f32 %v2096_v58, %v2058_v34  ;;  %v2033_v10 = vsel %vm1285_vm15, %v2031_v49, %v2032_v51  ;;  %v1976_v54 = vsel %vm1285_vm15, %v1974_v62, %v1975_v50  ;;  %v2139_v34 = vld [vmem:[%s5661_s6 + $0x68] sm:$0xff] }
 0xb2d   :  { %v2068_v12 = vmul.f32 %v2066_v9, %v6278_v17  ;;  %v6303_v13 = vsel %vm1400_vm0, %v2052_v1, %v2053_v4  ;;  %v2070_v15 = vmul.f32 %v2066_v9, %v6280_v33  ;;  %v2028_v2 = vrot.slane %v2020_v57, 2  ;;  %v4262_v4 = vld [vmem:[%s5656_s30 + $0x9] ss:$0 sm:$0xff]  ;;  %s6775_s30 = sld [smem:[#allocation21_spill]] }
 0xb2e   :  { %v2029_v16 = vrot.slane %v2022_v61, 2  ;;  %v2000_v19 = vsel %vm1285_vm15, %v1998_v55, %v1999_v56  ;;  %v5265_v46 = vpack.c.bf16 %v2135_v11, %v2134_v32  ;;  %v2109_v20 = vrot.slane %v2099_v7, 4  ;;  %v4263_v32 = vld [vmem:[%s5661_s6 + $0x80] ss:$0 sm:$0xff]  ;;  %s6776_s6 = sld [smem:[#allocation22_spill]] }
 0xb2f   :  { %2004 = vrot.lane.b32.xlu1 %v2000_v19, %s5582_s29  ;;  %v2110_v21 = vrot.slane %v2101_v8, 4  ;;  %v2081_v36 = vsel %vm1400_vm0, %v2079_v60, %v2080_v63  ;;  %v2076_v25 = vrot.slane %v2068_v12, 4  ;;  %v2077_v26 = vrot.slane %v2070_v15, 4  ;;  %v4273_v19 = vld [vmem:[%s6773_s19 + $0x8] ss:$0 sm:$0xff] }
 0xb30   :  { %2006 = vrot.lane.b32.xlu0 %v2003_v35, %s5582_s29  ;;  %v2098_v52 = vmul.f32 %v2096_v58, %v6278_v17  ;;  %v2100_v29 = vmul.f32 %v2096_v58, %v6280_v33  ;;  %v2030_v9 = vsel %vm1285_vm15, %v2028_v2, %v2029_v16  ;;  %5266 = vmatpush3.bf16.msra.mxu1 %v5265_v46  ;;  %v2218_v2 = vld [vmem:[%s6772_s14] sm:$0xff]  ;;  %vm2500_vm15 = vcmask 1046018  }
 0xb31   :  { %v5268_v30 = vpack.c.bf16 %v2137_v24, %v2136_v22  ;;  %v2111_v31 = vsel %vm1400_vm0, %v2109_v20, %v2110_v21  ;;  %5267 = vmatprep.subr.bf16.mxu1 %v5584_v3  ;;  %v2078_v33 = vsel %vm1400_vm0, %v2076_v25, %v2077_v26  ;;  %v5271_v14 = vpack.c.bf16 %v2139_v34, %v2138_v48  ;;  %v4267_v16 = vld [vmem:[%s6773_s19 + $0x2] ss:$0 sm:$0xff]  ;;  %v4270_v21 = vld [vmem:[%s6773_s19 + $0x5] ss:$0 sm:$0xff]  ;;  %v2407_v24 = vld [vmem:[%s6774_s24 + $0x8] sm:$0xff] }
 0xb32   :  { %v2106_v37 = vrot.slane %v2098_v52, 4  ;;  %v2107_v17 = vrot.slane %v2100_v29, 4  ;;  %v5274_v39 = vpack.c.bf16 %v2141_v23, %v2140_v27  ;;  %v1921_v18 = vmul.f32 %v4253_v43, %v6275_v28  ;;  %v2406_v22 = vld [vmem:[%s6774_s24] sm:$0xff]  ;;  %v2411_v23 = vld [vmem:[%s6774_s24 + $0x28] sm:$0xff] }
 0xb33   :  { %2034 = vrot.lane.b32.xlu1 %v2030_v9, %s5586_s8  ;;  %v5277_v25 = vpack.c.bf16 %v2407_v24, %v2406_v22  ;;  %v4265_v43 = vld [vmem:[%s6773_s19] ss:$0 sm:$0xff] }
 0xb34   :  { %2036 = vrot.lane.b32.xlu0 %v2033_v10, %s5586_s8  ;;  %5269 = vmatpush3.bf16.msra.mxu1 %v5268_v30  ;;  %v2108_v5 = vsel %vm1400_vm0, %v2106_v37, %v2107_v17  ;;  %v2408_v17 = vld [vmem:[%s6774_s24 + $0x10] sm:$0xff]  ;;  %v2640_v24 = vld [vmem:[%s6776_s6 + $0x18] sm:$0xff]  ;;  %vm2502_vm0 = vcmask 521218  }
 0xb35   :  { %5270 = vmatprep.subr.bf16.mxu1 %v5584_v3 }
 0xb37   :  { %2082 = vrot.lane.b32.xlu1 %v2078_v33, %s5582_s29  ;;  %v2409_v33 = vld [vmem:[%s6774_s24 + $0x18] sm:$0xff] }
 0xb38   :  { %2084 = vrot.lane.b32.xlu0 %v2081_v36, %s5582_s29  ;;  %5272 = vmatpush3.bf16.msra.mxu1 %v5271_v14  ;;  %v2410_v14 = vld [vmem:[%s6774_s24 + $0x20] sm:$0xff]  ;;  %v5280_v27 = vpack.c.bf16 %v2409_v33, %v2408_v17  ;;  %v2646_v33 = vld [vmem:[%s6776_s6 + $0x48] sm:$0xff] }
 0xb39   :  { %5273 = vmatprep.subr.bf16.mxu1 %v5584_v3  ;;  %v2645_v17 = vld [vmem:[%s6776_s6 + $0x40] sm:$0xff] }
 0xb3b   :  { %2112 = vrot.lane.b32.xlu1 %v2108_v5, %s5586_s8  ;;  %v5283_v5 = vpack.c.bf16 %v2411_v23, %v2410_v14  ;;  %v5301_v23 = vpack.c.bf16 %v2646_v33, %v2645_v17 }
 0xb3c   :  { %2114 = vrot.lane.b32.xlu0 %v2111_v31, %s5586_s8  ;;  %5275 = vmatpush3.bf16.msra.mxu1 %v5274_v39  ;;  %v2412_v39 = vld [vmem:[%s6774_s24 + $0x30] sm:$0xff] }
 0xb3d   :  { %5312 = vmatprep.subr.bf16.mxu1 %v5584_v3 }
 0xb40   :  { %2328 = vrot.lane.b32.xlu0 %v4267_v16, %s5580_s21 }
 0xb44   :  { %2390 = vrot.lane.b32.xlu0 %v4273_v19, %s5580_s21 }
 0xb99   :  { %v1937_v44 = vpop.permute.xlu1 %1936 }
 0xb9a   :  { %v1939_v40 = vpop.permute.xlu0 %1938 }
 0xb9b   :  { %v1940_v6 = vsel %vm1265_vm12, %v1937_v44, %v1939_v40  ;;  %v2413_v40 = vld [vmem:[%s6774_s24 + $0x38] sm:$0xff]  ;;  %v4266_v44 = vld [vmem:[%s6773_s19 + $0x1] ss:$0 sm:$0xff] }
 0xb9c   :  { %v1942_v47 = vadd.f32 %v1940_v6, %v1921_v18 }
 0xb9d   :  { %v1957_v49 = vpop.permute.xlu1 %1956 }
 0xb9e   :  { %v1959_v42 = vpop.permute.xlu0 %1958 }
 0xb9f   :  { %v1960_v51 = vsel %vm693_vm3, %v1957_v49, %v1959_v42  ;;  %v5286_v42 = vpack.c.bf16 %v2413_v40, %v2412_v39 }
 0xba0   :  { %v1962_v35 = vadd.f32 %v1960_v51, %v1942_v47  ;;  %v4268_v47 = vld [vmem:[%s6773_s19 + $0x3] ss:$0 sm:$0xff] }
 0xba1   :  { %v2005_v53 = vpop.permute.xlu1 %2004 }
 0xba2   :  { %v2007_v41 = vpop.permute.xlu0 %2006  ;;  %v1978_v55 = vadd.f32 %v1976_v54, %v1962_v35  ;;  %v4269_v35 = vld [vmem:[%s6773_s19 + $0x4] ss:$0 sm:$0xff] }
 0xba3   :  { %v2008_v56 = vsel %vm1265_vm12, %v2005_v53, %v2007_v41 }
 0xba4   :  { %v2010_v57 = vadd.f32 %v2008_v56, %v1978_v55 }
 0xba5   :  { %v2035_v58 = vpop.permute.xlu1 %2034 }
 0xba6   :  { %v2037_v38 = vpop.permute.xlu0 %2036 }
 0xba7   :  { %v2038_v60 = vsel %vm693_vm3, %v2035_v58, %v2037_v38  ;;  %v4271_v58 = vld [vmem:[%s6773_s19 + $0x6] ss:$0 sm:$0xff] }
 0xba8   :  { %v2040_v61 = vadd.f32 %v2038_v60, %v2010_v57 }
 0xba9   :  { %v2083_v28 = vpop.permute.xlu1 %2082 }
 0xbaa   :  { %v2085_v59 = vpop.permute.xlu0 %2084  ;;  %v2056_v62 = vadd.f32 %v6303_v13, %v2040_v61  ;;  %v4272_v61 = vld [vmem:[%s6773_s19 + $0x7] ss:$0 sm:$0xff] }
 0xbab   :  { %v2086_v50 = vsel %vm1265_vm12, %v2083_v28, %v2085_v59  ;;  %vm2302_vm12 = vcmask 523268  }
 0xbac   :  { %v2088_v0 = vadd.f32 %v2086_v50, %v2056_v62 }
 0xbad   :  { %v2113_v1 = vpop.permute.xlu1 %2112 }
 0xbae   :  { %v2115_v63 = vpop.permute.xlu0 %2114 }
 0xbaf   :  { %v2116_v7 = vsel %vm693_vm3, %v2113_v1, %v2115_v63 }
 0xbb0   :  { %v2118_v8 = vadd.f32 %v2116_v7, %v2088_v0 }
 0xbb2   :  { %v2124_v10 = vadd.f32 %v4262_v4, %v2118_v8  ;;  %v2329_v26 = vpop.permute.xlu0 %2328  ;;  %v4274_v4 = vld [vmem:[%s6773_s19 + $0x9] ss:$0 sm:$0xff] }
 0xbb4   :  { %v2125_v54 = vmax.f32 %v2124_v10, 0.0 }
 0xbb6   :  { %4810 = vmatmul.mubr.f32.vlgmr.msra.gmra.mrb[16].mxu1 %v2125_v54  ;;  %v2391_v31 = vpop.permute.xlu0 %2390 }
 0xbb7   :  { %4903 = vmatprep.mubr.msk.f32.mxu1 %vm5585_vm5, %v6205_v45 }
 0xc89   :  { %v2213_v11 = vpop.f32.mrb[16].mxu1 }
 0xc8a   :  { %v2214_v12 = vadd.f32 %v4263_v32, %v2213_v11  ;;  %v4811_v13 = vpop.f32.mrb[17].mxu1  ;;  %v4278_v32 = vld [vmem:[%s6775_s30 + $0x1] ss:$0 sm:$0xff]  ;;  %v4284_v11 = vld [vmem:[%s6775_s30 + $0x7] ss:$0 sm:$0xff] }
 0xc8c   :  { %v2217_v15 = vmax.f32 %v2214_v12, 0.0  ;;  %v4275_v12 = vld [vmem:[%s6774_s24 + $0x40] ss:$0 sm:$0xff] }
 0xc8e   :  { %4813 = vmatpush3.msra.mxu0 %v2217_v15 }
 0xc8f   :  { %4815 = vmatmul.mubr.msk.f32.vlgmr.msra.gmra.mrb[16].mxu0 %vm2219_vm11, %v2218_v2  ;;  %5276 = vmatprep.subr.bf16.mxu0 %v5584_v3 }
 0xc90   :  { %4833 = vmatprep.mubr.msk.f32.mxu0 %vm5585_vm5, %v6205_v45  ;;  %5278 = vmatpush3.bf16.msra.mxu0 %v5277_v25 }
 0xc91   :  { %5279 = vmatprep.subr.bf16.mxu0 %v5584_v3 }
 0xc94   :  { %5281 = vmatpush3.bf16.msra.mxu0 %v5280_v27 }
 0xc95   :  { %5282 = vmatprep.subr.bf16.mxu0 %v5584_v3 }
 0xc98   :  { %5284 = vmatpush3.bf16.msra.mxu0 %v5283_v5 }
 0xc99   :  { %5285 = vmatprep.subr.bf16.mxu0 %v5584_v3 }
 0xc9c   :  { %5287 = vmatpush3.bf16.msra.mxu0 %v5286_v42 }
 0xc9d   :  { %5288 = vmatprep.subr.bf16.mxu0 %v5584_v3 }
 0xd62   :  { %v2289_v46 = vpop.f32.mrb[16].mxu0 }
 0xd63   :  { %2303 = vst.msk [vmem:[#allocation7 + $0x4] sm:$0xf0] %vm2302_vm12, %v2289_v46  ;;  %2297 = vrot.lane.b32.xlu1 %v2289_v46, %s5582_s29  ;;  %v4816_v20 = vpop.f32.mrb[17].mxu0 }
 0xd64   :  { %2306 = vst.msk [vmem:[#allocation7 + $0x12] sm:$0xf] %vm1900_vm6, %v2289_v46  ;;  %v4281_v46 = vld [vmem:[%s6775_s30 + $0x4] ss:$0 sm:$0xff]  ;;  %vm3673_vm6 = vcmask 517120  }
 0xd65   :  { %v2637_v20 = vld [vmem:[%s6776_s6] sm:$0xff] }
 0xd67   :  { %2359 = vrot.lane.b32.xlu1 %v4270_v21, %s5580_s21  ;;  %v2638_v21 = vld [vmem:[%s6776_s6 + $0x8] sm:$0xff] }
 0xd68   :  { %v5289_v22 = vpack.c.bf16 %v2638_v21, %v2637_v20 }
 0xd6a   :  { %v2314_v6 = vld [vmem:[#allocation7 + $0x6] sm:$0xf] }
 0xd6b   :  { %v2320_v41 = vmul.f32 %v4266_v44, %v2314_v6  ;;  %v2345_v38 = vld [vmem:[#allocation7 + $0x12] sm:$0xf]  ;;  %v2376_v28 = vld [vmem:[#allocation7 + $0x8] sm:$0xf] }
 0xd6c   :  { %v2351_v57 = vmul.f32 %v4269_v35, %v2345_v38  ;;  %v2382_v0 = vmul.f32 %v4272_v61, %v2376_v28  ;;  %v2651_v61 = vld [vmem:[%s6776_s6 + $0x70] sm:$0xff]  ;;  %v2652_v28 = vld [vmem:[%s6776_s6 + $0x78] sm:$0xff] }
 0xdd5   :  { %v2298_v36 = vpop.permute.xlu1 %2297 }
 0xdd6   :  { %2301 = vst.msk [vmem:[#allocation7 - $0x2] sm:$0xf0] %vm2300_vm13, %v2298_v36 }
 0xdd7   :  { %2305 = vst.msk [vmem:[#allocation7 + $0xc] sm:$0xf] %vm2304_vm14, %v2298_v36  ;;  %v2639_v36 = vld [vmem:[%s6776_s6 + $0x10] sm:$0xff] }
 0xdd8   :  { %v5292_v25 = vpack.c.bf16 %v2640_v24, %v2639_v36  ;;  %v4285_v24 = vld [vmem:[%s6775_s30 + $0x8] ss:$0 sm:$0xff] }
 0xdd9   :  { %v2360_v52 = vpop.permute.xlu1 %2359 }
 0xddd   :  { %v2307_v29 = vld [vmem:[#allocation7] sm:$0xf] }
 0xdde   :  { %v2337_v9 = vld [vmem:[#allocation7 + $0xc] sm:$0xf]  ;;  %v2331_v30 = vmul.f32 %v2329_v26, %v2307_v29  ;;  %v2368_v48 = vld [vmem:[#allocation7 + $0x2] sm:$0xf]  ;;  %v2313_v18 = vmul.f32 %v4265_v43, %v2307_v29  ;;  %v2641_v26 = vld [vmem:[%s6776_s6 + $0x20] sm:$0xff] }
 0xddf   :  { %v2362_v34 = vmul.f32 %v2360_v52, %v2337_v9  ;;  %v2393_v37 = vmul.f32 %v2391_v31, %v2368_v48  ;;  %v2343_v53 = vmul.f32 %v4268_v47, %v2337_v9  ;;  %v2374_v62 = vmul.f32 %v4271_v58, %v2368_v48  ;;  %v2642_v52 = vld [vmem:[%s6776_s6 + $0x28] sm:$0xff]  ;;  %v2644_v31 = vld [vmem:[%s6776_s6 + $0x38] sm:$0xff] }
 0xde0   :  { %2333 = vrot.lane.b32.xlu1 %v2331_v30, %s5582_s29  ;;  %v2321_v49 = vadd.f32 %v2320_v41, %v2313_v18  ;;  %v5295_v29 = vpack.c.bf16 %v2642_v52, %v2641_v26  ;;  %v2643_v30 = vld [vmem:[%s6776_s6 + $0x30] sm:$0xff] }
 0xde1   :  { %2364 = vrot.lane.b32.xlu0 %v2362_v34, %s5582_s29  ;;  %v5298_v48 = vpack.c.bf16 %v2644_v31, %v2643_v30 }
 0xde4   :  { %2395 = vrot.lane.b32.xlu1 %v2393_v37, %s5582_s29 }
 0xde8   :  { %2519 = vrot.lane.b32.xlu1 %v4278_v32, %s5586_s8  ;;  %v4282_v32 = vld [vmem:[%s6775_s30 + $0x5] ss:$0 sm:$0xff] }
 0xdec   :  { %2604 = vrot.lane.b32.xlu1 %v4284_v11, %s5586_s8 }
 0xe52   :  { %v2334_v51 = vpop.permute.xlu1 %2333 }
 0xe53   :  { %v2336_v55 = vadd.f32 %v2334_v51, %v2321_v49  ;;  %v2365_v60 = vpop.permute.xlu0 %2364 }
 0xe55   :  { %v2344_v56 = vadd.f32 %v2343_v53, %v2336_v55  ;;  %v2647_v55 = vld [vmem:[%s6776_s6 + $0x50] sm:$0xff] }
 0xe56   :  { %v2396_v7 = vpop.permute.xlu1 %2395 }
 0xe57   :  { %v2352_v59 = vadd.f32 %v2351_v57, %v2344_v56  ;;  %v2648_v56 = vld [vmem:[%s6776_s6 + $0x58] sm:$0xff]  ;;  %v2649_v57 = vld [vmem:[%s6776_s6 + $0x60] sm:$0xff] }
 0xe58   :  { %v5304_v58 = vpack.c.bf16 %v2648_v56, %v2647_v55  ;;  %v2875_v55 = vld [vmem:[%s6778_s2 + $0x20] sm:$0xff]  ;;  %v2876_v56 = vld [vmem:[%s6778_s2 + $0x28] sm:$0xff] }
 0xe59   :  { %v2367_v50 = vadd.f32 %v2365_v60, %v2352_v59  ;;  %v2650_v59 = vld [vmem:[%s6776_s6 + $0x68] sm:$0xff] }
 0xe5a   :  { %v2520_v34 = vpop.permute.xlu1 %2519  ;;  %v5307_v60 = vpack.c.bf16 %v2650_v59, %v2649_v57  ;;  %v5319_v57 = vpack.c.bf16 %v2876_v56, %v2875_v55  ;;  %v2877_v59 = vld [vmem:[%s6778_s2 + $0x30] sm:$0xff] }
 0xe5b   :  { %v2375_v63 = vadd.f32 %v2374_v62, %v2367_v50  ;;  %v5310_v62 = vpack.c.bf16 %v2652_v28, %v2651_v61  ;;  %v4277_v50 = vld [vmem:[%s6775_s30] ss:$0 sm:$0xff] }
 0xe5d   :  { %v2383_v1 = vadd.f32 %v2382_v0, %v2375_v63 }
 0xe5e   :  { %v2605_v43 = vpop.permute.xlu1 %2604 }
 0xe5f   :  { %v2398_v8 = vadd.f32 %v2396_v7, %v2383_v1  ;;  %v4280_v1 = vld [vmem:[%s6775_s30 + $0x3] ss:$0 sm:$0xff] }
 0xe61   :  { %v2404_v10 = vadd.f32 %v4274_v4, %v2398_v8  ;;  %v4279_v4 = vld [vmem:[%s6775_s30 + $0x2] ss:$0 sm:$0xff] }
 0xe63   :  { %v2405_v54 = vmax.f32 %v2404_v10, 0.0 }
 0xe65   :  { %4834 = vmatmul.mubr.msk.f32.vlgmr.msra.gmra.mrb[18].mxu0 %vm693_vm3, %v2405_v54 }
 0xe66   :  { %4868 = vmatprep.mubr.msk.f32.mxu0 %vm5585_vm5, %v6205_v45  ;;  %5290 = vmatpush3.bf16.msra.mxu0 %v5289_v22 }
 0xe67   :  { %5291 = vmatprep.subr.bf16.mxu0 %v5584_v3 }
 0xe6a   :  { %5293 = vmatpush3.bf16.msra.mxu0 %v5292_v25 }
 0xe6b   :  { %5294 = vmatprep.subr.bf16.mxu0 %v5584_v3 }
 0xe6e   :  { %5296 = vmatpush3.bf16.msra.mxu0 %v5295_v29 }
 0xe6f   :  { %5297 = vmatprep.subr.bf16.mxu0 %v5584_v3 }
 0xe72   :  { %5299 = vmatpush3.bf16.msra.mxu0 %v5298_v48 }
 0xe73   :  { %5300 = vmatprep.subr.bf16.mxu0 %v5584_v3 }
 0xe76   :  { %5302 = vmatpush3.bf16.msra.mxu0 %v5301_v23 }
 0xe77   :  { %5303 = vmatprep.subr.bf16.mxu0 %v5584_v3 }
 0xe7a   :  { %5305 = vmatpush3.bf16.msra.mxu0 %v5304_v58 }
 0xe7b   :  { %5306 = vmatprep.subr.bf16.mxu0 %v5584_v3 }
 0xe7e   :  { %5308 = vmatpush3.bf16.msra.mxu0 %v5307_v60  ;;  %v2878_v60 = vld [vmem:[%s6778_s2 + $0x38] sm:$0xff] }
 0xe7f   :  { %5309 = vmatprep.subr.bf16.mxu0 %v5584_v3  ;;  %v5322_v61 = vpack.c.bf16 %v2878_v60, %v2877_v59 }
 0xe82   :  { %5311 = vmatpush3.bf16.msra.mxu0 %v5310_v62 }
 0xe83   :  { %5336 = vmatprep.subr.bf16.mxu0 %v5584_v3 }
 0xf38   :  { %v2488_v13 = vpop.f32.mrb[18].mxu0 }
 0xf39   :  { %v2489_v15 = vadd.f32 %v4275_v12, %v2488_v13  ;;  %v4835_v2 = vpop.f32.mrb[19].mxu0 }
 0xf3a   :  { %v4283_v2 = vld [vmem:[%s6775_s30 + $0x6] ss:$0 sm:$0xff] }
 0xf3b   :  { %v2492_v16 = vmax.f32 %v2489_v15, 0.0 }
 0xf3d   :  { %v2496_v19 = vrot.slane %v2492_v16, 6 }
 0xf3f   :  { %2497 = vrot.lane.b32.xlu0 %v2496_v19, %s5586_s8 }
 0xf43   :  { %2559 = vrot.lane.b32.xlu0 %v4281_v46, %s5586_s8 }
 0xfb1   :  { %v2498_v9 = vpop.permute.xlu0 %2497 }
 0xfb2   :  { %2501 = vst.msk [vmem:[#allocation8] sm:$0x3c] %vm2500_vm15, %v2498_v9 }
 0xfb3   :  { %2503 = vst.msk [vmem:[#allocation8 + $0x8] sm:$0x3c] %vm2502_vm0, %v2498_v9 }
 0xfb5   :  { %v2560_v37 = vpop.permute.xlu0 %2559 }
 0xfb9   :  { %v2511_v14 = vld [vmem:[#allocation8] sm:$0xf]  ;;  %v2596_v44 = vld [vmem:[#allocation8] sm:$0xf0] }
 0xfba   :  { %v2512_v27 = vld [vmem:[#allocation8 + $0x8] sm:$0xf]  ;;  %v2522_v5 = vmul.f32 %v2520_v34, %v2511_v14  ;;  %v2551_v40 = vld [vmem:[#allocation8] sm:$0x3c]  ;;  %v2597_v6 = vld [vmem:[#allocation8 + $0x8] sm:$0xf0]  ;;  %v2607_v47 = vmul.f32 %v2605_v43, %v2596_v44 }
 0xfbb   :  { %v2523_v39 = vmul.f32 %v2520_v34, %v2512_v27  ;;  %v2552_v42 = vld [vmem:[#allocation8 + $0x8] sm:$0x3c]  ;;  %v2562_v18 = vmul.f32 %v2560_v37, %v2551_v40  ;;  %v2608_v49 = vmul.f32 %v2605_v43, %v2597_v6  ;;  %v2504_v63 = vld [vmem:[#allocation8] sm:$0xf]  ;;  %v2538_v12 = vmul.f32 %v4279_v4, %v2512_v27  ;;  %v2585_v15 = vld [vmem:[#allocation8] sm:$0xf0] }
 0xfbc   :  { %v2563_v41 = vmul.f32 %v2560_v37, %v2552_v42  ;;  %2526 = vrot.lane.b32.xlu0 %v2522_v5, %s5586_s8  ;;  %v2611_v38 = vrot.slane %v2607_v47, 4  ;;  %v2540_v0 = vld [vmem:[#allocation8] sm:$0x3c]  ;;  %v2510_v8 = vmul.f32 %v4277_v50, %v2504_v63  ;;  %v2580_v16 = vmul.f32 %v4282_v32, %v2552_v42  ;;  %v4286_v14 = vld [vmem:[%s6775_s30 + $0x9] ss:$0 sm:$0xff] }
 0xfbd   :  { %2528 = vrot.lane.b32.xlu1 %v2523_v39, %s5586_s8  ;;  %v2566_v51 = vrot.slane %v2562_v18, 2  ;;  %v2612_v53 = vrot.slane %v2608_v49, 4  ;;  %v2546_v54 = vmul.f32 %v4280_v1, %v2540_v0  ;;  %v2591_v22 = vmul.f32 %v4283_v2, %v2585_v15  ;;  %v4289_v39 = vld [vmem:[%s6777_s1 + $0x1] ss:$0 sm:$0xff]  ;;  %v4295_v40 = vld [vmem:[%s6777_s1 + $0x7] ss:$0 sm:$0xff] }
 0xfbe   :  { %v2567_v35 = vrot.slane %v2563_v41, 2  ;;  %v2582_v26 = vrot.slane %v2580_v16, 2  ;;  %v2625_v29 = vmul.f32 %v4285_v24, %v2597_v6  ;;  %v4287_v42 = vld [vmem:[%s6776_s6 + $0x80] ss:$0 sm:$0xff]  ;;  %v4292_v47 = vld [vmem:[%s6777_s1 + $0x4] ss:$0 sm:$0xff] }
 0xfbf   :  { %v2548_v20 = vrot.slane %v2546_v54, 2  ;;  %v2593_v31 = vrot.slane %v2591_v22, 4  ;;  %v2872_v49 = vld [vmem:[%s6778_s2 + $0x8] sm:$0xff]  ;;  %v2879_v50 = vld [vmem:[%s6778_s2 + $0x40] sm:$0xff]  ;;  %v2882_v22 = vld [vmem:[%s6778_s2 + $0x58] sm:$0xff] }
 0xfc0   :  { %2568 = vrot.lane.b32.xlu0 %v2566_v51, %s5586_s8  ;;  %v2627_v17 = vrot.slane %v2625_v29, 4  ;;  %v2873_v51 = vld [vmem:[%s6778_s2 + $0x10] sm:$0xff]  ;;  %v2880_v63 = vld [vmem:[%s6778_s2 + $0x48] sm:$0xff]  ;;  %v2883_v24 = vld [vmem:[%s6778_s2 + $0x60] sm:$0xff] }
 0xfc1   :  { %2570 = vrot.lane.b32.xlu1 %v2567_v35, %s5586_s8  ;;  %v5325_v4 = vpack.c.bf16 %v2880_v63, %v2879_v50  ;;  %v2885_v29 = vld [vmem:[%s6778_s2 + $0x70] sm:$0xff]  ;;  %v4297_v63 = vld [vmem:[%s6777_s1 + $0x9] ss:$0 sm:$0xff] }
 0xfc4   :  { %2613 = vrot.lane.b32.xlu0 %v2611_v38, %s5586_s8  ;;  %v2874_v38 = vld [vmem:[%s6778_s2 + $0x18] sm:$0xff] }
 0xfc5   :  { %2615 = vrot.lane.b32.xlu1 %v2612_v53, %s5586_s8  ;;  %v5316_v53 = vpack.c.bf16 %v2874_v38, %v2873_v51 }
 0xfc9   :  { %2753 = vrot.lane.b32.xlu1 %v4289_v39, %s5586_s8 }
 0xfcd   :  { %2838 = vrot.lane.b32.xlu1 %v4295_v40, %s5586_s8 }
0x102e   :  { %v2527_v10 = vpop.permute.xlu0 %2526 }
0x102f   :  { %v2529_v7 = vpop.permute.xlu1 %2528 }
0x1030   :  { %v2530_v11 = vsel %vm693_vm3, %v2527_v10, %v2529_v7 }
0x1031   :  { %v2532_v13 = vadd.f32 %v2530_v11, %v2510_v8 }
0x1032   :  { %v2569_v21 = vpop.permute.xlu0 %2568 }
0x1033   :  { %v2539_v19 = vadd.f32 %v2538_v12, %v2532_v13  ;;  %v2571_v46 = vpop.permute.xlu1 %2570 }
0x1034   :  { %v2572_v25 = vsel %vm693_vm3, %v2569_v21, %v2571_v46 }
0x1035   :  { %v2550_v36 = vadd.f32 %v2548_v20, %v2539_v19 }
0x1036   :  { %v2614_v48 = vpop.permute.xlu0 %2613 }
0x1037   :  { %v2574_v52 = vadd.f32 %v2572_v25, %v2550_v36  ;;  %v2616_v30 = vpop.permute.xlu1 %2615  ;;  %v2881_v36 = vld [vmem:[%s6778_s2 + $0x50] sm:$0xff] }
0x1038   :  { %v2617_v37 = vsel %vm693_vm3, %v2614_v48, %v2616_v30  ;;  %v5328_v25 = vpack.c.bf16 %v2882_v22, %v2881_v36  ;;  %v3109_v22 = vld [vmem:[%s6780_s10 + $0x20] sm:$0xff] }
0x1039   :  { %v2584_v9 = vadd.f32 %v2582_v26, %v2574_v52  ;;  %v2884_v26 = vld [vmem:[%s6778_s2 + $0x68] sm:$0xff] }
0x103a   :  { %v5331_v52 = vpack.c.bf16 %v2884_v26, %v2883_v24  ;;  %v3110_v24 = vld [vmem:[%s6780_s10 + $0x28] sm:$0xff] }
0x103b   :  { %v2595_v34 = vadd.f32 %v2593_v31, %v2584_v9  ;;  %v2754_v28 = vpop.permute.xlu1 %2753  ;;  %v2886_v9 = vld [vmem:[%s6778_s2 + $0x78] sm:$0xff]  ;;  %v4288_v31 = vld [vmem:[%s6777_s1] ss:$0 sm:$0xff] }
0x103c   :  { %v5334_v30 = vpack.c.bf16 %v2886_v9, %v2885_v29  ;;  %v3112_v29 = vld [vmem:[%s6780_s10 + $0x38] sm:$0xff] }
0x103d   :  { %v2619_v33 = vadd.f32 %v2617_v37, %v2595_v34  ;;  %v4291_v37 = vld [vmem:[%s6777_s1 + $0x3] ss:$0 sm:$0xff] }
0x103f   :  { %v2629_v27 = vadd.f32 %v2627_v17, %v2619_v33  ;;  %v2839_v32 = vpop.permute.xlu1 %2838  ;;  %v4290_v17 = vld [vmem:[%s6777_s1 + $0x2] ss:$0 sm:$0xff] }
0x1041   :  { %v2635_v23 = vadd.f32 %v4286_v14, %v2629_v27 }
0x1043   :  { %v2636_v5 = vmax.f32 %v2635_v23, 0.0 }
0x1045   :  { %4869 = vmatmul.mubr.f32.vlgmr.msra.gmra.mrb[20].mxu0 %v2636_v5  ;;  %v4293_v5 = vld [vmem:[%s6777_s1 + $0x5] ss:$0 sm:$0xff] }
0x1046   :  { %4938 = vmatprep.mubr.msk.f32.mxu0 %vm5585_vm5, %v6205_v45  ;;  %v2871_v45 = vld [vmem:[%s6778_s2] sm:$0xff] }
0x1047   :  { %v5313_v35 = vpack.c.bf16 %v2872_v49, %v2871_v45 }
0x1049   :  { %5314 = vmatpush3.bf16.msra.mxu1 %v5313_v35  ;;  %v4296_v35 = vld [vmem:[%s6777_s1 + $0x8] ss:$0 sm:$0xff] }
0x104a   :  { %5315 = vmatprep.subr.bf16.mxu1 %v5584_v3 }
0x104d   :  { %5317 = vmatpush3.bf16.msra.mxu1 %v5316_v53 }
0x104e   :  { %5318 = vmatprep.subr.bf16.mxu1 %v5584_v3 }
0x1051   :  { %5320 = vmatpush3.bf16.msra.mxu1 %v5319_v57 }
0x1052   :  { %5321 = vmatprep.subr.bf16.mxu1 %v5584_v3 }
0x1055   :  { %5323 = vmatpush3.bf16.msra.mxu1 %v5322_v61 }
0x1056   :  { %5324 = vmatprep.subr.bf16.mxu1 %v5584_v3 }
0x1059   :  { %5326 = vmatpush3.bf16.msra.mxu1 %v5325_v4 }
0x105a   :  { %5327 = vmatprep.subr.bf16.mxu1 %v5584_v3 }
0x105d   :  { %5329 = vmatpush3.bf16.msra.mxu1 %v5328_v25  ;;  %v5343_v25 = vpack.c.bf16 %v3110_v24, %v3109_v22 }
0x105e   :  { %5330 = vmatprep.subr.bf16.mxu1 %v5584_v3 }
0x1061   :  { %5332 = vmatpush3.bf16.msra.mxu1 %v5331_v52  ;;  %v3111_v52 = vld [vmem:[%s6780_s10 + $0x30] sm:$0xff] }
0x1062   :  { %5333 = vmatprep.subr.bf16.mxu1 %v5584_v3  ;;  %v5346_v9 = vpack.c.bf16 %v3112_v29, %v3111_v52 }
0x1065   :  { %5335 = vmatpush3.bf16.msra.mxu1 %v5334_v30 }
0x1066   :  { %5360 = vmatprep.subr.bf16.mxu1 %v5584_v3 }
0x1118   :  { %v2724_v43 = vpop.f32.mrb[20].mxu0 }
0x1119   :  { %v2725_v44 = vadd.f32 %v4287_v42, %v2724_v43  ;;  %v4870_v6 = vpop.f32.mrb[21].mxu0 }
0x111b   :  { %v2728_v18 = vmax.f32 %v2725_v44, 0.0  ;;  %v4294_v44 = vld [vmem:[%s6777_s1 + $0x6] ss:$0 sm:$0xff] }
0x111d   :  { %v2732_v41 = vrot.slane %v2728_v18, 6 }
0x111f   :  { %2733 = vrot.lane.b32.xlu0 %v2732_v41, %s5586_s8 }
0x1123   :  { %2793 = vrot.lane.b32.xlu0 %v4292_v47, %s5586_s8 }
0x1191   :  { %v2734_v58 = vpop.permute.xlu0 %2733 }
0x1192   :  { %2736 = vst.msk [vmem:[#allocation9] sm:$0x3c] %vm2500_vm15, %v2734_v58 }
0x1193   :  { %2737 = vst.msk [vmem:[#allocation9 + $0x8] sm:$0x3c] %vm2502_vm0, %v2734_v58 }
0x1195   :  { %v2794_v62 = vpop.permute.xlu0 %2793 }
0x1199   :  { %v2745_v0 = vld [vmem:[#allocation9] sm:$0xf]  ;;  %v2830_v11 = vld [vmem:[#allocation9] sm:$0xf0] }
0x119a   :  { %v2746_v1 = vld [vmem:[#allocation9 + $0x8] sm:$0xf]  ;;  %v2756_v7 = vmul.f32 %v2754_v28, %v2745_v0  ;;  %v2785_v10 = vld [vmem:[#allocation9] sm:$0x3c]  ;;  %v2831_v12 = vld [vmem:[#allocation9 + $0x8] sm:$0xf0]  ;;  %v2841_v2 = vmul.f32 %v2839_v32, %v2830_v11 }
0x119b   :  { %v2757_v8 = vmul.f32 %v2754_v28, %v2746_v1  ;;  %v2786_v54 = vld [vmem:[#allocation9 + $0x8] sm:$0x3c]  ;;  %v2796_v13 = vmul.f32 %v2794_v62, %v2785_v10  ;;  %v2842_v16 = vmul.f32 %v2839_v32, %v2831_v12  ;;  %v2738_v48 = vld [vmem:[#allocation9] sm:$0xf]  ;;  %v2772_v40 = vmul.f32 %v4290_v17, %v2746_v1  ;;  %v2819_v43 = vld [vmem:[#allocation9] sm:$0xf0] }
0x119c   :  { %v2797_v15 = vmul.f32 %v2794_v62, %v2786_v54  ;;  %2760 = vrot.lane.b32.xlu0 %v2756_v7, %s5586_s8  ;;  %v2845_v20 = vrot.slane %v2841_v2, 4  ;;  %v2774_v34 = vld [vmem:[#allocation9] sm:$0x3c]  ;;  %v2744_v14 = vmul.f32 %v4288_v31, %v2738_v48  ;;  %v2814_v6 = vmul.f32 %v4293_v5, %v2786_v54  ;;  %v6483_v7 = vld [vmem:[#allocation10] sm:$0xff] }
0x119d   :  { %2762 = vrot.lane.b32.xlu1 %v2757_v8, %s5586_s8  ;;  %v2800_v19 = vrot.slane %v2796_v13, 2  ;;  %v2846_v21 = vrot.slane %v2842_v16, 4  ;;  %v2780_v23 = vmul.f32 %v4291_v37, %v2774_v34  ;;  %v2825_v51 = vmul.f32 %v4294_v44, %v2819_v43  ;;  %v4300_v8 = vld [vmem:[%s6779_s7 + $0x1] ss:$0 sm:$0xff]  ;;  %v4306_v10 = vld [vmem:[%s6779_s7 + $0x7] ss:$0 sm:$0xff] }
0x119e   :  { %v2801_v46 = vrot.slane %v2797_v15, 2  ;;  %v2816_v53 = vrot.slane %v2814_v6, 2  ;;  %v2859_v56 = vmul.f32 %v4296_v35, %v2831_v12  ;;  %v4298_v54 = vld [vmem:[%s6778_s2 + $0x80] ss:$0 sm:$0xff]  ;;  %v4303_v2 = vld [vmem:[%s6779_s7 + $0x4] ss:$0 sm:$0xff] }
0x119f   :  { %v2782_v47 = vrot.slane %v2780_v23, 2  ;;  %v2827_v59 = vrot.slane %v2825_v51, 4  ;;  %v3105_v16 = vld [vmem:[%s6780_s10] sm:$0xff]  ;;  %v3114_v34 = vld [vmem:[%s6780_s10 + $0x48] sm:$0xff]  ;;  %v3115_v51 = vld [vmem:[%s6780_s10 + $0x50] sm:$0xff] }
0x11a0   :  { %2802 = vrot.lane.b32.xlu0 %v2800_v19, %s5586_s8  ;;  %v2861_v62 = vrot.slane %v2859_v56, 4  ;;  %v3106_v19 = vld [vmem:[%s6780_s10 + $0x8] sm:$0xff]  ;;  %v3113_v48 = vld [vmem:[%s6780_s10 + $0x40] sm:$0xff]  ;;  %v3116_v35 = vld [vmem:[%s6780_s10 + $0x58] sm:$0xff] }
0x11a1   :  { %2804 = vrot.lane.b32.xlu1 %v2801_v46, %s5586_s8  ;;  %v3107_v46 = vld [vmem:[%s6780_s10 + $0x10] sm:$0xff] }
0x11a4   :  { %2847 = vrot.lane.b32.xlu0 %v2845_v20, %s5586_s8  ;;  %v5337_v20 = vpack.c.bf16 %v3106_v19, %v3105_v16 }
0x11a5   :  { %2849 = vrot.lane.b32.xlu1 %v2846_v21, %s5586_s8  ;;  %v3108_v21 = vld [vmem:[%s6780_s10 + $0x18] sm:$0xff] }
0x11a6   :  { %5338 = vmatpush3.bf16.msra.mxu0 %v5337_v20  ;;  %v5340_v36 = vpack.c.bf16 %v3108_v21, %v3107_v46  ;;  %v4307_v21 = vld [vmem:[%s6779_s7 + $0x8] ss:$0 sm:$0xff] }
0x11a7   :  { %5339 = vmatprep.subr.bf16.mxu0 %v5584_v3 }
0x11a9   :  { %2987 = vrot.lane.b32.xlu1 %v4300_v8, %s5586_s8  ;;  %v4304_v8 = vld [vmem:[%s6779_s7 + $0x5] ss:$0 sm:$0xff] }
0x11aa   :  { %5341 = vmatpush3.bf16.msra.mxu0 %v5340_v36 }
0x11ab   :  { %5342 = vmatprep.subr.bf16.mxu0 %v5584_v3 }
0x11ad   :  { %3072 = vrot.lane.b32.xlu1 %v4306_v10, %s5586_s8 }
0x11ae   :  { %5344 = vmatpush3.bf16.msra.mxu0 %v5343_v25 }
0x11af   :  { %5345 = vmatprep.subr.bf16.mxu0 %v5584_v3 }
0x11b2   :  { %5347 = vmatpush3.bf16.msra.mxu0 %v5346_v9 }
0x11b3   :  { %5348 = vmatprep.subr.bf16.mxu0 %v5584_v3 }
0x120e   :  { %v2761_v27 = vpop.permute.xlu0 %2760 }
0x120f   :  { %v2763_v33 = vpop.permute.xlu1 %2762 }
0x1210   :  { %v2764_v39 = vsel %vm693_vm3, %v2761_v27, %v2763_v33  ;;  %v5349_v33 = vpack.c.bf16 %v3114_v34, %v3113_v48 }
0x1211   :  { %v2766_v42 = vadd.f32 %v2764_v39, %v2744_v14 }
0x1212   :  { %v2803_v45 = vpop.permute.xlu0 %2802  ;;  %5350 = vmatpush3.bf16.msra.mxu0 %v5349_v33 }
0x1213   :  { %v2773_v18 = vadd.f32 %v2772_v40, %v2766_v42  ;;  %v2805_v41 = vpop.permute.xlu1 %2804  ;;  %5351 = vmatprep.subr.bf16.mxu0 %v5584_v3 }
0x1214   :  { %v2806_v38 = vsel %vm693_vm3, %v2803_v45, %v2805_v41 }
0x1215   :  { %v2784_v49 = vadd.f32 %v2782_v47, %v2773_v18 }
0x1216   :  { %v2848_v60 = vpop.permute.xlu0 %2847 }
0x1217   :  { %v2808_v55 = vadd.f32 %v2806_v38, %v2784_v49  ;;  %v2850_v58 = vpop.permute.xlu1 %2849  ;;  %v3117_v38 = vld [vmem:[%s6780_s10 + $0x60] sm:$0xff] }
0x1218   :  { %v2851_v28 = vsel %vm693_vm3, %v2848_v60, %v2850_v58  ;;  %v3120_v58 = vld [vmem:[%s6780_s10 + $0x78] sm:$0xff]  ;;  %v4299_v60 = vld [vmem:[%s6779_s7] ss:$0 sm:$0xff] }
0x1219   :  { %v2818_v57 = vadd.f32 %v2816_v53, %v2808_v55  ;;  %v5352_v53 = vpack.c.bf16 %v3116_v35, %v3115_v51  ;;  %v3118_v55 = vld [vmem:[%s6780_s10 + $0x68] sm:$0xff]  ;;  %v3343_v35 = vld [vmem:[%s6782_s15 + $0x20] sm:$0xff] }
0x121a   :  { %v5355_v56 = vpack.c.bf16 %v3118_v55, %v3117_v38  ;;  %v3344_v38 = vld [vmem:[%s6782_s15 + $0x28] sm:$0xff] }
0x121b   :  { %v2829_v61 = vadd.f32 %v2827_v59, %v2818_v57  ;;  %v2988_v30 = vpop.permute.xlu1 %2987  ;;  %5353 = vmatpush3.bf16.msra.mxu0 %v5352_v53  ;;  %v3119_v57 = vld [vmem:[%s6780_s10 + $0x70] sm:$0xff]  ;;  %v5367_v53 = vpack.c.bf16 %v3344_v38, %v3343_v35 }
0x121c   :  { %5354 = vmatprep.subr.bf16.mxu0 %v5584_v3  ;;  %v5358_v59 = vpack.c.bf16 %v3120_v58, %v3119_v57  ;;  %v3346_v57 = vld [vmem:[%s6782_s15 + $0x38] sm:$0xff] }
0x121d   :  { %v2853_v50 = vadd.f32 %v2851_v28, %v2829_v61 }
0x121f   :  { %v2863_v0 = vadd.f32 %v2861_v62, %v2853_v50  ;;  %v3073_v39 = vpop.permute.xlu1 %3072  ;;  %5356 = vmatpush3.bf16.msra.mxu0 %v5355_v56  ;;  %v4302_v62 = vld [vmem:[%s6779_s7 + $0x3] ss:$0 sm:$0xff]  ;;  %v4301_v50 = vld [vmem:[%s6779_s7 + $0x2] ss:$0 sm:$0xff]  ;;  %v3345_v56 = vld [vmem:[%s6782_s15 + $0x30] sm:$0xff] }
0x1220   :  { %5357 = vmatprep.subr.bf16.mxu0 %v5584_v3  ;;  %v5370_v58 = vpack.c.bf16 %v3346_v57, %v3345_v56 }
0x1221   :  { %v2869_v1 = vadd.f32 %v4297_v63, %v2863_v0 }
0x1223   :  { %v2870_v4 = vmax.f32 %v2869_v1, 0.0  ;;  %5359 = vmatpush3.bf16.msra.mxu0 %v5358_v59 }
0x1224   :  { %5384 = vmatprep.subr.bf16.mxu0 %v5584_v3 }
0x1225   :  { %4904 = vmatmul.mubr.f32.vlgmr.msra.gmra.mrb[18].mxu1 %v2870_v4 }
0x1226   :  { %4973 = vmatprep.mubr.msk.f32.mxu1 %vm5585_vm5, %v6483_v7 }
0x12f8   :  { %v2958_v32 = vpop.f32.mrb[18].mxu1 }
0x12f9   :  { %v2959_v11 = vadd.f32 %v4298_v54, %v2958_v32  ;;  %v4905_v12 = vpop.f32.mrb[19].mxu1 }
0x12fa   :  { %v4305_v12 = vld [vmem:[%s6779_s7 + $0x6] ss:$0 sm:$0xff] }
0x12fb   :  { %v2962_v13 = vmax.f32 %v2959_v11, 0.0 }
0x12fd   :  { %v2966_v15 = vrot.slane %v2962_v13, 6 }
0x12ff   :  { %2967 = vrot.lane.b32.xlu0 %v2966_v15, %s5586_s8 }
0x1303   :  { %3027 = vrot.lane.b32.xlu0 %v4303_v2, %s5586_s8 }
0x1371   :  { %v2968_v26 = vpop.permute.xlu0 %2967 }
0x1372   :  { %2970 = vst.msk [vmem:[#allocation10] sm:$0x3c] %vm2500_vm15, %v2968_v26 }
0x1373   :  { %2971 = vst.msk [vmem:[#allocation10 + $0x8] sm:$0x3c] %vm2502_vm0, %v2968_v26 }
0x1375   :  { %v3028_v31 = vpop.permute.xlu0 %3027 }
0x1379   :  { %v2979_v37 = vld [vmem:[#allocation10] sm:$0xf]  ;;  %v3064_v40 = vld [vmem:[#allocation10] sm:$0xf0] }
0x137a   :  { %v2980_v17 = vld [vmem:[#allocation10 + $0x8] sm:$0xf]  ;;  %v2990_v14 = vmul.f32 %v2988_v30, %v2979_v37  ;;  %v3019_v23 = vld [vmem:[#allocation10] sm:$0x3c]  ;;  %v3065_v42 = vld [vmem:[#allocation10 + $0x8] sm:$0xf0]  ;;  %v3075_v6 = vmul.f32 %v3073_v39, %v3064_v40 }
0x137b   :  { %v2991_v27 = vmul.f32 %v2988_v30, %v2980_v17  ;;  %v3020_v5 = vld [vmem:[#allocation10 + $0x8] sm:$0x3c]  ;;  %v3030_v43 = vmul.f32 %v3028_v31, %v3019_v23  ;;  %v3076_v18 = vmul.f32 %v3073_v39, %v3065_v42  ;;  %v2972_v61 = vld [vmem:[#allocation10] sm:$0xf]  ;;  %v3006_v54 = vmul.f32 %v4301_v50, %v2980_v17  ;;  %v3053_v11 = vld [vmem:[#allocation10] sm:$0xf0] }
0x137c   :  { %v3031_v44 = vmul.f32 %v3028_v31, %v3020_v5  ;;  %2994 = vrot.lane.b32.xlu0 %v2990_v14, %s5586_s8  ;;  %v3079_v45 = vrot.slane %v3075_v6, 4  ;;  %v3008_v28 = vld [vmem:[#allocation10] sm:$0x3c]  ;;  %v2978_v0 = vmul.f32 %v4299_v60, %v2972_v61  ;;  %v3048_v13 = vmul.f32 %v4304_v8, %v3020_v5  ;;  %v4308_v37 = vld [vmem:[%s6779_s7 + $0x9] ss:$0 sm:$0xff] }
0x137d   :  { %2996 = vrot.lane.b32.xlu1 %v2991_v27, %s5586_s8  ;;  %v3034_v41 = vrot.slane %v3030_v43, 2  ;;  %v3080_v49 = vrot.slane %v3076_v18, 4  ;;  %v3014_v4 = vmul.f32 %v4302_v62, %v3008_v28  ;;  %v3059_v20 = vmul.f32 %v4305_v12, %v3053_v11  ;;  %v4311_v27 = vld [vmem:[%s6781_s11 + $0x1] ss:$0 sm:$0xff]  ;;  %v4317_v23 = vld [vmem:[%s6781_s11 + $0x7] ss:$0 sm:$0xff] }
0x137e   :  { %v3035_v47 = vrot.slane %v3031_v44, 2  ;;  %v3050_v22 = vrot.slane %v3048_v13, 2  ;;  %v3093_v25 = vmul.f32 %v4307_v21, %v3065_v42  ;;  %v4309_v5 = vld [vmem:[%s6780_s10 + $0x80] ss:$0 sm:$0xff]  ;;  %v4314_v6 = vld [vmem:[%s6781_s11 + $0x4] ss:$0 sm:$0xff] }
0x137f   :  { %v3016_v16 = vrot.slane %v3014_v4, 2  ;;  %v3061_v29 = vrot.slane %v3059_v20, 4  ;;  %v3339_v18 = vld [vmem:[%s6782_s15] sm:$0xff]  ;;  %v3348_v28 = vld [vmem:[%s6782_s15 + $0x48] sm:$0xff]  ;;  %v3349_v20 = vld [vmem:[%s6782_s15 + $0x50] sm:$0xff] }
0x1380   :  { %3036 = vrot.lane.b32.xlu0 %v3034_v41, %s5586_s8  ;;  %v3095_v48 = vrot.slane %v3093_v25, 4  ;;  %v3340_v41 = vld [vmem:[%s6782_s15 + $0x8] sm:$0xff]  ;;  %v3347_v61 = vld [vmem:[%s6782_s15 + $0x40] sm:$0xff]  ;;  %v3350_v21 = vld [vmem:[%s6782_s15 + $0x58] sm:$0xff] }
0x1381   :  { %3038 = vrot.lane.b32.xlu1 %v3035_v47, %s5586_s8  ;;  %v3341_v47 = vld [vmem:[%s6782_s15 + $0x10] sm:$0xff] }
0x1384   :  { %3081 = vrot.lane.b32.xlu0 %v3079_v45, %s5586_s8  ;;  %v5361_v45 = vpack.c.bf16 %v3340_v41, %v3339_v18 }
0x1385   :  { %3083 = vrot.lane.b32.xlu1 %v3080_v49, %s5586_s8  ;;  %v3342_v49 = vld [vmem:[%s6782_s15 + $0x18] sm:$0xff] }
0x1386   :  { %5362 = vmatpush3.bf16.msra.mxu1 %v5361_v45  ;;  %v5364_v51 = vpack.c.bf16 %v3342_v49, %v3341_v47  ;;  %v4318_v49 = vld [vmem:[%s6781_s11 + $0x8] ss:$0 sm:$0xff] }
0x1387   :  { %5363 = vmatprep.subr.bf16.mxu1 %v5584_v3 }
0x1389   :  { %3221 = vrot.lane.b32.xlu1 %v4311_v27, %s5586_s8  ;;  %v4315_v27 = vld [vmem:[%s6781_s11 + $0x5] ss:$0 sm:$0xff] }
0x138a   :  { %5365 = vmatpush3.bf16.msra.mxu1 %v5364_v51 }
0x138b   :  { %5366 = vmatprep.subr.bf16.mxu1 %v5584_v3 }
0x138d   :  { %3306 = vrot.lane.b32.xlu1 %v4317_v23, %s5586_s8 }
0x138e   :  { %5368 = vmatpush3.bf16.msra.mxu1 %v5367_v53 }
0x138f   :  { %5369 = vmatprep.subr.bf16.mxu1 %v5584_v3 }
0x1392   :  { %5371 = vmatpush3.bf16.msra.mxu1 %v5370_v58 }
0x1393   :  { %5372 = vmatprep.subr.bf16.mxu1 %v5584_v3 }
0x13ee   :  { %v2995_v1 = vpop.permute.xlu0 %2994 }
0x13ef   :  { %v2997_v63 = vpop.permute.xlu1 %2996 }
0x13f0   :  { %v2998_v10 = vsel %vm693_vm3, %v2995_v1, %v2997_v63  ;;  %v5373_v63 = vpack.c.bf16 %v3348_v28, %v3347_v61 }
0x13f1   :  { %v3000_v32 = vadd.f32 %v2998_v10, %v2978_v0 }
0x13f2   :  { %v3037_v19 = vpop.permute.xlu0 %3036  ;;  %5374 = vmatpush3.bf16.msra.mxu1 %v5373_v63 }
0x13f3   :  { %v3007_v15 = vadd.f32 %v3006_v54, %v3000_v32  ;;  %v3039_v2 = vpop.permute.xlu1 %3038  ;;  %5375 = vmatprep.subr.bf16.mxu1 %v5584_v3 }
0x13f4   :  { %v3040_v36 = vsel %vm693_vm3, %v3037_v19, %v3039_v2 }
0x13f5   :  { %v3018_v46 = vadd.f32 %v3016_v16, %v3007_v15 }
0x13f6   :  { %v3082_v9 = vpop.permute.xlu0 %3081 }
0x13f7   :  { %v3042_v24 = vadd.f32 %v3040_v36, %v3018_v46  ;;  %v3084_v52 = vpop.permute.xlu1 %3083  ;;  %v3351_v36 = vld [vmem:[%s6782_s15 + $0x60] sm:$0xff] }
0x13f8   :  { %v3085_v31 = vsel %vm693_vm3, %v3082_v9, %v3084_v52  ;;  %v3354_v52 = vld [vmem:[%s6782_s15 + $0x78] sm:$0xff]  ;;  %v4310_v9 = vld [vmem:[%s6781_s11] ss:$0 sm:$0xff] }
0x13f9   :  { %v3052_v26 = vadd.f32 %v3050_v22, %v3042_v24  ;;  %v5376_v22 = vpack.c.bf16 %v3350_v21, %v3349_v20  ;;  %v3352_v24 = vld [vmem:[%s6782_s15 + $0x68] sm:$0xff]  ;;  %v3577_v21 = vld [vmem:[%s6784_s18 + $0x20] sm:$0xff] }
0x13fa   :  { %v5379_v25 = vpack.c.bf16 %v3352_v24, %v3351_v36  ;;  %v3578_v36 = vld [vmem:[%s6784_s18 + $0x28] sm:$0xff] }
0x13fb   :  { %v3063_v30 = vadd.f32 %v3061_v29, %v3052_v26  ;;  %v3222_v59 = vpop.permute.xlu1 %3221  ;;  %5377 = vmatpush3.bf16.msra.mxu1 %v5376_v22  ;;  %v3353_v26 = vld [vmem:[%s6782_s15 + $0x70] sm:$0xff]  ;;  %v5391_v22 = vpack.c.bf16 %v3578_v36, %v3577_v21  ;;  %v4329_v36 = vld [vmem:[%s6783_s16 + $0x8] ss:$0 sm:$0xff] }
0x13fc   :  { %5378 = vmatprep.subr.bf16.mxu1 %v5584_v3  ;;  %v5382_v29 = vpack.c.bf16 %v3354_v52, %v3353_v26  ;;  %v3580_v26 = vld [vmem:[%s6784_s18 + $0x38] sm:$0xff] }
0x13fd   :  { %v3087_v34 = vadd.f32 %v3085_v31, %v3063_v30 }
0x13ff   :  { %v3097_v17 = vadd.f32 %v3095_v48, %v3087_v34  ;;  %v3307_v10 = vpop.permute.xlu1 %3306  ;;  %5380 = vmatpush3.bf16.msra.mxu1 %v5379_v25  ;;  %v4313_v48 = vld [vmem:[%s6781_s11 + $0x3] ss:$0 sm:$0xff]  ;;  %v4312_v34 = vld [vmem:[%s6781_s11 + $0x2] ss:$0 sm:$0xff]  ;;  %v3579_v25 = vld [vmem:[%s6784_s18 + $0x30] sm:$0xff] }
0x1400   :  { %5381 = vmatprep.subr.bf16.mxu1 %v5584_v3  ;;  %v5394_v52 = vpack.c.bf16 %v3580_v26, %v3579_v25 }
0x1401   :  { %v3103_v33 = vadd.f32 %v4308_v37, %v3097_v17 }
0x1403   :  { %v3104_v14 = vmax.f32 %v3103_v33, 0.0  ;;  %5383 = vmatpush3.bf16.msra.mxu1 %v5382_v29 }
0x1404   :  { %5408 = vmatprep.subr.bf16.mxu1 %v5584_v3 }
0x1405   :  { %4939 = vmatmul.mubr.f32.vlgmr.msra.gmra.mrb[22].mxu0 %v3104_v14 }
0x1406   :  { %5008 = vmatprep.mubr.msk.f32.mxu0 %vm5585_vm5, %v6483_v7 }
0x14d8   :  { %v3192_v39 = vpop.f32.mrb[22].mxu0 }
0x14d9   :  { %v3193_v40 = vadd.f32 %v4309_v5, %v3192_v39  ;;  %v4940_v42 = vpop.f32.mrb[23].mxu0 }
0x14da   :  { %v4316_v42 = vld [vmem:[%s6781_s11 + $0x6] ss:$0 sm:$0xff] }
0x14db   :  { %v3196_v43 = vmax.f32 %v3193_v40, 0.0 }
0x14dd   :  { %v3200_v44 = vrot.slane %v3196_v43, 6 }
0x14df   :  { %3201 = vrot.lane.b32.xlu0 %v3200_v44, %s5586_s8 }
0x14e3   :  { %3261 = vrot.lane.b32.xlu0 %v4314_v6, %s5586_s8 }
0x1551   :  { %v3202_v55 = vpop.permute.xlu0 %3201 }
0x1552   :  { %3204 = vst.msk [vmem:[#allocation11] sm:$0x3c] %vm2500_vm15, %v3202_v55 }
0x1553   :  { %3205 = vst.msk [vmem:[#allocation11 + $0x8] sm:$0x3c] %vm2502_vm0, %v3202_v55 }
0x1555   :  { %v3262_v60 = vpop.permute.xlu0 %3261 }
0x1559   :  { %v3213_v62 = vld [vmem:[#allocation11] sm:$0xf]  ;;  %v3298_v54 = vld [vmem:[#allocation11] sm:$0xf0] }
0x155a   :  { %v3214_v50 = vld [vmem:[#allocation11 + $0x8] sm:$0xf]  ;;  %v3224_v0 = vmul.f32 %v3222_v59, %v3213_v62  ;;  %v3253_v4 = vld [vmem:[#allocation11] sm:$0x3c]  ;;  %v3299_v32 = vld [vmem:[#allocation11 + $0x8] sm:$0xf0]  ;;  %v3309_v13 = vmul.f32 %v3307_v10, %v3298_v54 }
0x155b   :  { %v3225_v1 = vmul.f32 %v3222_v59, %v3214_v50  ;;  %v3254_v8 = vld [vmem:[#allocation11 + $0x8] sm:$0x3c]  ;;  %v3264_v11 = vmul.f32 %v3262_v60, %v3253_v4  ;;  %v3310_v15 = vmul.f32 %v3307_v10, %v3299_v32  ;;  %v3206_v30 = vld [vmem:[#allocation11] sm:$0xf]  ;;  %v3240_v5 = vmul.f32 %v4312_v34, %v3214_v50  ;;  %v3287_v40 = vld [vmem:[#allocation11] sm:$0xf0] }
0x155c   :  { %v3265_v12 = vmul.f32 %v3262_v60, %v3254_v8  ;;  %3228 = vrot.lane.b32.xlu0 %v3224_v0, %s5586_s8  ;;  %v3313_v19 = vrot.slane %v3309_v13, 4  ;;  %v3242_v31 = vld [vmem:[#allocation11] sm:$0x3c]  ;;  %v3212_v17 = vmul.f32 %v4310_v9, %v3206_v30  ;;  %v3282_v43 = vmul.f32 %v4315_v27, %v3254_v8  ;;  %v4319_v62 = vld [vmem:[%s6781_s11 + $0x9] ss:$0 sm:$0xff]  ;;  %v3581_v30 = vld [vmem:[%s6784_s18 + $0x40] sm:$0xff] }
0x155d   :  { %3230 = vrot.lane.b32.xlu1 %v3225_v1, %s5586_s8  ;;  %v3268_v2 = vrot.slane %v3264_v11, 2  ;;  %v3314_v46 = vrot.slane %v3310_v15, 4  ;;  %v3248_v14 = vmul.f32 %v4313_v48, %v3242_v31  ;;  %v3293_v45 = vmul.f32 %v4316_v42, %v3287_v40  ;;  %v4322_v1 = vld [vmem:[%s6783_s16 + $0x1] ss:$0 sm:$0xff]  ;;  %v4328_v4 = vld [vmem:[%s6783_s16 + $0x7] ss:$0 sm:$0xff] }
0x155e   :  { %v3269_v16 = vrot.slane %v3265_v12, 2  ;;  %v3284_v35 = vrot.slane %v3282_v43, 2  ;;  %v3327_v53 = vmul.f32 %v4318_v49, %v3299_v32  ;;  %v4320_v8 = vld [vmem:[%s6782_s15 + $0x80] ss:$0 sm:$0xff]  ;;  %v4325_v13 = vld [vmem:[%s6783_s16 + $0x4] ss:$0 sm:$0xff] }
0x155f   :  { %v3250_v18 = vrot.slane %v3248_v14, 2  ;;  %v3295_v57 = vrot.slane %v3293_v45, 4  ;;  %v3573_v15 = vld [vmem:[%s6784_s18] sm:$0xff]  ;;  %v3582_v31 = vld [vmem:[%s6784_s18 + $0x48] sm:$0xff]  ;;  %v3583_v45 = vld [vmem:[%s6784_s18 + $0x50] sm:$0xff] }
0x1560   :  { %3270 = vrot.lane.b32.xlu0 %v3268_v2, %s5586_s8  ;;  %v3329_v61 = vrot.slane %v3327_v53, 4  ;;  %v3574_v2 = vld [vmem:[%s6784_s18 + $0x8] sm:$0xff]  ;;  %v3584_v49 = vld [vmem:[%s6784_s18 + $0x58] sm:$0xff]  ;;  %v4334_v53 = vld [vmem:[%s6785_s22 + $0x2] ss:$0 sm:$0xff] }
0x1561   :  { %3272 = vrot.lane.b32.xlu1 %v3269_v16, %s5586_s8  ;;  %v3575_v16 = vld [vmem:[%s6784_s18 + $0x10] sm:$0xff] }
0x1564   :  { %3315 = vrot.lane.b32.xlu0 %v3313_v19, %s5586_s8  ;;  %v5385_v19 = vpack.c.bf16 %v3574_v2, %v3573_v15 }
0x1565   :  { %3317 = vrot.lane.b32.xlu1 %v3314_v46, %s5586_s8  ;;  %v3576_v46 = vld [vmem:[%s6784_s18 + $0x18] sm:$0xff] }
0x1566   :  { %5386 = vmatpush3.bf16.msra.mxu0 %v5385_v19  ;;  %v5388_v20 = vpack.c.bf16 %v3576_v46, %v3575_v16 }
0x1567   :  { %5387 = vmatprep.subr.bf16.mxu0 %v5584_v3 }
0x1569   :  { %3455 = vrot.lane.b32.xlu1 %v4322_v1, %s5586_s8 }
0x156a   :  { %5389 = vmatpush3.bf16.msra.mxu0 %v5388_v20 }
0x156b   :  { %5390 = vmatprep.subr.bf16.mxu0 %v5584_v3 }
0x156d   :  { %3540 = vrot.lane.b32.xlu1 %v4328_v4, %s5586_s8 }
0x156e   :  { %5392 = vmatpush3.bf16.msra.mxu0 %v5391_v22 }
0x156f   :  { %5393 = vmatprep.subr.bf16.mxu0 %v5584_v3 }
0x1572   :  { %5395 = vmatpush3.bf16.msra.mxu0 %v5394_v52 }
0x1573   :  { %5396 = vmatprep.subr.bf16.mxu0 %v5584_v3 }
0x15ce   :  { %v3229_v33 = vpop.permute.xlu0 %3228 }
0x15cf   :  { %v3231_v37 = vpop.permute.xlu1 %3230 }
0x15d0   :  { %v3232_v23 = vsel %vm693_vm3, %v3229_v33, %v3231_v37  ;;  %v5397_v37 = vpack.c.bf16 %v3582_v31, %v3581_v30  ;;  %v3675_v31 = vld [vmem:[#allocation13] sm:$0x3] }
0x15d1   :  { %v3234_v39 = vadd.f32 %v3232_v23, %v3212_v17 }
0x15d2   :  { %v3271_v41 = vpop.permute.xlu0 %3270  ;;  %5398 = vmatpush3.bf16.msra.mxu0 %v5397_v37 }
0x15d3   :  { %v3241_v44 = vadd.f32 %v3240_v5, %v3234_v39  ;;  %v3273_v6 = vpop.permute.xlu1 %3272  ;;  %5399 = vmatprep.subr.bf16.mxu0 %v5584_v3 }
0x15d4   :  { %v3274_v51 = vsel %vm693_vm3, %v3271_v41, %v3273_v6 }
0x15d5   :  { %v3252_v47 = vadd.f32 %v3250_v18, %v3241_v44 }
0x15d6   :  { %v3316_v58 = vpop.permute.xlu0 %3315 }
0x15d7   :  { %v3276_v38 = vadd.f32 %v3274_v51, %v3252_v47  ;;  %v3318_v56 = vpop.permute.xlu1 %3317  ;;  %v5400_v51 = vpack.c.bf16 %v3584_v49, %v3583_v45 }
0x15d8   :  { %v3319_v60 = vsel %vm693_vm3, %v3316_v58, %v3318_v56  ;;  %v4337_v56 = vld [vmem:[%s6785_s22 + $0x5] ss:$0 sm:$0xff]  ;;  %v3588_v58 = vld [vmem:[%s6784_s18 + $0x78] sm:$0xff] }
0x15d9   :  { %v3286_v55 = vadd.f32 %v3284_v35, %v3276_v38  ;;  %v3585_v35 = vld [vmem:[%s6784_s18 + $0x60] sm:$0xff]  ;;  %v3586_v38 = vld [vmem:[%s6784_s18 + $0x68] sm:$0xff]  ;;  %5401 = vmatpush3.bf16.msra.mxu0 %v5400_v51 }
0x15da   :  { %5402 = vmatprep.subr.bf16.mxu0 %v5584_v3 }
0x15db   :  { %v3297_v59 = vadd.f32 %v3295_v57, %v3286_v55  ;;  %v3456_v29 = vpop.permute.xlu1 %3455  ;;  %v5403_v55 = vpack.c.bf16 %v3586_v38, %v3585_v35  ;;  %v3587_v57 = vld [vmem:[%s6784_s18 + $0x70] sm:$0xff] }
0x15dd   :  { %v3321_v28 = vadd.f32 %v3319_v60, %v3297_v59  ;;  %5404 = vmatpush3.bf16.msra.mxu0 %v5403_v55  ;;  %v5406_v59 = vpack.c.bf16 %v3588_v58, %v3587_v57  ;;  %v4340_v60 = vld [vmem:[%s6785_s22 + $0x8] ss:$0 sm:$0xff]  ;;  %v3776_v55 = vld [vmem:[%s6786_s23 + $0x10] sm:$0xff]  ;;  %v3778_v58 = vld [vmem:[%s6786_s23 + $0x20] sm:$0xff] }
0x15de   :  { %5405 = vmatprep.subr.bf16.mxu0 %v5584_v3 }
0x15df   :  { %v3331_v50 = vadd.f32 %v3329_v61, %v3321_v28  ;;  %v3541_v23 = vpop.permute.xlu1 %3540  ;;  %v4321_v61 = vld [vmem:[%s6783_s16] ss:$0 sm:$0xff] }
0x15e1   :  { %v3337_v63 = vadd.f32 %v4319_v62, %v3331_v50  ;;  %5407 = vmatpush3.bf16.msra.mxu0 %v5406_v59  ;;  %v4324_v50 = vld [vmem:[%s6783_s16 + $0x3] ss:$0 sm:$0xff]  ;;  %v3779_v59 = vld [vmem:[%s6786_s23 + $0x28] sm:$0xff] }
0x15e2   :  { %5444 = vmatprep.subr.bf16.mxu0 %v5584_v3 }
0x15e3   :  { %v3338_v0 = vmax.f32 %v3337_v63, 0.0  ;;  %v4323_v63 = vld [vmem:[%s6783_s16 + $0x2] ss:$0 sm:$0xff] }
0x15e5   :  { %4974 = vmatmul.mubr.f32.vlgmr.msra.gmra.mrb[20].mxu1 %v3338_v0 }
0x15e6   :  { %5027 = vmatprep.mubr.msk.f32.mxu1 %vm5585_vm5, %v6483_v7 }
0x16b8   :  { %v3426_v10 = vpop.f32.mrb[20].mxu1 }
0x16b9   :  { %v3427_v54 = vadd.f32 %v4320_v8, %v3426_v10  ;;  %v4975_v32 = vpop.f32.mrb[21].mxu1  ;;  %v4326_v10 = vld [vmem:[%s6783_s16 + $0x5] ss:$0 sm:$0xff] }
0x16bb   :  { %v3430_v11 = vmax.f32 %v3427_v54, 0.0 }
0x16bd   :  { %v3434_v12 = vrot.slane %v3430_v11, 6 }
0x16bf   :  { %3435 = vrot.lane.b32.xlu0 %v3434_v12, %s5586_s8 }
0x16c3   :  { %3495 = vrot.lane.b32.xlu0 %v4325_v13, %s5586_s8  ;;  %v4327_v13 = vld [vmem:[%s6783_s16 + $0x6] ss:$0 sm:$0xff] }
0x1731   :  { %v3436_v24 = vpop.permute.xlu0 %3435 }
0x1732   :  { %3438 = vst.msk [vmem:[#allocation12] sm:$0x3c] %vm2500_vm15, %v3436_v24 }
0x1733   :  { %3439 = vst.msk [vmem:[#allocation12 + $0x8] sm:$0x3c] %vm2502_vm0, %v3436_v24 }
0x1735   :  { %v3496_v9 = vpop.permute.xlu0 %3495 }
0x1739   :  { %v3447_v48 = vld [vmem:[#allocation12] sm:$0xf]  ;;  %v3532_v5 = vld [vmem:[#allocation12] sm:$0xf0] }
0x173a   :  { %v3448_v34 = vld [vmem:[#allocation12 + $0x8] sm:$0xf]  ;;  %v3458_v17 = vmul.f32 %v3456_v29, %v3447_v48  ;;  %v3487_v14 = vld [vmem:[#allocation12] sm:$0x3c]  ;;  %v6615_v39 = vld [vmem:[#allocation12 + $0x8] sm:$0xf0]  ;;  %v3543_v43 = vmul.f32 %v3541_v23, %v3532_v5 }
0x173b   :  { %v3459_v33 = vmul.f32 %v3456_v29, %v3448_v34  ;;  %v3488_v27 = vld [vmem:[#allocation12 + $0x8] sm:$0x3c]  ;;  %v3498_v40 = vmul.f32 %v3496_v9, %v3487_v14  ;;  %v3544_v44 = vmul.f32 %v3541_v23, %v6615_v39  ;;  %v3440_v28 = vld [vmem:[#allocation12] sm:$0xf]  ;;  %v3474_v32 = vmul.f32 %v4323_v63, %v3448_v34  ;;  %v3521_v12 = vld [vmem:[#allocation12] sm:$0xf0] }
0x173c   :  { %v3499_v42 = vmul.f32 %v3496_v9, %v3488_v27  ;;  %3462 = vrot.lane.b32.xlu0 %v3458_v17, %s5586_s8  ;;  %v3547_v41 = vrot.slane %v3543_v43, 4  ;;  %v3476_v62 = vld [vmem:[#allocation12] sm:$0x3c]  ;;  %v3446_v1 = vmul.f32 %v4321_v61, %v3440_v28  ;;  %v3516_v15 = vmul.f32 %v4326_v10, %v3488_v27  ;;  %v4330_v27 = vld [vmem:[%s6783_s16 + $0x9] ss:$0 sm:$0xff]  ;;  %v3780_v61 = vld [vmem:[%s6786_s23 + $0x30] sm:$0xff] }
0x173d   :  { %3464 = vrot.lane.b32.xlu1 %v3459_v33, %s5586_s8  ;;  %v3502_v6 = vrot.slane %v3498_v40, 2  ;;  %v3548_v47 = vrot.slane %v3544_v44, 4  ;;  %v3482_v8 = vmul.f32 %v4324_v50, %v3476_v62  ;;  %v3527_v21 = vmul.f32 %v4327_v13, %v3521_v12  ;;  %v3774_v40 = vld [vmem:[%s6786_s23] sm:$0xff]  ;;  %v3781_v28 = vld [vmem:[%s6786_s23 + $0x38] sm:$0xff]  ;;  %v3682_v63 = vld [vmem:[#allocation13 + $0x4] sm:$0x3] }
0x173e   :  { %v3503_v18 = vrot.slane %v3499_v42, 2  ;;  %v3518_v24 = vrot.slane %v3516_v15, 2  ;;  %v3561_v52 = vmul.f32 %v4329_v36, %v6615_v39  ;;  %v3775_v42 = vld [vmem:[%s6786_s23 + $0x8] sm:$0xff]  ;;  %v4331_v44 = vld [vmem:[%s6784_s18 + $0x80] ss:$0 sm:$0xff]  ;;  %v5418_v62 = vpack.c.bf16 %v3781_v28, %v3780_v61 }
0x173f   :  { %v3484_v19 = vrot.slane %v3482_v8, 2  ;;  %v3529_v30 = vrot.slane %v3527_v21, 4  ;;  %v5409_v43 = vpack.c.bf16 %v3775_v42, %v3774_v40  ;;  %v4332_v50 = vld [vmem:[%s6785_s22] ss:$0 sm:$0xff]  ;;  %v4335_v10 = vld [vmem:[%s6785_s22 + $0x3] ss:$0 sm:$0xff] }
0x1740   :  { %3504 = vrot.lane.b32.xlu0 %v3502_v6, %s5586_s8  ;;  %v3563_v33 = vrot.slane %v3561_v52, 4  ;;  %v4336_v13 = vld [vmem:[%s6785_s22 + $0x4] ss:$0 sm:$0xff]  ;;  %v4339_v21 = vld [vmem:[%s6785_s22 + $0x7] ss:$0 sm:$0xff]  ;;  %v4061_v61 = vld [vmem:[%s5751_s20 + $0x28] sm:$0xff] }
0x1741   :  { %3506 = vrot.lane.b32.xlu1 %v3503_v18, %s5586_s8  ;;  %5410 = vmatpush3.bf16.msra.mxu1 %v5409_v43  ;;  %v4341_v52 = vld [vmem:[%s6785_s22 + $0x9] ss:$0 sm:$0xff]  ;;  %v3972_v42 = vld [vmem:[%s5746_s12 + $0x40] sm:$0xff] }
0x1742   :  { %5411 = vmatprep.subr.bf16.mxu1 %v5584_v3  ;;  %v3973_v43 = vld [vmem:[%s5746_s12 + $0x48] sm:$0xff] }
0x1744   :  { %3549 = vrot.lane.b32.xlu0 %v3547_v41, %s5586_s8 }
0x1745   :  { %3551 = vrot.lane.b32.xlu1 %v3548_v47, %s5586_s8 }
0x1748   :  { %3696 = vrot.lane.b32.xlu0 %v4334_v53, %s5586_s8 }
0x1749   :  { %3727 = vrot.lane.b32.xlu1 %v4337_v56, %s5586_s8  ;;  %v3777_v56 = vld [vmem:[%s6786_s23 + $0x18] sm:$0xff] }
0x174a   :  { %v5412_v57 = vpack.c.bf16 %v3777_v56, %v3776_v55  ;;  %v4058_v55 = vld [vmem:[%s5751_s20 + $0x10] sm:$0xff] }
0x174c   :  { %3758 = vrot.lane.b32.xlu0 %v4340_v60, %s5586_s8  ;;  %5413 = vmatpush3.bf16.msra.mxu1 %v5412_v57  ;;  %v5415_v60 = vpack.c.bf16 %v3779_v59, %v3778_v58  ;;  %v4059_v58 = vld [vmem:[%s5751_s20 + $0x18] sm:$0xff] }
0x174d   :  { %5414 = vmatprep.subr.bf16.mxu1 %v5584_v3  ;;  %v5448_v59 = vpack.c.bf16 %v4059_v58, %v4058_v55 }
0x1750   :  { %5416 = vmatpush3.bf16.msra.mxu1 %v5415_v60  ;;  %v4060_v60 = vld [vmem:[%s5751_s20 + $0x20] sm:$0xff] }
0x1751   :  { %5417 = vmatprep.subr.bf16.mxu1 %v5584_v3  ;;  %v5451_v28 = vpack.c.bf16 %v4061_v61, %v4060_v60  ;;  %v4070_v61 = vld [vmem:[%s5751_s20 + $0x70] sm:$0xff] }
0x1754   :  { %5419 = vmatpush3.bf16.msra.mxu1 %v5418_v62  ;;  %v4062_v62 = vld [vmem:[%s5751_s20 + $0x30] sm:$0xff] }
0x1755   :  { %5420 = vmatprep.subr.bf16.mxu1 %v5584_v3 }
0x17ae   :  { %v3463_v4 = vpop.permute.xlu0 %3462 }
0x17af   :  { %v3465_v0 = vpop.permute.xlu1 %3464 }
0x17b0   :  { %v3466_v54 = vsel %vm693_vm3, %v3463_v4, %v3465_v0  ;;  %v4333_v0 = vld [vmem:[%s6785_s22 + $0x1] ss:$0 sm:$0xff] }
0x17b1   :  { %v3468_v11 = vadd.f32 %v3466_v54, %v3446_v1  ;;  %v3681_v1 = vmul.f32 %v4332_v50, %v3675_v31  ;;  %v3688_v4 = vmul.f32 %v4333_v0, %v3682_v63  ;;  %v4063_v50 = vld [vmem:[%s5751_s20 + $0x38] sm:$0xff]  ;;  %v4064_v0 = vld [vmem:[%s5751_s20 + $0x40] sm:$0xff] }
0x17b2   :  { %v3505_v46 = vpop.permute.xlu0 %3504  ;;  %v5454_v63 = vpack.c.bf16 %v4063_v50, %v4062_v62  ;;  %v4354_v50 = vld [vmem:[%s5746_s12 + $0x80] ss:$0 sm:$0xff] }
0x17b3   :  { %v3475_v2 = vadd.f32 %v3474_v32, %v3468_v11  ;;  %v3507_v16 = vpop.permute.xlu1 %3506  ;;  %v3689_v8 = vadd.f32 %v3688_v4, %v3681_v1  ;;  %v4065_v1 = vld [vmem:[%s5751_s20 + $0x48] sm:$0xff] }
0x17b4   :  { %v3508_v22 = vsel %vm693_vm3, %v3505_v46, %v3507_v16  ;;  %v4338_v16 = vld [vmem:[%s6785_s22 + $0x6] ss:$0 sm:$0xff]  ;;  %v5457_v4 = vpack.c.bf16 %v4065_v1, %v4064_v0 }
0x17b5   :  { %v3486_v20 = vadd.f32 %v3484_v19, %v3475_v2 }
0x17b6   :  { %v3550_v26 = vpop.permute.xlu0 %3549 }
0x17b7   :  { %v3510_v25 = vadd.f32 %v3508_v22, %v3486_v20  ;;  %v3552_v9 = vpop.permute.xlu1 %3551 }
0x17b8   :  { %v3553_v37 = vsel %vm693_vm3, %v3550_v26, %v3552_v9 }
0x17b9   :  { %v3520_v29 = vadd.f32 %v3518_v24, %v3510_v25 }
0x17ba   :  { %v3697_v34 = vpop.permute.xlu0 %3696 }
0x17bb   :  { %v3531_v48 = vadd.f32 %v3529_v30, %v3520_v29  ;;  %v3699_v17 = vmul.f32 %v3697_v34, %v3675_v31  ;;  %v3728_v49 = vpop.permute.xlu1 %3727  ;;  %v3965_v34 = vld [vmem:[%s5746_s12 + $0x8] sm:$0xff] }
0x17bd   :  { %v3555_v14 = vadd.f32 %v3553_v37, %v3531_v48  ;;  %3701 = vrot.lane.b32.xlu1 %v3699_v17, %s5586_s8  ;;  %v3964_v48 = vld [vmem:[%s5746_s12] sm:$0xff]  ;;  %v3966_v37 = vld [vmem:[%s5746_s12 + $0x10] sm:$0xff] }
0x17be   :  { %v3759_v45 = vpop.permute.xlu0 %3758  ;;  %v5421_v17 = vpack.c.bf16 %v3965_v34, %v3964_v48  ;;  %v3913_v48 = vld [vmem:[#allocation14 + $0x10] sm:$0xc]  ;;  %v4349_v34 = vld [vmem:[%s5741_s4 + $0x5] ss:$0 sm:$0xff] }
0x17bf   :  { %v3565_v23 = vadd.f32 %v3563_v33, %v3555_v14  ;;  %v3967_v33 = vld [vmem:[%s5746_s12 + $0x18] sm:$0xff] }
0x17c0   :  { %v5424_v14 = vpack.c.bf16 %v3967_v33, %v3966_v37  ;;  %v4348_v33 = vld [vmem:[%s5741_s4 + $0x4] ss:$0 sm:$0xff] }
0x17c1   :  { %v3571_v5 = vadd.f32 %v4330_v27, %v3565_v23  ;;  %v3968_v27 = vld [vmem:[%s5746_s12 + $0x20] sm:$0xff]  ;;  %v3969_v23 = vld [vmem:[%s5746_s12 + $0x28] sm:$0xff] }
0x17c3   :  { %v3572_v39 = vmax.f32 %v3571_v5, 0.0  ;;  %v5427_v5 = vpack.c.bf16 %v3969_v23, %v3968_v27  ;;  %v4350_v27 = vld [vmem:[%s5741_s4 + $0x6] ss:$0 sm:$0xff]  ;;  %v3919_v23 = vmul.f32 %v4349_v34, %v3913_v48 }
0x17c5   :  { %5009 = vmatmul.mubr.f32.vlgmr.msra.gmra.mrb[24].mxu0 %v3572_v39  ;;  %v3971_v39 = vld [vmem:[%s5746_s12 + $0x38] sm:$0xff] }
0x17c6   :  { %5097 = vmatprep.mubr.msk.f32.mxu0 %vm5585_vm5, %v6483_v7 }
0x182f   :  { %v3702_v54 = vpop.permute.xlu1 %3701 }
0x1830   :  { %v3704_v11 = vadd.f32 %v3702_v54, %v3689_v8  ;;  %v4066_v8 = vld [vmem:[%s5751_s20 + $0x50] sm:$0xff] }
0x1898   :  { %v3660_v6 = vpop.f32.mrb[24].mxu0 }
0x1899   :  { %v3661_v18 = vadd.f32 %v4331_v44, %v3660_v6  ;;  %v5010_v41 = vpop.f32.mrb[25].mxu0  ;;  %v5433_v44 = vpack.c.bf16 %v3973_v43, %v3972_v42  ;;  %v3974_v6 = vld [vmem:[%s5746_s12 + $0x50] sm:$0xff] }
0x189b   :  { %v3664_v47 = vmax.f32 %v3661_v18, 0.0  ;;  %v3975_v18 = vld [vmem:[%s5746_s12 + $0x58] sm:$0xff] }
0x189c   :  { %v5436_v41 = vpack.c.bf16 %v3975_v18, %v3974_v6  ;;  %v4352_v6 = vld [vmem:[%s5741_s4 + $0x8] ss:$0 sm:$0xff] }
0x189d   :  { %3668 = vst.msk [vmem:[#allocation13] sm:$0xc] %vm3667_vm1, %v3664_v47 }
0x189e   :  { %3670 = vst.msk [vmem:[#allocation13 + $0x4] sm:$0xc] %vm3669_vm2, %v3664_v47 }
0x189f   :  { %3672 = vst.msk [vmem:[#allocation13 + $0x8] sm:$0x3] %vm3671_vm4, %v3664_v47 }
0x18a0   :  { %3674 = vst.msk [vmem:[#allocation13 + $0xc] sm:$0x3] %vm3673_vm6, %v3664_v47  ;;  %v3976_v47 = vld [vmem:[%s5746_s12 + $0x60] sm:$0xff] }
0x18a4   :  { %v3736_v35 = vld [vmem:[#allocation13 + $0x2] sm:$0x3] }
0x18a5   :  { %v3761_v53 = vmul.f32 %v3759_v45, %v3736_v35  ;;  %v3744_v20 = vld [vmem:[#allocation13 + $0x6] sm:$0x3]  ;;  %v3742_v36 = vmul.f32 %v4338_v16, %v3736_v35  ;;  %v3977_v45 = vld [vmem:[%s5746_s12 + $0x68] sm:$0xff]  ;;  %v3979_v35 = vld [vmem:[%s5746_s12 + $0x78] sm:$0xff] }
0x18a6   :  { %v3705_v51 = vld [vmem:[#allocation13 + $0x8] sm:$0x3]  ;;  %v3750_v25 = vmul.f32 %v4339_v21, %v3744_v20 }
0x18a7   :  { %v3730_v38 = vmul.f32 %v3728_v49, %v3705_v51  ;;  %3763 = vrot.lane.b32.xlu1 %v3761_v53, %s5586_s8  ;;  %v3711_v32 = vmul.f32 %v4335_v10, %v3705_v51  ;;  %v3713_v12 = vld [vmem:[#allocation13 + $0xc] sm:$0x3]  ;;  %v5439_v49 = vpack.c.bf16 %v3977_v45, %v3976_v47  ;;  %v3978_v51 = vld [vmem:[%s5746_s12 + $0x70] sm:$0xff]  ;;  %v4057_v53 = vld [vmem:[%s5751_s20 + $0x8] sm:$0xff] }
0x18a8   :  { %v3719_v2 = vmul.f32 %v4336_v13, %v3713_v12  ;;  %v5442_v56 = vpack.c.bf16 %v3979_v35, %v3978_v51  ;;  %v4067_v10 = vld [vmem:[%s5751_s20 + $0x58] sm:$0xff]  ;;  %v4342_v13 = vld [vmem:[%s6786_s23 + $0x40] ss:$0 sm:$0xff] }
0x18a9   :  { %3732 = vrot.lane.b32.xlu0 %v3730_v38, %s5586_s8  ;;  %v3712_v15 = vadd.f32 %v3711_v32, %v3704_v11  ;;  %v4056_v38 = vld [vmem:[%s5751_s20] sm:$0xff]  ;;  %v5460_v54 = vpack.c.bf16 %v4067_v10, %v4066_v8  ;;  %v4069_v11 = vld [vmem:[%s5751_s20 + $0x68] sm:$0xff] }
0x18aa   :  { %v5445_v57 = vpack.c.bf16 %v4057_v53, %v4056_v38  ;;  %v4068_v32 = vld [vmem:[%s5751_s20 + $0x60] sm:$0xff] }
0x18ab   :  { %v3720_v19 = vadd.f32 %v3719_v2, %v3712_v15  ;;  %v5463_v12 = vpack.c.bf16 %v4069_v11, %v4068_v32  ;;  %v3868_v15 = vld [vmem:[#allocation14] sm:$0x3] }
0x18ac   :  { %5446 = vmatpush3.bf16.msra.mxu0 %v5445_v57  ;;  %v4344_v2 = vld [vmem:[%s5741_s4] ss:$0 sm:$0xff]  ;;  %v4353_v57 = vld [vmem:[%s5741_s4 + $0x9] ss:$0 sm:$0xff] }
0x18ad   :  { %5447 = vmatprep.subr.bf16.mxu0 %v5584_v3  ;;  %v4355_v8 = vld [vmem:[%s5751_s20 + $0x80] ss:$0 sm:$0xff] }
0x18b0   :  { %5449 = vmatpush3.bf16.msra.mxu0 %v5448_v59 }
0x18b1   :  { %5450 = vmatprep.subr.bf16.mxu0 %v5584_v3 }
0x18b4   :  { %5452 = vmatpush3.bf16.msra.mxu0 %v5451_v28  ;;  %v4071_v28 = vld [vmem:[%s5751_s20 + $0x78] sm:$0xff] }
0x18b5   :  { %5453 = vmatprep.subr.bf16.mxu0 %v5584_v3  ;;  %v5466_v62 = vpack.c.bf16 %v4071_v28, %v4070_v61 }
0x18b8   :  { %5455 = vmatpush3.bf16.msra.mxu0 %v5454_v63 }
0x18b9   :  { %5456 = vmatprep.subr.bf16.mxu0 %v5584_v3 }
0x18bc   :  { %5458 = vmatpush3.bf16.msra.mxu0 %v5457_v4 }
0x18bd   :  { %5459 = vmatprep.subr.bf16.mxu0 %v5584_v3 }
0x18c0   :  { %5461 = vmatpush3.bf16.msra.mxu0 %v5460_v54 }
0x18c1   :  { %5462 = vmatprep.subr.bf16.mxu0 %v5584_v3 }
0x18c4   :  { %5464 = vmatpush3.bf16.msra.mxu0 %v5463_v12 }
0x18c5   :  { %5465 = vmatprep.subr.bf16.mxu0 %v5584_v3 }
0x18c8   :  { %5467 = vmatpush3.bf16.msra.mxu0 %v5466_v62 }
0x1919   :  { %v3764_v29 = vpop.permute.xlu1 %3763 }
0x191b   :  { %v3733_v46 = vpop.permute.xlu0 %3732 }
0x191c   :  { %v3735_v22 = vadd.f32 %v3733_v46, %v3720_v19  ;;  %v3875_v19 = vld [vmem:[#allocation14 + $0x8] sm:$0x3]  ;;  %v4345_v46 = vld [vmem:[%s5741_s4 + $0x1] ss:$0 sm:$0xff] }
0x191e   :  { %v3743_v24 = vadd.f32 %v3742_v36, %v3735_v22  ;;  %v3874_v22 = vmul.f32 %v4344_v2, %v3868_v15 }
0x1920   :  { %v3751_v26 = vadd.f32 %v3750_v25, %v3743_v24  ;;  %v3881_v24 = vmul.f32 %v4345_v46, %v3875_v19  ;;  %v3883_v25 = vld [vmem:[#allocation14 + $0x10] sm:$0x3] }
0x1922   :  { %v3766_v9 = vadd.f32 %v3764_v29, %v3751_v26  ;;  %v4346_v26 = vld [vmem:[%s5741_s4 + $0x2] ss:$0 sm:$0xff]  ;;  %v4347_v29 = vld [vmem:[%s5741_s4 + $0x3] ss:$0 sm:$0xff] }
0x1924   :  { %v3772_v30 = vadd.f32 %v4341_v52, %v3766_v9  ;;  %v3891_v52 = vld [vmem:[#allocation14] sm:$0xc]  ;;  %v3882_v9 = vadd.f32 %v3881_v24, %v3874_v22 }
0x1926   :  { %v3773_v31 = vmax.f32 %v3772_v30, 0.0  ;;  %v3889_v30 = vmul.f32 %v4346_v26, %v3883_v25 }
0x1928   :  { %5028 = vmatmul.mubr.msk.f32.vlgmr.msra.gmra.mrb[22].mxu1 %vm693_vm3, %v3773_v31  ;;  %v3897_v31 = vmul.f32 %v4347_v29, %v3891_v52  ;;  %v3890_v37 = vadd.f32 %v3889_v30, %v3882_v9  ;;  %vm4147_vm3 = vcmask 74752  }
0x1929   :  { %5062 = vmatprep.mubr.msk.f32.mxu1 %vm5585_vm5, %v6483_v7  ;;  %5422 = vmatpush3.bf16.msra.mxu1 %v5421_v17  ;;  %v3970_v7 = vld [vmem:[%s5746_s12 + $0x30] sm:$0xff] }
0x192a   :  { %5423 = vmatprep.subr.bf16.mxu1 %v5584_v3  ;;  %v5430_v40 = vpack.c.bf16 %v3971_v39, %v3970_v7  ;;  %v3899_v17 = vrot.slane %v3897_v31, 2  ;;  %v3935_v7 = vld [vmem:[#allocation14 + $0x8] sm:$0x30]  ;;  %v4351_v39 = vld [vmem:[%s5741_s4 + $0x7] ss:$0 sm:$0xff]  ;;  %s5517_s4 = scalar_lea.vmem %s4156_s0, 32 }
0x192b   :  { %v3941_v47 = vmul.f32 %v4351_v39, %v3935_v7  ;;  %p5518_p0 = scmp.ne.s32.totalorder %s4156_s0, %s5517_s4  ;;  %p5523_p2 = scmp.lt.s32.totalorder %s5517_s4, %s5517_s4 }
0x192d   :  { %5425 = vmatpush3.bf16.msra.mxu1 %v5424_v14  ;;  %v3924_v14 = vld [vmem:[#allocation14] sm:$0x30]  ;;  %v3943_v38 = vrot.slane %v3941_v47, 4  ;;  %p5524_p3 = por %p5523_p2, %p5522_p1 }
0x192e   :  { %5426 = vmatprep.subr.bf16.mxu1 %v5584_v3  ;;  %v3930_v43 = vmul.f32 %v4350_v27, %v3924_v14 }
0x192f   :  { %p5525_p4 = pnand %p5524_p3, %p5518_p0 }
0x1931   :  { %5428 = vmatpush3.bf16.msra.mxu1 %v5427_v5 }
0x1932   :  { %5429 = vmatprep.subr.bf16.mxu1 %v5584_v3 }
0x1935   :  { %5431 = vmatpush3.bf16.msra.mxu1 %v5430_v40  ;;  %v3901_v40 = vadd.f32 %v3899_v17, %v3890_v37 }
0x1936   :  { %5432 = vmatprep.subr.bf16.mxu1 %v5584_v3 }
0x1939   :  { %5434 = vmatpush3.bf16.msra.mxu1 %v5433_v44  ;;  %v3946_v44 = vld [vmem:[#allocation14 + $0x10] sm:$0x30] }
0x193a   :  { %5435 = vmatprep.subr.bf16.mxu1 %v5584_v3  ;;  %v3952_v51 = vmul.f32 %v4352_v6, %v3946_v44 }
0x193c   :  { %v3954_v55 = vrot.slane %v3952_v51, 4 }
0x193d   :  { %5437 = vmatpush3.bf16.msra.mxu1 %v5436_v41  ;;  %v3921_v41 = vrot.slane %v3919_v23, 2 }
0x193e   :  { %5438 = vmatprep.subr.bf16.mxu1 %v5584_v3 }
0x1941   :  { %5440 = vmatpush3.bf16.msra.mxu1 %v5439_v49  ;;  %v3932_v49 = vrot.slane %v3930_v43, 4 }
0x1942   :  { %5441 = vmatprep.subr.bf16.mxu1 %v5584_v3 }
0x1945   :  { %5443 = vmatpush3.bf16.msra.mxu1 %v5442_v56 }
0x19fb   :  { %v3856_v16 = vpop.f32.mrb[22].mxu1 }
0x19fc   :  { %v3857_v20 = vadd.f32 %v4342_v13, %v3856_v16  ;;  %v5029_v21 = vpop.f32.mrb[23].mxu1 }
0x19fe   :  { %v3860_v36 = vmax.f32 %v3857_v20, 0.0 }
0x1a00   :  { %v3865_v3 = vrot.slane %v3860_v36, 6 }
0x1a02   :  { %3867 = vst [vmem:[#allocation14 + $0x8] sm:$0xc] %v3865_v3 }
0x1a09   :  { %v3902_v5 = vld [vmem:[#allocation14 + $0x8] sm:$0xc] }
0x1a0a   :  { %v3908_v42 = vmul.f32 %v4348_v33, %v3902_v5 }
0x1a0c   :  { %v3910_v18 = vrot.slane %v3908_v42, 2 }
0x1a0e   :  { %v3912_v45 = vadd.f32 %v3910_v18, %v3901_v40 }
0x1a10   :  { %v3923_v35 = vadd.f32 %v3921_v41, %v3912_v45 }
0x1a12   :  { %v3934_v53 = vadd.f32 %v3932_v49, %v3923_v35 }
0x1a14   :  { %v3945_v56 = vadd.f32 %v3943_v38, %v3934_v53 }
0x1a16   :  { %v3956_v58 = vadd.f32 %v3954_v55, %v3945_v56 }
0x1a18   :  { %v3962_v59 = vadd.f32 %v4353_v57, %v3956_v58 }
0x1a1a   :  { %v3963_v60 = vmax.f32 %v3962_v59, 0.0 }
0x1a1c   :  { %5063 = vmatmul.mubr.f32.vlgmr.msra.gmra.mrb[24].mxu1 %v3963_v60 }
0x1aef   :  { %v4051_v63 = vpop.f32.mrb[24].mxu1 }
0x1af0   :  { %v4052_v0 = vadd.f32 %v4354_v50, %v4051_v63  ;;  %v5064_v1 = vpop.f32.mrb[25].mxu1 }
0x1af2   :  { %v4055_v4 = vmax.f32 %v4052_v0, 0.0 }
0x1af4   :  { %5098 = vmatmul.mubr.f32.vlgmr.msra.gmra.mrb[26].mxu0 %v4055_v4 }
0x1bc7   :  { %v4143_v10 = vpop.f32.mrb[26].mxu0 }
0x1bc8   :  { %v4144_v54 = vadd.f32 %v4355_v8, %v4143_v10  ;;  %v5099_v32 = vpop.f32.mrb[27].mxu0 }
0x1bca   :  { %4148 = vst.msk [vmem:[#allocation15] sm:$0x3] %vm4147_vm3, %v4144_v54 }
0x1bcb   :  { %5528 = shalt.err (!%p5525_p4)
}
0x1bcc   :  { %s5529_s12 = scalar_lea.hbm %s5756_s27, 32 }
0x1bcd   :  { %p5530_p5 = scmp.ne.s32.totalorder %s5756_s27, %s5529_s12  ;;  %p5533_p6 = scmp.lt.u32.totalorder %s5529_s12, %s5756_s27 }
0x1bcf   :  { %p5535_p7 = pnand %p5533_p6, %p5530_p5 }
0x1bd1   :  { %5538 = shalt.err (!%p5535_p7)
}
0x1bd2   :  { %4158 = dma.vmem_to_hbm [thread:$0]  %s4156_s0, 32, %s5756_s27, [#allocation16]  }
0x1bd3   :  { %5539 = dma.done.wait [#allocation16], 32  }
0x1bd4   :  { %5540 = vsyncadd [#allocation16], 4294967264 }
0x1bd5   :  { %4162 = vsyncpa [#allocation16], 1 }

</bundles_post_ra>
